<compile_context>
chip_gen: v5e
topology: v5e:2x2
jax: 0.10.0
libtpu: 0.0.40
codegen_flags: <defaults>
</compile_context>

<pallas_src>
import functools

import jax
import jax.numpy as jnp
from jax import lax
from jax.experimental import pallas as pl
from jax.experimental.pallas import tpu as pltpu

_LANE = 128


def _round_up(x, m):
    return ((x + m - 1) // m) * m


def _itemsize(dtype):
    return jnp.dtype(dtype).itemsize


def _vmem_limit_bytes(cap_bytes):
    """Scoped-VMEM limit: generous on 128-MiB parts, clamped on v7x (64 MiB)."""
    try:
        phys = pltpu.get_tpu_info().vmem_capacity_bytes
    except Exception:
        phys = 128 * 1024 * 1024
    return int(min(cap_bytes, max(phys // 2, 16 * 1024 * 1024)))


def _pick_m_tile(M, target=512):
    """Largest tile <= target that divides M and is a multiple of 8."""
    for t in (target, 256, 128, 64, 32, 16, 8):
        if t <= M and M % t == 0 and t % 8 == 0:
            return t
    return None


# ---------------------------------------------------------------------------
# Pallas kernel 1: pointwise (1x1x1) conv  ->  out = X @ W + b
# ---------------------------------------------------------------------------
def _pointwise_conv_kernel(x_ref, w_ref, b_ref, o_ref):
    acc = jnp.dot(x_ref[...], w_ref[...], preferred_element_type=jnp.float32)
    acc = acc + b_ref[...].astype(jnp.float32)
    o_ref[...] = acc.astype(o_ref.dtype)


def pointwise_conv(x2d, w, b, *, compute_dtype=jnp.bfloat16, out_dtype=None,
                   tm_target=512):
    """x2d: (M, Cin), w: (Cin, Coutp), b: (1, Coutp) -> (M, Coutp)."""
    M, Cin = x2d.shape
    Coutp = w.shape[-1]
    out_dtype = compute_dtype if out_dtype is None else out_dtype

    cpad = 16 if _itemsize(compute_dtype) < 4 else 8
    xc = x2d.astype(compute_dtype)
    wc = w.astype(compute_dtype)
    Cinp = _round_up(Cin, cpad)
    if Cinp != Cin:
        xc = jnp.pad(xc, ((0, 0), (0, Cinp - Cin)))
        wc = jnp.pad(wc, ((0, Cinp - Cin), (0, 0)))

    tm = _pick_m_tile(M, tm_target)
    pad_m = 0
    if tm is None:
        # Ragged M: keep a LARGE tile and pad/slice (never fall back to tiny tiles).
        tm = min(tm_target, _round_up(M, 8))
        pad_m = _round_up(M, tm) - M
        xc = jnp.pad(xc, ((0, pad_m), (0, 0)))
    Mp = xc.shape[0]

    out = pl.pallas_call(
        _pointwise_conv_kernel,
        out_shape=jax.ShapeDtypeStruct((Mp, Coutp), out_dtype),
        grid=(Mp // tm,),
        in_specs=[
            pl.BlockSpec((tm, Cinp), lambda i: (i, 0)),
            pl.BlockSpec((Cinp, Coutp), lambda i: (0, 0)),   # resident weight
            pl.BlockSpec((1, Coutp), lambda i: (0, 0)),       # resident bias
        ],
        out_specs=pl.BlockSpec((tm, Coutp), lambda i: (i, 0)),
        compiler_params=pltpu.CompilerParams(
            dimension_semantics=("parallel",),
            vmem_limit_bytes=_vmem_limit_bytes(32 * 1024 * 1024)),
    )(xc, wc, b.astype(jnp.float32))
    return out[:M] if pad_m else out


# ---------------------------------------------------------------------------
# Pallas kernel 2: direct 3x3x3 'same' conv over the (virtual) channel-concat
# of several feature groups, fused bias + ReLU.
#   grid = (N, D_out); the full 3x3x3 reduction lives inside the kernel body.
# ---------------------------------------------------------------------------
def _conv3x3x3_kernel(*refs, num_groups, relu, H, W):
    nact = 3 * num_groups
    x_refs = refs[:nact]            # (group-major, kd-minor), each (1,1,H+2,W+2,Cgp)
    w_ref = refs[nact]              # (3, 3, Ktot, Coutp) resident, kd folded into K
    b_ref = refs[nact + 1]          # (1, Coutp) f32
    o_ref = refs[nact + 2]          # (1, 1, H, W, Coutp)
    xcat_ref = refs[nact + 3]       # (H+2, W+2, Ktot) staging scratch

    # Stage all (group, depth-tap) slabs side-by-side along the contraction axis.
    # This fuses the channel concat AND folds the 3 depth taps into K (big-K MXU).
    off = 0
    for i in range(nact):
        slab = x_refs[i][0, 0]                       # (H+2, W+2, Cgp)
        cgp = slab.shape[-1]
        xcat_ref[:, :, off:off + cgp] = slab
        off += cgp

    Ktot = xcat_ref.shape[-1]
    Coutp = o_ref.shape[-1]
    acc = jnp.broadcast_to(b_ref[...].astype(jnp.float32), (H * W, Coutp))
    for kw in range(3):
        s_kw = xcat_ref[:, kw:kw + W, :]             # one W-shift slab per kw (hoisted)
        for kh in range(3):
            xt = s_kw[kh:kh + H].reshape(H * W, Ktot)   # leading-dim slice: cheap
            acc = acc + jnp.dot(xt, w_ref[kh, kw],
                                preferred_element_type=jnp.float32)
    if relu:
        acc = jnp.maximum(acc, 0.0)
    o_ref[...] = acc.reshape(o_ref.shape).astype(o_ref.dtype)


def conv3x3x3_fused(features, weights, bias, *, relu=True,
                    out_dtype=jnp.float32, compute_dtype=jnp.bfloat16):
    """Direct 3x3x3 stride-1 pad-1 conv of concat(features, axis=C), no im2col in HBM.

    features: list of (N, D, H, W, Cg) arrays (the channel concat is fused).
    weights:  list of (3, 3, 3, Cg, Coutp) arrays, layout (kd, kh, kw, Cin, Cout).
    bias:     (1, Coutp), Coutp a multiple of 128 (lane-dense output stores).
    Returns (N, D, H, W, Coutp) with bias (+ ReLU) applied.
    """
    assert len(features) == len(weights) and features
    N, D, H, W = features[0].shape[:4]
    Coutp = weights[0].shape[-1]
    assert bias.shape == (1, Coutp)
    cpad = 16 if _itemsize(compute_dtype) < 4 else 8   # bf16 sublane packing

    xs, wgs = [], []
    for f, w in zip(features, weights):
        assert f.shape[:4] == (N, D, H, W)
        cg = f.shape[-1]
        assert w.shape == (3, 3, 3, cg, Coutp)
        cgp = _round_up(cg, cpad)
        # one fused pad: +1 'same' halo on D/H/W and channel round-up (zero, inert).
        xs.append(jnp.pad(f.astype(compute_dtype),
                          ((0, 0), (1, 1), (1, 1), (1, 1), (0, cgp - cg))))
        wp = jnp.pad(w.astype(compute_dtype),
                     ((0, 0), (0, 0), (0, 0), (0, cgp - cg), (0, 0)))
        # (kd,kh,kw,Cgp,Cout) -> (kh,kw,kd*Cgp,Cout): depth taps folded into K.
        wgs.append(jnp.transpose(wp, (1, 2, 0, 3, 4)).reshape(3, 3, 3 * cgp, Coutp))
    w_packed = wgs[0] if len(wgs) == 1 else jnp.concatenate(wgs, axis=2)
    Ktot = w_packed.shape[2]

    # Activation operands: each group passed 3x, once per depth tap; depth block
    # size 1 with block index d + kd gives the 3-deep 'same' window in-kernel.
    act_args, in_specs = [], []
    for x in xs:
        cgp = x.shape[-1]
        for kd in range(3):
            act_args.append(x)
            in_specs.append(pl.BlockSpec(
                (1, 1, H + 2, W + 2, cgp),
                lambda n, d, _kd=kd: (n, d + _kd, 0, 0, 0)))
    # Grid-resident weights & bias: constant block index -> fetched once per call.
    in_specs.append(pl.BlockSpec((3, 3, Ktot, Coutp), lambda n, d: (0, 0, 0, 0)))
    in_specs.append(pl.BlockSpec((1, Coutp), lambda n, d: (0, 0)))

    kernel = functools.partial(_conv3x3x3_kernel, num_groups=len(xs),
                               relu=relu, H=H, W=W)

    return pl.pallas_call(
        kernel,
        out_shape=jax.ShapeDtypeStruct((N, D, H, W, Coutp), out_dtype),
        grid=(N, D),
        in_specs=in_specs,
        out_specs=pl.BlockSpec((1, 1, H, W, Coutp), lambda n, d: (n, d, 0, 0, 0)),
        scratch_shapes=[pltpu.VMEM((H + 2, W + 2, Ktot), compute_dtype)],
        compiler_params=pltpu.CompilerParams(
            dimension_semantics=("parallel", "parallel"),
            vmem_limit_bytes=_vmem_limit_bytes(64 * 1024 * 1024)),
    )(*act_args, w_packed, bias.astype(jnp.float32))


# ---------------------------------------------------------------------------
# JAX glue: gather-free 2x trilinear upsample (PyTorch align_corners=False).
# Runs in compute_dtype (bf16 in the performance path).
# ---------------------------------------------------------------------------
def _up2x_axis(x, axis):
    S = x.shape[axis]
    x_prev = jnp.concatenate([lax.slice_in_dim(x, 0, 1, axis=axis),
                              lax.slice_in_dim(x, 0, S - 1, axis=axis)], axis=axis)
    x_next = jnp.concatenate([lax.slice_in_dim(x, 1, S, axis=axis),
                              lax.slice_in_dim(x, S - 1, S, axis=axis)], axis=axis)
    even = 0.25 * x_prev + 0.75 * x          # out[2m]   (m=0 clamps -> x[0])
    odd = 0.75 * x + 0.25 * x_next           # out[2m+1] (m=S-1 clamps -> x[S-1])
    y = jnp.stack([even, odd], axis=axis + 1)
    new_shape = list(x.shape)
    new_shape[axis] = 2 * S
    return y.reshape(new_shape)


def upsample_trilinear_2x(x_ndhwc):
    for axis in (1, 2, 3):
        x_ndhwc = _up2x_axis(x_ndhwc, axis)
    return x_ndhwc


# ---------------------------------------------------------------------------
# Parameters: PyTorch-layout init + packing into lane-dense kernel layout.
# ---------------------------------------------------------------------------
def init_unet_up_params(key, in_size, out_size, n_concat=2):
    conv1_in = in_size + (n_concat - 2) * out_size

    def kaiming_w(k, cin, cout, ks):
        fan_in = cin * ks ** 3
        return jax.random.normal(k, (cout, cin, ks, ks, ks), jnp.float32) * (2.0 / fan_in) ** 0.5

    def conv_b(k, cin, cout, ks):
        bound = 1.0 / (cin * ks ** 3) ** 0.5
        return jax.random.uniform(k, (cout,), jnp.float32, -bound, bound)

    ks_ = jax.random.split(key, 6)
    return {
        "up_w": kaiming_w(ks_[0], in_size, out_size, 1),     # (O, I, 1,1,1)
        "up_b": conv_b(ks_[1], in_size, out_size, 1),
        "c1_w": kaiming_w(ks_[2], conv1_in, out_size, 3),    # (O, I, 3,3,3)
        "c1_b": conv_b(ks_[3], conv1_in, out_size, 3),
        "c2_w": kaiming_w(ks_[4], out_size, out_size, 3),
        "c2_b": conv_b(ks_[5], out_size, out_size, 3),
    }


def pack_unet_up_params(tp, out_size):
    """PyTorch layout -> kernel layout: (kd,kh,kw,Cin,Cout) with Cout padded to 128."""
    coutp = _round_up(out_size, _LANE)

    def pad_out(a):
        return jnp.pad(a, [(0, 0)] * (a.ndim - 1) + [(0, coutp - a.shape[-1])])

    up_w = pad_out(jnp.transpose(tp["up_w"][:, :, 0, 0, 0], (1, 0)))      # (I, Coutp)
    up_b = pad_out(tp["up_b"].reshape(1, -1))
    c1_w = pad_out(jnp.transpose(tp["c1_w"], (2, 3, 4, 1, 0)))            # (3,3,3,I,Coutp)
    c1_b = pad_out(tp["c1_b"].reshape(1, -1))
    c2_w = pad_out(jnp.transpose(tp["c2_w"], (2, 3, 4, 1, 0)))
    c2_w = jnp.pad(c2_w, ((0, 0), (0, 0), (0, 0), (0, coutp - out_size), (0, 0)))
    c2_b = pad_out(tp["c2_b"].reshape(1, -1))
    return {"up_w": up_w, "up_b": up_b, "c1_w": c1_w, "c1_b": c1_b,
            "c2_w": c2_w, "c2_b": c2_b}


# ---------------------------------------------------------------------------
# unetUp.forward (Pallas path)
# ---------------------------------------------------------------------------
def unet_up_forward(params, high_feature, *low_features, out_size,
                    compute_dtype=jnp.bfloat16):
    """high_feature: (N, in_size, D, H, W); low_features: (N, c_i, 2D, 2H, 2W).

    Returns (N, out_size, 2D, 2H, 2W), matching the PyTorch module.
    """
    x = jnp.transpose(high_feature, (0, 2, 3, 4, 1))        # NCDHW -> NDHWC
    N, D, H, W, Cin = x.shape

    # 1x1 conv BEFORE the upsample (commutes exactly: interpolation weights sum
    # to 1) -> 8x fewer pointwise FLOPs; emit compute_dtype so the upsample runs
    # in bf16 in the performance path.
    y0 = pointwise_conv(x.reshape(N * D * H * W, Cin), params["up_w"],
                        params["up_b"], compute_dtype=compute_dtype,
                        out_dtype=compute_dtype)
    y0 = y0.reshape(N, D, H, W, -1)[..., :out_size]

    # gather-free 2x trilinear upsample (on out_size channels only, compute dtype).
    y = upsample_trilinear_2x(y0)                           # (N, 2D, 2H, 2W, out_size)

    # concat fused into conv1: one weight slice per feature group.
    lows = [jnp.transpose(lf, (0, 2, 3, 4, 1)) for lf in low_features]
    feats = [y] + lows
    group_ch = [out_size] + [lf.shape[-1] for lf in lows]
    assert sum(group_ch) == params["c1_w"].shape[3], "channel mismatch with conv1"
    w_groups, off = [], 0
    for c in group_ch:
        w_groups.append(params["c1_w"][:, :, :, off:off + c, :])
        off += c

    h1 = conv3x3x3_fused(feats, w_groups, params["c1_b"], relu=True,
                         out_dtype=compute_dtype, compute_dtype=compute_dtype)
    h2 = conv3x3x3_fused([h1], [params["c2_w"]], params["c2_b"], relu=True,
                         out_dtype=jnp.float32, compute_dtype=compute_dtype)

    out = h2[..., :out_size]                                # drop lane padding
    return jnp.transpose(out, (0, 4, 1, 2, 3))              # NDHWC -> NCDHW


# ---------------------------------------------------------------------------
# Pure-JAX reference (original op order: upsample -> 1x1 conv -> concat -> convs)
# ---------------------------------------------------------------------------
def unet_up_reference(tp, high_feature, *low_features):
    x = jnp.transpose(high_feature, (0, 2, 3, 4, 1)).astype(jnp.float32)
    x = upsample_trilinear_2x(x)
    y = jnp.einsum("ndhwi,oi->ndhwo", x, tp["up_w"][:, :, 0, 0, 0],
                   precision=lax.Precision.HIGHEST) + tp["up_b"]
    feats = [y] + [jnp.transpose(lf, (0, 2, 3, 4, 1)) for lf in low_features]
    z = jnp.concatenate(feats, axis=-1)

    def conv3(z, w_torch, b_torch):
        w = jnp.transpose(w_torch, (2, 3, 4, 1, 0))          # (kd,kh,kw,I,O)
        out = lax.conv_general_dilated(
            z, w, window_strides=(1, 1, 1), padding="SAME",
            dimension_numbers=("NDHWC", "DHWIO", "NDHWC"),
            precision=lax.Precision.HIGHEST)
        return jax.nn.relu(out + b_torch)

    z = conv3(z, tp["c1_w"], tp["c1_b"])
    z = conv3(z, tp["c2_w"], tp["c2_b"])
    return jnp.transpose(z, (0, 4, 1, 2, 3))


if __name__ == "__main__":
    key = jax.random.PRNGKey(0)
    k_high, k_low, k_params = jax.random.split(key, 3)

    # Small shapes consistent with the module (in_size = 2 * out_size; the low
    # feature has out_size channels at 2x spatial resolution).
    in_size, out_size, n_concat = 8, 4, 2
    N, D, H, W = 2, 4, 4, 4

    high = jax.random.normal(k_high, (N, in_size, D, H, W), jnp.float32)
    low = jax.random.normal(k_low, (N, in_size - out_size, 2 * D, 2 * H, 2 * W),
                            jnp.float32)

    torch_params = init_unet_up_params(k_params, in_size, out_size, n_concat)
    packed = pack_unet_up_params(torch_params, out_size)

    # --- correctness: f32 Pallas path vs pure-JAX reference -----------------
    f32_fwd = jax.jit(functools.partial(unet_up_forward, out_size=out_size,
                                        compute_dtype=jnp.float32))
    out_f32 = jax.block_until_ready(f32_fwd(packed, high, low))
    ref = jax.block_until_ready(unet_up_reference(torch_params, high, low))
    assert out_f32.shape == (N, out_size, 2 * D, 2 * H, 2 * W), out_f32.shape
    scale = float(jnp.max(jnp.abs(ref)))
    diff = float(jnp.max(jnp.abs(out_f32 - ref)))
    if not diff <= 1e-2 * (1.0 + scale):
        raise AssertionError(f"f32 mismatch vs reference: max|diff|={diff}, max|ref|={scale}")

    # --- performance path: bf16 MXU operands, f32 accumulation --------------
    bf16_fwd = jax.jit(functools.partial(unet_up_forward, out_size=out_size,
                                         compute_dtype=jnp.bfloat16))
    out_bf16 = jax.block_until_ready(bf16_fwd(packed, high, low))
    assert out_bf16.shape == (N, out_size, 2 * D, 2 * H, 2 * W), out_bf16.shape
    assert out_bf16.dtype == jnp.float32
    assert bool(jnp.all(jnp.isfinite(out_bf16)))
    # loose explicit bf16-vs-reference check (bf16 operands, f32 accumulation).
    diff_bf16 = float(jnp.max(jnp.abs(out_bf16 - ref)))
    if not diff_bf16 <= 1e-1 * (1.0 + scale):
        raise AssertionError(f"bf16 mismatch vs reference: max|diff|={diff_bf16}, max|ref|={scale}")

    print("KERNEL_OK")
</pallas_src>

<mosaic_0001>
module attributes {stable_mosaic.version = 11 : i64} {
  func.func @_pointwise_conv_kernel(%arg0: i32, %arg1: memref<128x8xf32, #tpu.memory_space<vmem>>, %arg2: memref<8x128xf32, #tpu.memory_space<vmem>>, %arg3: memref<1x128xf32, #tpu.memory_space<vmem>>, %arg4: memref<128x128xf32, #tpu.memory_space<vmem>>) attributes {dimension_semantics = [#tpu.dimension_semantics<parallel>], iteration_bounds = array<i64: 1>, scalar_prefetch = 0 : i64, scratch_operands = 0 : i64, tpu.core_type = #tpu.core_type<tc>, window_params = [{transform_indices = @transform_0, window_bounds = array<i64: 128, 8>}, {pipeline_mode = #tpu.pipeline_mode<synchronous>, transform_indices = @transform_1, window_bounds = array<i64: 8, 128>}, {pipeline_mode = #tpu.pipeline_mode<synchronous>, transform_indices = @transform_2, window_bounds = array<i64: 1, 128>}, {transform_indices = @transform_3, window_bounds = array<i64: 128, 128>}]} {
    %c0 = arith.constant 0 : index
    %c0_0 = arith.constant 0 : index
    %0 = vector.load %arg1[%c0, %c0_0] : memref<128x8xf32, #tpu.memory_space<vmem>>, vector<128x8xf32>
    %c0_1 = arith.constant 0 : index
    %c0_2 = arith.constant 0 : index
    %1 = vector.load %arg2[%c0_1, %c0_2] : memref<8x128xf32, #tpu.memory_space<vmem>>, vector<8x128xf32>
    %cst = arith.constant dense<0.000000e+00> : vector<128x128xf32>
    %2 = tpu.matmul %0, %1, %cst {dimension_numbers = #tpu.dot_dimension_numbers<[1], [0], [0], [1], [0, 0, 1, 1], [], []>} : vector<128x8xf32>, vector<8x128xf32>, vector<128x128xf32> -> vector<128x128xf32>
    %c0_3 = arith.constant 0 : index
    %c0_4 = arith.constant 0 : index
    %3 = vector.load %arg3[%c0_3, %c0_4] : memref<1x128xf32, #tpu.memory_space<vmem>>, vector<1x128xf32>
    %4 = vector.broadcast %3 : vector<1x128xf32> to vector<128x128xf32>
    %5 = arith.addf %2, %4 : vector<128x128xf32>
    %c0_5 = arith.constant 0 : index
    %c0_6 = arith.constant 0 : index
    %6 = vector.load %arg4[%c0_5, %c0_6] : memref<128x128xf32, #tpu.memory_space<vmem>>, vector<128x128xf32>
    tpu.vector_store %arg4[%c0_5, %c0_6], %5 {strides = array<i32>} : memref<128x128xf32, #tpu.memory_space<vmem>>, vector<128x128xf32>,
    return
  }
  func.func @transform_0(%arg0: i32) -> (i32, i32) {
    %c0_i32 = arith.constant 0 : i32
    %c0_i32_0 = arith.constant 0 : i32
    return %arg0, %c0_i32 : i32, i32
  }
  func.func @transform_1(%arg0: i32) -> (i32, i32) {
    %c0_i32 = arith.constant 0 : i32
    %c0_i32_0 = arith.constant 0 : i32
    %c0_i32_1 = arith.constant 0 : i32
    return %c0_i32, %c0_i32_0 : i32, i32
  }
  func.func @transform_2(%arg0: i32) -> (i32, i32) {
    %c0_i32 = arith.constant 0 : i32
    %c0_i32_0 = arith.constant 0 : i32
    %c0_i32_1 = arith.constant 0 : i32
    return %c0_i32, %c0_i32_0 : i32, i32
  }
  func.func @transform_3(%arg0: i32) -> (i32, i32) {
    %c0_i32 = arith.constant 0 : i32
    %c0_i32_0 = arith.constant 0 : i32
    return %arg0, %c0_i32 : i32, i32
  }
}

module attributes {stable_mosaic.version = 11 : i64} {
  func.func @_conv3x3x3_kernel(%arg0: i32, %arg1: i32, %arg2: memref<1x1x10x10x8xf32, #tpu.memory_space<vmem>>, %arg3: memref<1x1x10x10x8xf32, #tpu.memory_space<vmem>>, %arg4: memref<1x1x10x10x8xf32, #tpu.memory_space<vmem>>, %arg5: memref<1x1x10x10x8xf32, #tpu.memory_space<vmem>>, %arg6: memref<1x1x10x10x8xf32, #tpu.memory_space<vmem>>, %arg7: memref<1x1x10x10x8xf32, #tpu.memory_space<vmem>>, %arg8: memref<3x3x48x128xf32, #tpu.memory_space<vmem>>, %arg9: memref<1x128xf32, #tpu.memory_space<vmem>>, %arg10: memref<1x1x8x8x128xf32, #tpu.memory_space<vmem>>, %arg11: memref<10x10x48xf32, #tpu.memory_space<vmem>>) attributes {dimension_semantics = [#tpu.dimension_semantics<parallel>, #tpu.dimension_semantics<parallel>], iteration_bounds = array<i64: 2, 8>, scalar_prefetch = 0 : i64, scratch_operands = 1 : i64, tpu.core_type = #tpu.core_type<tc>, window_params = [{transform_indices = @transform_0, window_bounds = array<i64: 1, 1, 10, 10, 8>}, {transform_indices = @transform_1, window_bounds = array<i64: 1, 1, 10, 10, 8>}, {transform_indices = @transform_2, window_bounds = array<i64: 1, 1, 10, 10, 8>}, {transform_indices = @transform_3, window_bounds = array<i64: 1, 1, 10, 10, 8>}, {transform_indices = @transform_4, window_bounds = array<i64: 1, 1, 10, 10, 8>}, {transform_indices = @transform_5, window_bounds = array<i64: 1, 1, 10, 10, 8>}, {pipeline_mode = #tpu.pipeline_mode<synchronous>, transform_indices = @transform_6, window_bounds = array<i64: 3, 3, 48, 128>}, {pipeline_mode = #tpu.pipeline_mode<synchronous>, transform_indices = @transform_7, window_bounds = array<i64: 1, 128>}, {transform_indices = @transform_8, window_bounds = array<i64: 1, 1, 8, 8, 128>}]} {
    %c0 = arith.constant 0 : index
    %c0_0 = arith.constant 0 : index
    %c0_1 = arith.constant 0 : index
    %c0_2 = arith.constant 0 : index
    %c0_3 = arith.constant 0 : index
    %0 = vector.load %arg2[%c0, %c0_0, %c0_1, %c0_2, %c0_3] : memref<1x1x10x10x8xf32, #tpu.memory_space<vmem>>, vector<1x1x10x10x8xf32>
    %1 = vector.shape_cast %0 : vector<1x1x10x10x8xf32> to vector<10x10x8xf32>
    %c0_4 = arith.constant 0 : index
    %c0_5 = arith.constant 0 : index
    %c0_6 = arith.constant 0 : index
    %2 = vector.load %arg11[%c0_4, %c0_5, %c0_6] : memref<10x10x48xf32, #tpu.memory_space<vmem>>, vector<10x10x8xf32>
    tpu.vector_store %arg11[%c0_4, %c0_5, %c0_6], %1 {strides = array<i32>} : memref<10x10x48xf32, #tpu.memory_space<vmem>>, vector<10x10x8xf32>,
    %c0_7 = arith.constant 0 : index
    %c0_8 = arith.constant 0 : index
    %c0_9 = arith.constant 0 : index
    %c0_10 = arith.constant 0 : index
    %c0_11 = arith.constant 0 : index
    %3 = vector.load %arg3[%c0_7, %c0_8, %c0_9, %c0_10, %c0_11] : memref<1x1x10x10x8xf32, #tpu.memory_space<vmem>>, vector<1x1x10x10x8xf32>
    %4 = vector.shape_cast %3 : vector<1x1x10x10x8xf32> to vector<10x10x8xf32>
    %c0_12 = arith.constant 0 : index
    %c0_13 = arith.constant 0 : index
    %c8 = arith.constant 8 : index
    %5 = vector.load %arg11[%c0_12, %c0_13, %c8] : memref<10x10x48xf32, #tpu.memory_space<vmem>>, vector<10x10x8xf32>
    tpu.vector_store %arg11[%c0_12, %c0_13, %c8], %4 {strides = array<i32>} : memref<10x10x48xf32, #tpu.memory_space<vmem>>, vector<10x10x8xf32>,
    %c0_14 = arith.constant 0 : index
    %c0_15 = arith.constant 0 : index
    %c0_16 = arith.constant 0 : index
    %c0_17 = arith.constant 0 : index
    %c0_18 = arith.constant 0 : index
    %6 = vector.load %arg4[%c0_14, %c0_15, %c0_16, %c0_17, %c0_18] : memref<1x1x10x10x8xf32, #tpu.memory_space<vmem>>, vector<1x1x10x10x8xf32>
    %7 = vector.shape_cast %6 : vector<1x1x10x10x8xf32> to vector<10x10x8xf32>
    %c0_19 = arith.constant 0 : index
    %c0_20 = arith.constant 0 : index
    %c16 = arith.constant 16 : index
    %8 = vector.load %arg11[%c0_19, %c0_20, %c16] : memref<10x10x48xf32, #tpu.memory_space<vmem>>, vector<10x10x8xf32>
    tpu.vector_store %arg11[%c0_19, %c0_20, %c16], %7 {strides = array<i32>} : memref<10x10x48xf32, #tpu.memory_space<vmem>>, vector<10x10x8xf32>,
    %c0_21 = arith.constant 0 : index
    %c0_22 = arith.constant 0 : index
    %c0_23 = arith.constant 0 : index
    %c0_24 = arith.constant 0 : index
    %c0_25 = arith.constant 0 : index
    %9 = vector.load %arg5[%c0_21, %c0_22, %c0_23, %c0_24, %c0_25] : memref<1x1x10x10x8xf32, #tpu.memory_space<vmem>>, vector<1x1x10x10x8xf32>
    %10 = vector.shape_cast %9 : vector<1x1x10x10x8xf32> to vector<10x10x8xf32>
    %c0_26 = arith.constant 0 : index
    %c0_27 = arith.constant 0 : index
    %c24 = arith.constant 24 : index
    %11 = vector.load %arg11[%c0_26, %c0_27, %c24] : memref<10x10x48xf32, #tpu.memory_space<vmem>>, vector<10x10x8xf32>
    tpu.vector_store %arg11[%c0_26, %c0_27, %c24], %10 {strides = array<i32>} : memref<10x10x48xf32, #tpu.memory_space<vmem>>, vector<10x10x8xf32>,
    %c0_28 = arith.constant 0 : index
    %c0_29 = arith.constant 0 : index
    %c0_30 = arith.constant 0 : index
    %c0_31 = arith.constant 0 : index
    %c0_32 = arith.constant 0 : index
    %12 = vector.load %arg6[%c0_28, %c0_29, %c0_30, %c0_31, %c0_32] : memref<1x1x10x10x8xf32, #tpu.memory_space<vmem>>, vector<1x1x10x10x8xf32>
    %13 = vector.shape_cast %12 : vector<1x1x10x10x8xf32> to vector<10x10x8xf32>
    %c0_33 = arith.constant 0 : index
    %c0_34 = arith.constant 0 : index
    %c32 = arith.constant 32 : index
    %14 = vector.load %arg11[%c0_33, %c0_34, %c32] : memref<10x10x48xf32, #tpu.memory_space<vmem>>, vector<10x10x8xf32>
    tpu.vector_store %arg11[%c0_33, %c0_34, %c32], %13 {strides = array<i32>} : memref<10x10x48xf32, #tpu.memory_space<vmem>>, vector<10x10x8xf32>,
    %c0_35 = arith.constant 0 : index
    %c0_36 = arith.constant 0 : index
    %c0_37 = arith.constant 0 : index
    %c0_38 = arith.constant 0 : index
    %c0_39 = arith.constant 0 : index
    %15 = vector.load %arg7[%c0_35, %c0_36, %c0_37, %c0_38, %c0_39] : memref<1x1x10x10x8xf32, #tpu.memory_space<vmem>>, vector<1x1x10x10x8xf32>
    %16 = vector.shape_cast %15 : vector<1x1x10x10x8xf32> to vector<10x10x8xf32>
    %c0_40 = arith.constant 0 : index
    %c0_41 = arith.constant 0 : index
    %c40 = arith.constant 40 : index
    %17 = vector.load %arg11[%c0_40, %c0_41, %c40] : memref<10x10x48xf32, #tpu.memory_space<vmem>>, vector<10x10x8xf32>
    tpu.vector_store %arg11[%c0_40, %c0_41, %c40], %16 {strides = array<i32>} : memref<10x10x48xf32, #tpu.memory_space<vmem>>, vector<10x10x8xf32>,
    %c0_42 = arith.constant 0 : index
    %c0_43 = arith.constant 0 : index
    %18 = vector.load %arg9[%c0_42, %c0_43] : memref<1x128xf32, #tpu.memory_space<vmem>>, vector<1x128xf32>
    %19 = vector.shape_cast %18 : vector<1x128xf32> to vector<1x128xf32>
    %20 = vector.broadcast %19 : vector<1x128xf32> to vector<64x128xf32>
    %c0_44 = arith.constant 0 : index
    %c0_45 = arith.constant 0 : index
    %c0_46 = arith.constant 0 : index
    %21 = vector.load %arg11[%c0_44, %c0_45, %c0_46] : memref<10x10x48xf32, #tpu.memory_space<vmem>>, vector<10x8x48xf32>
    %22 = vector.extract_strided_slice %21 {offsets = [0, 0, 0], sizes = [8, 8, 48], strides = [1, 1, 1]} : vector<10x8x48xf32> to vector<8x8x48xf32>
    %23 = vector.shape_cast %22 : vector<8x8x48xf32> to vector<64x48xf32>
    %c0_47 = arith.constant 0 : index
    %c0_48 = arith.constant 0 : index
    %c0_49 = arith.constant 0 : index
    %c0_50 = arith.constant 0 : index
    %24 = vector.load %arg8[%c0_47, %c0_48, %c0_49, %c0_50] : memref<3x3x48x128xf32, #tpu.memory_space<vmem>>, vector<1x1x48x128xf32>
    %25 = vector.shape_cast %24 : vector<1x1x48x128xf32> to vector<48x128xf32>
    %cst = arith.constant dense<0.000000e+00> : vector<64x128xf32>
    %26 = tpu.matmul %23, %25, %cst {dimension_numbers = #tpu.dot_dimension_numbers<[1], [0], [0], [1], [0, 0, 1, 1], [], []>} : vector<64x48xf32>, vector<48x128xf32>, vector<64x128xf32> -> vector<64x128xf32>
    %27 = arith.addf %20, %26 : vector<64x128xf32>
    %28 = vector.extract_strided_slice %21 {offsets = [1, 0, 0], sizes = [8, 8, 48], strides = [1, 1, 1]} : vector<10x8x48xf32> to vector<8x8x48xf32>
    %29 = vector.shape_cast %28 : vector<8x8x48xf32> to vector<64x48xf32>
    %c1 = arith.constant 1 : index
    %c0_51 = arith.constant 0 : index
    %c0_52 = arith.constant 0 : index
    %c0_53 = arith.constant 0 : index
    %30 = vector.load %arg8[%c1, %c0_51, %c0_52, %c0_53] : memref<3x3x48x128xf32, #tpu.memory_space<vmem>>, vector<1x1x48x128xf32>
    %31 = vector.shape_cast %30 : vector<1x1x48x128xf32> to vector<48x128xf32>
    %cst_54 = arith.constant dense<0.000000e+00> : vector<64x128xf32>
    %32 = tpu.matmul %29, %31, %cst_54 {dimension_numbers = #tpu.dot_dimension_numbers<[1], [0], [0], [1], [0, 0, 1, 1], [], []>} : vector<64x48xf32>, vector<48x128xf32>, vector<64x128xf32> -> vector<64x128xf32>
    %33 = arith.addf %27, %32 : vector<64x128xf32>
    %34 = vector.extract_strided_slice %21 {offsets = [2, 0, 0], sizes = [8, 8, 48], strides = [1, 1, 1]} : vector<10x8x48xf32> to vector<8x8x48xf32>
    %35 = vector.shape_cast %34 : vector<8x8x48xf32> to vector<64x48xf32>
    %c2 = arith.constant 2 : index
    %c0_55 = arith.constant 0 : index
    %c0_56 = arith.constant 0 : index
    %c0_57 = arith.constant 0 : index
    %36 = vector.load %arg8[%c2, %c0_55, %c0_56, %c0_57] : memref<3x3x48x128xf32, #tpu.memory_space<vmem>>, vector<1x1x48x128xf32>
    %37 = vector.shape_cast %36 : vector<1x1x48x128xf32> to vector<48x128xf32>
    %cst_58 = arith.constant dense<0.000000e+00> : vector<64x128xf32>
    %38 = tpu.matmul %35, %37, %cst_58 {dimension_numbers = #tpu.dot_dimension_numbers<[1], [0], [0], [1], [0, 0, 1, 1], [], []>} : vector<64x48xf32>, vector<48x128xf32>, vector<64x128xf32> -> vector<64x128xf32>
    %39 = arith.addf %33, %38 : vector<64x128xf32>
    %c0_59 = arith.constant 0 : index
    %c1_60 = arith.constant 1 : index
    %c0_61 = arith.constant 0 : index
    %40 = vector.load %arg11[%c0_59, %c1_60, %c0_61] : memref<10x10x48xf32, #tpu.memory_space<vmem>>, vector<10x8x48xf32>
    %41 = vector.extract_strided_slice %40 {offsets = [0, 0, 0], sizes = [8, 8, 48], strides = [1, 1, 1]} : vector<10x8x48xf32> to vector<8x8x48xf32>
    %42 = vector.shape_cast %41 : vector<8x8x48xf32> to vector<64x48xf32>
    %c0_62 = arith.constant 0 : index
    %c1_63 = arith.constant 1 : index
    %c0_64 = arith.constant 0 : index
    %c0_65 = arith.constant 0 : index
    %43 = vector.load %arg8[%c0_62, %c1_63, %c0_64, %c0_65] : memref<3x3x48x128xf32, #tpu.memory_space<vmem>>, vector<1x1x48x128xf32>
    %44 = vector.shape_cast %43 : vector<1x1x48x128xf32> to vector<48x128xf32>
    %cst_66 = arith.constant dense<0.000000e+00> : vector<64x128xf32>
    %45 = tpu.matmul %42, %44, %cst_66 {dimension_numbers = #tpu.dot_dimension_numbers<[1], [0], [0], [1], [0, 0, 1, 1], [], []>} : vector<64x48xf32>, vector<48x128xf32>, vector<64x128xf32> -> vector<64x128xf32>
    %46 = arith.addf %39, %45 : vector<64x128xf32>
    %47 = vector.extract_strided_slice %40 {offsets = [1, 0, 0], sizes = [8, 8, 48], strides = [1, 1, 1]} : vector<10x8x48xf32> to vector<8x8x48xf32>
    %48 = vector.shape_cast %47 : vector<8x8x48xf32> to vector<64x48xf32>
    %c1_67 = arith.constant 1 : index
    %c1_68 = arith.constant 1 : index
    %c0_69 = arith.constant 0 : index
    %c0_70 = arith.constant 0 : index
    %49 = vector.load %arg8[%c1_67, %c1_68, %c0_69, %c0_70] : memref<3x3x48x128xf32, #tpu.memory_space<vmem>>, vector<1x1x48x128xf32>
    %50 = vector.shape_cast %49 : vector<1x1x48x128xf32> to vector<48x128xf32>
    %cst_71 = arith.constant dense<0.000000e+00> : vector<64x128xf32>
    %51 = tpu.matmul %48, %50, %cst_71 {dimension_numbers = #tpu.dot_dimension_numbers<[1], [0], [0], [1], [0, 0, 1, 1], [], []>} : vector<64x48xf32>, vector<48x128xf32>, vector<64x128xf32> -> vector<64x128xf32>
    %52 = arith.addf %46, %51 : vector<64x128xf32>
    %53 = vector.extract_strided_slice %40 {offsets = [2, 0, 0], sizes = [8, 8, 48], strides = [1, 1, 1]} : vector<10x8x48xf32> to vector<8x8x48xf32>
    %54 = vector.shape_cast %53 : vector<8x8x48xf32> to vector<64x48xf32>
    %c2_72 = arith.constant 2 : index
    %c1_73 = arith.constant 1 : index
    %c0_74 = arith.constant 0 : index
    %c0_75 = arith.constant 0 : index
    %55 = vector.load %arg8[%c2_72, %c1_73, %c0_74, %c0_75] : memref<3x3x48x128xf32, #tpu.memory_space<vmem>>, vector<1x1x48x128xf32>
    %56 = vector.shape_cast %55 : vector<1x1x48x128xf32> to vector<48x128xf32>
    %cst_76 = arith.constant dense<0.000000e+00> : vector<64x128xf32>
    %57 = tpu.matmul %54, %56, %cst_76 {dimension_numbers = #tpu.dot_dimension_numbers<[1], [0], [0], [1], [0, 0, 1, 1], [], []>} : vector<64x48xf32>, vector<48x128xf32>, vector<64x128xf32> -> vector<64x128xf32>
    %58 = arith.addf %52, %57 : vector<64x128xf32>
    %c0_77 = arith.constant 0 : index
    %c2_78 = arith.constant 2 : index
    %c0_79 = arith.constant 0 : index
    %59 = vector.load %arg11[%c0_77, %c2_78, %c0_79] : memref<10x10x48xf32, #tpu.memory_space<vmem>>, vector<10x8x48xf32>
    %60 = vector.extract_strided_slice %59 {offsets = [0, 0, 0], sizes = [8, 8, 48], strides = [1, 1, 1]} : vector<10x8x48xf32> to vector<8x8x48xf32>
    %61 = vector.shape_cast %60 : vector<8x8x48xf32> to vector<64x48xf32>
    %c0_80 = arith.constant 0 : index
    %c2_81 = arith.constant 2 : index
    %c0_82 = arith.constant 0 : index
    %c0_83 = arith.constant 0 : index
    %62 = vector.load %arg8[%c0_80, %c2_81, %c0_82, %c0_83] : memref<3x3x48x128xf32, #tpu.memory_space<vmem>>, vector<1x1x48x128xf32>
    %63 = vector.shape_cast %62 : vector<1x1x48x128xf32> to vector<48x128xf32>
    %cst_84 = arith.constant dense<0.000000e+00> : vector<64x128xf32>
    %64 = tpu.matmul %61, %63, %cst_84 {dimension_numbers = #tpu.dot_dimension_numbers<[1], [0], [0], [1], [0, 0, 1, 1], [], []>} : vector<64x48xf32>, vector<48x128xf32>, vector<64x128xf32> -> vector<64x128xf32>
    %65 = arith.addf %58, %64 : vector<64x128xf32>
    %66 = vector.extract_strided_slice %59 {offsets = [1, 0, 0], sizes = [8, 8, 48], strides = [1, 1, 1]} : vector<10x8x48xf32> to vector<8x8x48xf32>
    %67 = vector.shape_cast %66 : vector<8x8x48xf32> to vector<64x48xf32>
    %c1_85 = arith.constant 1 : index
    %c2_86 = arith.constant 2 : index
    %c0_87 = arith.constant 0 : index
    %c0_88 = arith.constant 0 : index
    %68 = vector.load %arg8[%c1_85, %c2_86, %c0_87, %c0_88] : memref<3x3x48x128xf32, #tpu.memory_space<vmem>>, vector<1x1x48x128xf32>
    %69 = vector.shape_cast %68 : vector<1x1x48x128xf32> to vector<48x128xf32>
    %cst_89 = arith.constant dense<0.000000e+00> : vector<64x128xf32>
    %70 = tpu.matmul %67, %69, %cst_89 {dimension_numbers = #tpu.dot_dimension_numbers<[1], [0], [0], [1], [0, 0, 1, 1], [], []>} : vector<64x48xf32>, vector<48x128xf32>, vector<64x128xf32> -> vector<64x128xf32>
    %71 = arith.addf %65, %70 : vector<64x128xf32>
    %72 = vector.extract_strided_slice %59 {offsets = [2, 0, 0], sizes = [8, 8, 48], strides = [1, 1, 1]} : vector<10x8x48xf32> to vector<8x8x48xf32>
    %73 = vector.shape_cast %72 : vector<8x8x48xf32> to vector<64x48xf32>
    %c2_90 = arith.constant 2 : index
    %c2_91 = arith.constant 2 : index
    %c0_92 = arith.constant 0 : index
    %c0_93 = arith.constant 0 : index
    %74 = vector.load %arg8[%c2_90, %c2_91, %c0_92, %c0_93] : memref<3x3x48x128xf32, #tpu.memory_space<vmem>>, vector<1x1x48x128xf32>
    %75 = vector.shape_cast %74 : vector<1x1x48x128xf32> to vector<48x128xf32>
    %cst_94 = arith.constant dense<0.000000e+00> : vector<64x128xf32>
    %76 = tpu.matmul %73, %75, %cst_94 {dimension_numbers = #tpu.dot_dimension_numbers<[1], [0], [0], [1], [0, 0, 1, 1], [], []>} : vector<64x48xf32>, vector<48x128xf32>, vector<64x128xf32> -> vector<64x128xf32>
    %77 = arith.addf %71, %76 : vector<64x128xf32>
    %cst_95 = arith.constant 0.000000e+00 : f32
    %78 = vector.broadcast %cst_95 : f32 to vector<64x128xf32>
    %79 = arith.maximumf %77, %78 : vector<64x128xf32>
    %80 = vector.shape_cast %79 : vector<64x128xf32> to vector<1x1x8x8x128xf32>
    %c0_96 = arith.constant 0 : index
    %c0_97 = arith.constant 0 : index
    %c0_98 = arith.constant 0 : index
    %c0_99 = arith.constant 0 : index
    %c0_100 = arith.constant 0 : index
    %81 = vector.load %arg10[%c0_96, %c0_97, %c0_98, %c0_99, %c0_100] : memref<1x1x8x8x128xf32, #tpu.memory_space<vmem>>, vector<1x1x8x8x128xf32>
    tpu.vector_store %arg10[%c0_96, %c0_97, %c0_98, %c0_99, %c0_100], %80 {strides = array<i32>} : memref<1x1x8x8x128xf32, #tpu.memory_space<vmem>>, vector<1x1x8x8x128xf32>,
    return
  }
  func.func @transform_0(%arg0: i32, %arg1: i32) -> (i32, i32, i32, i32, i32) {
    %c0_i32 = arith.constant 0 : i32
    %0 = arith.addi %arg1, %c0_i32 : i32
    %c0_i32_0 = arith.constant 0 : i32
    %c0_i32_1 = arith.constant 0 : i32
    %c0_i32_2 = arith.constant 0 : i32
    %c0_i32_3 = arith.constant 0 : i32
    return %arg0, %0, %c0_i32_0, %c0_i32_1, %c0_i32_2 : i32, i32, i32, i32, i32
  }
  func.func @transform_1(%arg0: i32, %arg1: i32) -> (i32, i32, i32, i32, i32) {
    %c1_i32 = arith.constant 1 : i32
    %0 = arith.addi %arg1, %c1_i32 : i32
    %c0_i32 = arith.constant 0 : i32
    %c0_i32_0 = arith.constant 0 : i32
    %c0_i32_1 = arith.constant 0 : i32
    %c0_i32_2 = arith.constant 0 : i32
    return %arg0, %0, %c0_i32, %c0_i32_0, %c0_i32_1 : i32, i32, i32, i32, i32
  }
  func.func @transform_2(%arg0: i32, %arg1: i32) -> (i32, i32, i32, i32, i32) {
    %c2_i32 = arith.constant 2 : i32
    %0 = arith.addi %arg1, %c2_i32 : i32
    %c0_i32 = arith.constant 0 : i32
    %c0_i32_0 = arith.constant 0 : i32
    %c0_i32_1 = arith.constant 0 : i32
    %c0_i32_2 = arith.constant 0 : i32
    return %arg0, %0, %c0_i32, %c0_i32_0, %c0_i32_1 : i32, i32, i32, i32, i32
  }
  func.func @transform_3(%arg0: i32, %arg1: i32) -> (i32, i32, i32, i32, i32) {
    %c0_i32 = arith.constant 0 : i32
    %0 = arith.addi %arg1, %c0_i32 : i32
    %c0_i32_0 = arith.constant 0 : i32
    %c0_i32_1 = arith.constant 0 : i32
    %c0_i32_2 = arith.constant 0 : i32
    %c0_i32_3 = arith.constant 0 : i32
    return %arg0, %0, %c0_i32_0, %c0_i32_1, %c0_i32_2 : i32, i32, i32, i32, i32
  }
  func.func @transform_4(%arg0: i32, %arg1: i32) -> (i32, i32, i32, i32, i32) {
    %c1_i32 = arith.constant 1 : i32
    %0 = arith.addi %arg1, %c1_i32 : i32
    %c0_i32 = arith.constant 0 : i32
    %c0_i32_0 = arith.constant 0 : i32
    %c0_i32_1 = arith.constant 0 : i32
    %c0_i32_2 = arith.constant 0 : i32
    return %arg0, %0, %c0_i32, %c0_i32_0, %c0_i32_1 : i32, i32, i32, i32, i32
  }
  func.func @transform_5(%arg0: i32, %arg1: i32) -> (i32, i32, i32, i32, i32) {
    %c2_i32 = arith.constant 2 : i32
    %0 = arith.addi %arg1, %c2_i32 : i32
    %c0_i32 = arith.constant 0 : i32
    %c0_i32_0 = arith.constant 0 : i32
    %c0_i32_1 = arith.constant 0 : i32
    %c0_i32_2 = arith.constant 0 : i32
    return %arg0, %0, %c0_i32, %c0_i32_0, %c0_i32_1 : i32, i32, i32, i32, i32
  }
  func.func @transform_6(%arg0: i32, %arg1: i32) -> (i32, i32, i32, i32) {
    %c0_i32 = arith.constant 0 : i32
    %c0_i32_0 = arith.constant 0 : i32
    %c0_i32_1 = arith.constant 0 : i32
    %c0_i32_2 = arith.constant 0 : i32
    %c0_i32_3 = arith.constant 0 : i32
    return %c0_i32, %c0_i32_0, %c0_i32_1, %c0_i32_2 : i32, i32, i32, i32
  }
  func.func @transform_7(%arg0: i32, %arg1: i32) -> (i32, i32) {
    %c0_i32 = arith.constant 0 : i32
    %c0_i32_0 = arith.constant 0 : i32
    %c0_i32_1 = arith.constant 0 : i32
    return %c0_i32, %c0_i32_0 : i32, i32
  }
  func.func @transform_8(%arg0: i32, %arg1: i32) -> (i32, i32, i32, i32, i32) {
    %c0_i32 = arith.constant 0 : i32
    %c0_i32_0 = arith.constant 0 : i32
    %c0_i32_1 = arith.constant 0 : i32
    %c0_i32_2 = arith.constant 0 : i32
    return %arg0, %arg1, %c0_i32, %c0_i32_0, %c0_i32_1 : i32, i32, i32, i32, i32
  }
}

module attributes {stable_mosaic.version = 11 : i64} {
  func.func @_conv3x3x3_kernel(%arg0: i32, %arg1: i32, %arg2: memref<1x1x10x10x128xf32, #tpu.memory_space<vmem>>, %arg3: memref<1x1x10x10x128xf32, #tpu.memory_space<vmem>>, %arg4: memref<1x1x10x10x128xf32, #tpu.memory_space<vmem>>, %arg5: memref<3x3x384x128xf32, #tpu.memory_space<vmem>>, %arg6: memref<1x128xf32, #tpu.memory_space<vmem>>, %arg7: memref<1x1x8x8x128xf32, #tpu.memory_space<vmem>>, %arg8: memref<10x10x384xf32, #tpu.memory_space<vmem>>) attributes {dimension_semantics = [#tpu.dimension_semantics<parallel>, #tpu.dimension_semantics<parallel>], iteration_bounds = array<i64: 2, 8>, scalar_prefetch = 0 : i64, scratch_operands = 1 : i64, tpu.core_type = #tpu.core_type<tc>, window_params = [{transform_indices = @transform_0, window_bounds = array<i64: 1, 1, 10, 10, 128>}, {transform_indices = @transform_1, window_bounds = array<i64: 1, 1, 10, 10, 128>}, {transform_indices = @transform_2, window_bounds = array<i64: 1, 1, 10, 10, 128>}, {pipeline_mode = #tpu.pipeline_mode<synchronous>, transform_indices = @transform_3, window_bounds = array<i64: 3, 3, 384, 128>}, {pipeline_mode = #tpu.pipeline_mode<synchronous>, transform_indices = @transform_4, window_bounds = array<i64: 1, 128>}, {transform_indices = @transform_5, window_bounds = array<i64: 1, 1, 8, 8, 128>}]} {
    %c0 = arith.constant 0 : index
    %c0_0 = arith.constant 0 : index
    %c0_1 = arith.constant 0 : index
    %c0_2 = arith.constant 0 : index
    %c0_3 = arith.constant 0 : index
    %0 = vector.load %arg2[%c0, %c0_0, %c0_1, %c0_2, %c0_3] : memref<1x1x10x10x128xf32, #tpu.memory_space<vmem>>, vector<1x1x10x10x128xf32>
    %1 = vector.shape_cast %0 : vector<1x1x10x10x128xf32> to vector<10x10x128xf32>
    %c0_4 = arith.constant 0 : index
    %c0_5 = arith.constant 0 : index
    %c0_6 = arith.constant 0 : index
    %2 = vector.load %arg8[%c0_4, %c0_5, %c0_6] : memref<10x10x384xf32, #tpu.memory_space<vmem>>, vector<10x10x128xf32>
    tpu.vector_store %arg8[%c0_4, %c0_5, %c0_6], %1 {strides = array<i32>} : memref<10x10x384xf32, #tpu.memory_space<vmem>>, vector<10x10x128xf32>,
    %c0_7 = arith.constant 0 : index
    %c0_8 = arith.constant 0 : index
    %c0_9 = arith.constant 0 : index
    %c0_10 = arith.constant 0 : index
    %c0_11 = arith.constant 0 : index
    %3 = vector.load %arg3[%c0_7, %c0_8, %c0_9, %c0_10, %c0_11] : memref<1x1x10x10x128xf32, #tpu.memory_space<vmem>>, vector<1x1x10x10x128xf32>
    %4 = vector.shape_cast %3 : vector<1x1x10x10x128xf32> to vector<10x10x128xf32>
    %c0_12 = arith.constant 0 : index
    %c0_13 = arith.constant 0 : index
    %c128 = arith.constant 128 : index
    %5 = vector.load %arg8[%c0_12, %c0_13, %c128] : memref<10x10x384xf32, #tpu.memory_space<vmem>>, vector<10x10x128xf32>
    tpu.vector_store %arg8[%c0_12, %c0_13, %c128], %4 {strides = array<i32>} : memref<10x10x384xf32, #tpu.memory_space<vmem>>, vector<10x10x128xf32>,
    %c0_14 = arith.constant 0 : index
    %c0_15 = arith.constant 0 : index
    %c0_16 = arith.constant 0 : index
    %c0_17 = arith.constant 0 : index
    %c0_18 = arith.constant 0 : index
    %6 = vector.load %arg4[%c0_14, %c0_15, %c0_16, %c0_17, %c0_18] : memref<1x1x10x10x128xf32, #tpu.memory_space<vmem>>, vector<1x1x10x10x128xf32>
    %7 = vector.shape_cast %6 : vector<1x1x10x10x128xf32> to vector<10x10x128xf32>
    %c0_19 = arith.constant 0 : index
    %c0_20 = arith.constant 0 : index
    %c256 = arith.constant 256 : index
    %8 = vector.load %arg8[%c0_19, %c0_20, %c256] : memref<10x10x384xf32, #tpu.memory_space<vmem>>, vector<10x10x128xf32>
    tpu.vector_store %arg8[%c0_19, %c0_20, %c256], %7 {strides = array<i32>} : memref<10x10x384xf32, #tpu.memory_space<vmem>>, vector<10x10x128xf32>,
    %c0_21 = arith.constant 0 : index
    %c0_22 = arith.constant 0 : index
    %9 = vector.load %arg6[%c0_21, %c0_22] : memref<1x128xf32, #tpu.memory_space<vmem>>, vector<1x128xf32>
    %10 = vector.shape_cast %9 : vector<1x128xf32> to vector<1x128xf32>
    %11 = vector.broadcast %10 : vector<1x128xf32> to vector<64x128xf32>
    %c0_23 = arith.constant 0 : index
    %c0_24 = arith.constant 0 : index
    %c0_25 = arith.constant 0 : index
    %12 = vector.load %arg8[%c0_23, %c0_24, %c0_25] : memref<10x10x384xf32, #tpu.memory_space<vmem>>, vector<10x8x384xf32>
    %13 = vector.extract_strided_slice %12 {offsets = [0, 0, 0], sizes = [8, 8, 384], strides = [1, 1, 1]} : vector<10x8x384xf32> to vector<8x8x384xf32>
    %14 = vector.shape_cast %13 : vector<8x8x384xf32> to vector<64x384xf32>
    %c0_26 = arith.constant 0 : index
    %c0_27 = arith.constant 0 : index
    %c0_28 = arith.constant 0 : index
    %c0_29 = arith.constant 0 : index
    %15 = vector.load %arg5[%c0_26, %c0_27, %c0_28, %c0_29] : memref<3x3x384x128xf32, #tpu.memory_space<vmem>>, vector<1x1x384x128xf32>
    %16 = vector.shape_cast %15 : vector<1x1x384x128xf32> to vector<384x128xf32>
    %cst = arith.constant dense<0.000000e+00> : vector<64x128xf32>
    %17 = tpu.matmul %14, %16, %cst {dimension_numbers = #tpu.dot_dimension_numbers<[1], [0], [0], [1], [0, 0, 1, 1], [], []>} : vector<64x384xf32>, vector<384x128xf32>, vector<64x128xf32> -> vector<64x128xf32>
    %18 = arith.addf %11, %17 : vector<64x128xf32>
    %19 = vector.extract_strided_slice %12 {offsets = [1, 0, 0], sizes = [8, 8, 384], strides = [1, 1, 1]} : vector<10x8x384xf32> to vector<8x8x384xf32>
    %20 = vector.shape_cast %19 : vector<8x8x384xf32> to vector<64x384xf32>
    %c1 = arith.constant 1 : index
    %c0_30 = arith.constant 0 : index
    %c0_31 = arith.constant 0 : index
    %c0_32 = arith.constant 0 : index
    %21 = vector.load %arg5[%c1, %c0_30, %c0_31, %c0_32] : memref<3x3x384x128xf32, #tpu.memory_space<vmem>>, vector<1x1x384x128xf32>
    %22 = vector.shape_cast %21 : vector<1x1x384x128xf32> to vector<384x128xf32>
    %cst_33 = arith.constant dense<0.000000e+00> : vector<64x128xf32>
    %23 = tpu.matmul %20, %22, %cst_33 {dimension_numbers = #tpu.dot_dimension_numbers<[1], [0], [0], [1], [0, 0, 1, 1], [], []>} : vector<64x384xf32>, vector<384x128xf32>, vector<64x128xf32> -> vector<64x128xf32>
    %24 = arith.addf %18, %23 : vector<64x128xf32>
    %25 = vector.extract_strided_slice %12 {offsets = [2, 0, 0], sizes = [8, 8, 384], strides = [1, 1, 1]} : vector<10x8x384xf32> to vector<8x8x384xf32>
    %26 = vector.shape_cast %25 : vector<8x8x384xf32> to vector<64x384xf32>
    %c2 = arith.constant 2 : index
    %c0_34 = arith.constant 0 : index
    %c0_35 = arith.constant 0 : index
    %c0_36 = arith.constant 0 : index
    %27 = vector.load %arg5[%c2, %c0_34, %c0_35, %c0_36] : memref<3x3x384x128xf32, #tpu.memory_space<vmem>>, vector<1x1x384x128xf32>
    %28 = vector.shape_cast %27 : vector<1x1x384x128xf32> to vector<384x128xf32>
    %cst_37 = arith.constant dense<0.000000e+00> : vector<64x128xf32>
    %29 = tpu.matmul %26, %28, %cst_37 {dimension_numbers = #tpu.dot_dimension_numbers<[1], [0], [0], [1], [0, 0, 1, 1], [], []>} : vector<64x384xf32>, vector<384x128xf32>, vector<64x128xf32> -> vector<64x128xf32>
    %30 = arith.addf %24, %29 : vector<64x128xf32>
    %c0_38 = arith.constant 0 : index
    %c1_39 = arith.constant 1 : index
    %c0_40 = arith.constant 0 : index
    %31 = vector.load %arg8[%c0_38, %c1_39, %c0_40] : memref<10x10x384xf32, #tpu.memory_space<vmem>>, vector<10x8x384xf32>
    %32 = vector.extract_strided_slice %31 {offsets = [0, 0, 0], sizes = [8, 8, 384], strides = [1, 1, 1]} : vector<10x8x384xf32> to vector<8x8x384xf32>
    %33 = vector.shape_cast %32 : vector<8x8x384xf32> to vector<64x384xf32>
    %c0_41 = arith.constant 0 : index
    %c1_42 = arith.constant 1 : index
    %c0_43 = arith.constant 0 : index
    %c0_44 = arith.constant 0 : index
    %34 = vector.load %arg5[%c0_41, %c1_42, %c0_43, %c0_44] : memref<3x3x384x128xf32, #tpu.memory_space<vmem>>, vector<1x1x384x128xf32>
    %35 = vector.shape_cast %34 : vector<1x1x384x128xf32> to vector<384x128xf32>
    %cst_45 = arith.constant dense<0.000000e+00> : vector<64x128xf32>
    %36 = tpu.matmul %33, %35, %cst_45 {dimension_numbers = #tpu.dot_dimension_numbers<[1], [0], [0], [1], [0, 0, 1, 1], [], []>} : vector<64x384xf32>, vector<384x128xf32>, vector<64x128xf32> -> vector<64x128xf32>
    %37 = arith.addf %30, %36 : vector<64x128xf32>
    %38 = vector.extract_strided_slice %31 {offsets = [1, 0, 0], sizes = [8, 8, 384], strides = [1, 1, 1]} : vector<10x8x384xf32> to vector<8x8x384xf32>
    %39 = vector.shape_cast %38 : vector<8x8x384xf32> to vector<64x384xf32>
    %c1_46 = arith.constant 1 : index
    %c1_47 = arith.constant 1 : index
    %c0_48 = arith.constant 0 : index
    %c0_49 = arith.constant 0 : index
    %40 = vector.load %arg5[%c1_46, %c1_47, %c0_48, %c0_49] : memref<3x3x384x128xf32, #tpu.memory_space<vmem>>, vector<1x1x384x128xf32>
    %41 = vector.shape_cast %40 : vector<1x1x384x128xf32> to vector<384x128xf32>
    %cst_50 = arith.constant dense<0.000000e+00> : vector<64x128xf32>
    %42 = tpu.matmul %39, %41, %cst_50 {dimension_numbers = #tpu.dot_dimension_numbers<[1], [0], [0], [1], [0, 0, 1, 1], [], []>} : vector<64x384xf32>, vector<384x128xf32>, vector<64x128xf32> -> vector<64x128xf32>
    %43 = arith.addf %37, %42 : vector<64x128xf32>
    %44 = vector.extract_strided_slice %31 {offsets = [2, 0, 0], sizes = [8, 8, 384], strides = [1, 1, 1]} : vector<10x8x384xf32> to vector<8x8x384xf32>
    %45 = vector.shape_cast %44 : vector<8x8x384xf32> to vector<64x384xf32>
    %c2_51 = arith.constant 2 : index
    %c1_52 = arith.constant 1 : index
    %c0_53 = arith.constant 0 : index
    %c0_54 = arith.constant 0 : index
    %46 = vector.load %arg5[%c2_51, %c1_52, %c0_53, %c0_54] : memref<3x3x384x128xf32, #tpu.memory_space<vmem>>, vector<1x1x384x128xf32>
    %47 = vector.shape_cast %46 : vector<1x1x384x128xf32> to vector<384x128xf32>
    %cst_55 = arith.constant dense<0.000000e+00> : vector<64x128xf32>
    %48 = tpu.matmul %45, %47, %cst_55 {dimension_numbers = #tpu.dot_dimension_numbers<[1], [0], [0], [1], [0, 0, 1, 1], [], []>} : vector<64x384xf32>, vector<384x128xf32>, vector<64x128xf32> -> vector<64x128xf32>
    %49 = arith.addf %43, %48 : vector<64x128xf32>
    %c0_56 = arith.constant 0 : index
    %c2_57 = arith.constant 2 : index
    %c0_58 = arith.constant 0 : index
    %50 = vector.load %arg8[%c0_56, %c2_57, %c0_58] : memref<10x10x384xf32, #tpu.memory_space<vmem>>, vector<10x8x384xf32>
    %51 = vector.extract_strided_slice %50 {offsets = [0, 0, 0], sizes = [8, 8, 384], strides = [1, 1, 1]} : vector<10x8x384xf32> to vector<8x8x384xf32>
    %52 = vector.shape_cast %51 : vector<8x8x384xf32> to vector<64x384xf32>
    %c0_59 = arith.constant 0 : index
    %c2_60 = arith.constant 2 : index
    %c0_61 = arith.constant 0 : index
    %c0_62 = arith.constant 0 : index
    %53 = vector.load %arg5[%c0_59, %c2_60, %c0_61, %c0_62] : memref<3x3x384x128xf32, #tpu.memory_space<vmem>>, vector<1x1x384x128xf32>
    %54 = vector.shape_cast %53 : vector<1x1x384x128xf32> to vector<384x128xf32>
    %cst_63 = arith.constant dense<0.000000e+00> : vector<64x128xf32>
    %55 = tpu.matmul %52, %54, %cst_63 {dimension_numbers = #tpu.dot_dimension_numbers<[1], [0], [0], [1], [0, 0, 1, 1], [], []>} : vector<64x384xf32>, vector<384x128xf32>, vector<64x128xf32> -> vector<64x128xf32>
    %56 = arith.addf %49, %55 : vector<64x128xf32>
    %57 = vector.extract_strided_slice %50 {offsets = [1, 0, 0], sizes = [8, 8, 384], strides = [1, 1, 1]} : vector<10x8x384xf32> to vector<8x8x384xf32>
    %58 = vector.shape_cast %57 : vector<8x8x384xf32> to vector<64x384xf32>
    %c1_64 = arith.constant 1 : index
    %c2_65 = arith.constant 2 : index
    %c0_66 = arith.constant 0 : index
    %c0_67 = arith.constant 0 : index
    %59 = vector.load %arg5[%c1_64, %c2_65, %c0_66, %c0_67] : memref<3x3x384x128xf32, #tpu.memory_space<vmem>>, vector<1x1x384x128xf32>
    %60 = vector.shape_cast %59 : vector<1x1x384x128xf32> to vector<384x128xf32>
    %cst_68 = arith.constant dense<0.000000e+00> : vector<64x128xf32>
    %61 = tpu.matmul %58, %60, %cst_68 {dimension_numbers = #tpu.dot_dimension_numbers<[1], [0], [0], [1], [0, 0, 1, 1], [], []>} : vector<64x384xf32>, vector<384x128xf32>, vector<64x128xf32> -> vector<64x128xf32>
    %62 = arith.addf %56, %61 : vector<64x128xf32>
    %63 = vector.extract_strided_slice %50 {offsets = [2, 0, 0], sizes = [8, 8, 384], strides = [1, 1, 1]} : vector<10x8x384xf32> to vector<8x8x384xf32>
    %64 = vector.shape_cast %63 : vector<8x8x384xf32> to vector<64x384xf32>
    %c2_69 = arith.constant 2 : index
    %c2_70 = arith.constant 2 : index
    %c0_71 = arith.constant 0 : index
    %c0_72 = arith.constant 0 : index
    %65 = vector.load %arg5[%c2_69, %c2_70, %c0_71, %c0_72] : memref<3x3x384x128xf32, #tpu.memory_space<vmem>>, vector<1x1x384x128xf32>
    %66 = vector.shape_cast %65 : vector<1x1x384x128xf32> to vector<384x128xf32>
    %cst_73 = arith.constant dense<0.000000e+00> : vector<64x128xf32>
    %67 = tpu.matmul %64, %66, %cst_73 {dimension_numbers = #tpu.dot_dimension_numbers<[1], [0], [0], [1], [0, 0, 1, 1], [], []>} : vector<64x384xf32>, vector<384x128xf32>, vector<64x128xf32> -> vector<64x128xf32>
    %68 = arith.addf %62, %67 : vector<64x128xf32>
    %cst_74 = arith.constant 0.000000e+00 : f32
    %69 = vector.broadcast %cst_74 : f32 to vector<64x128xf32>
    %70 = arith.maximumf %68, %69 : vector<64x128xf32>
    %71 = vector.shape_cast %70 : vector<64x128xf32> to vector<1x1x8x8x128xf32>
    %c0_75 = arith.constant 0 : index
    %c0_76 = arith.constant 0 : index
    %c0_77 = arith.constant 0 : index
    %c0_78 = arith.constant 0 : index
    %c0_79 = arith.constant 0 : index
    %72 = vector.load %arg7[%c0_75, %c0_76, %c0_77, %c0_78, %c0_79] : memref<1x1x8x8x128xf32, #tpu.memory_space<vmem>>, vector<1x1x8x8x128xf32>
    tpu.vector_store %arg7[%c0_75, %c0_76, %c0_77, %c0_78, %c0_79], %71 {strides = array<i32>} : memref<1x1x8x8x128xf32, #tpu.memory_space<vmem>>, vector<1x1x8x8x128xf32>,
    return
  }
  func.func @transform_0(%arg0: i32, %arg1: i32) -> (i32, i32, i32, i32, i32) {
    %c0_i32 = arith.constant 0 : i32
    %0 = arith.addi %arg1, %c0_i32 : i32
    %c0_i32_0 = arith.constant 0 : i32
    %c0_i32_1 = arith.constant 0 : i32
    %c0_i32_2 = arith.constant 0 : i32
    %c0_i32_3 = arith.constant 0 : i32
    return %arg0, %0, %c0_i32_0, %c0_i32_1, %c0_i32_2 : i32, i32, i32, i32, i32
  }
  func.func @transform_1(%arg0: i32, %arg1: i32) -> (i32, i32, i32, i32, i32) {
    %c1_i32 = arith.constant 1 : i32
    %0 = arith.addi %arg1, %c1_i32 : i32
    %c0_i32 = arith.constant 0 : i32
    %c0_i32_0 = arith.constant 0 : i32
    %c0_i32_1 = arith.constant 0 : i32
    %c0_i32_2 = arith.constant 0 : i32
    return %arg0, %0, %c0_i32, %c0_i32_0, %c0_i32_1 : i32, i32, i32, i32, i32
  }
  func.func @transform_2(%arg0: i32, %arg1: i32) -> (i32, i32, i32, i32, i32) {
    %c2_i32 = arith.constant 2 : i32
    %0 = arith.addi %arg1, %c2_i32 : i32
    %c0_i32 = arith.constant 0 : i32
    %c0_i32_0 = arith.constant 0 : i32
    %c0_i32_1 = arith.constant 0 : i32
    %c0_i32_2 = arith.constant 0 : i32
    return %arg0, %0, %c0_i32, %c0_i32_0, %c0_i32_1 : i32, i32, i32, i32, i32
  }
  func.func @transform_3(%arg0: i32, %arg1: i32) -> (i32, i32, i32, i32) {
    %c0_i32 = arith.constant 0 : i32
    %c0_i32_0 = arith.constant 0 : i32
    %c0_i32_1 = arith.constant 0 : i32
    %c0_i32_2 = arith.constant 0 : i32
    %c0_i32_3 = arith.constant 0 : i32
    return %c0_i32, %c0_i32_0, %c0_i32_1, %c0_i32_2 : i32, i32, i32, i32
  }
  func.func @transform_4(%arg0: i32, %arg1: i32) -> (i32, i32) {
    %c0_i32 = arith.constant 0 : i32
    %c0_i32_0 = arith.constant 0 : i32
    %c0_i32_1 = arith.constant 0 : i32
    return %c0_i32, %c0_i32_0 : i32, i32
  }
  func.func @transform_5(%arg0: i32, %arg1: i32) -> (i32, i32, i32, i32, i32) {
    %c0_i32 = arith.constant 0 : i32
    %c0_i32_0 = arith.constant 0 : i32
    %c0_i32_1 = arith.constant 0 : i32
    %c0_i32_2 = arith.constant 0 : i32
    return %arg0, %arg1, %c0_i32, %c0_i32_0, %c0_i32_1 : i32, i32, i32, i32, i32
  }
}

</mosaic_0001>

<bundles_post_ra>
// kernel: unet_up_forward.3
= control target key start
LH: loop header
LB: loop body
LE: loop exit
PB: predicated region body
PF: predicated region fallthrough
CT: control target
= control target key end

     0   :  { %8 = vsyncpa [#allocation3], 0  ;;  %s413_s0 = inlined_call_operand.hbm [shape: f32[128,8], index: 0, kind: input, shape index: {}]   ;;  %s414_s1 = inlined_call_operand.hbm [shape: f32[8,128], index: 1, kind: input, shape index: {}]   ;;  %s415_s2 = inlined_call_operand.hbm [shape: f32[1,128], index: 2, kind: input, shape index: {}]   ;;  %s416_s3 = inlined_call_operand.vmem [shape: f32[128,128], index: 3, kind: output, shape index: {}]  }
   0x1   :  { %9 = vsyncpa [#allocation5], 0  ;;  %s28_s14 = sshll.u32 %s414_s1, 4  ;;  %s315_s15 = smov [#allocation4]   ;;  %s29_s14 = int_to_ptr.hbm [resolvable:$true] %s28_s14 }
   0x2   :  { %s30_s16 = sshll.u32 %s315_s15, 4  ;;  %s14_s19 = sshll.u32 %s413_s0, 4  ;;  %s31_s16 = int_to_ptr.vmem [resolvable:$true] %s30_s16  ;;  %s15_s19 = int_to_ptr.hbm [resolvable:$true] %s14_s19 }
   0x3   :  { %33 = dma.hbm_to_vmem [thread:$0]  %s29_s14, 128, %s31_s16, [#allocation5]  }
   0x4   :  { %s316_s20 = smov [#allocation2]   ;;  %s317_s22 = smov 128  }
   0x5   :  { %s16_s21 = sshll.u32 %s316_s20, 4  ;;  %s318_s23 = smov 8   ;;  %s17_s21 = int_to_ptr.vmem [resolvable:$true] %s16_s21 }
   0x6   :  { %22 = dma.hbm_to_vmem [thread:$0]  %s15_s19, 2048, %s17_s21, [#allocation3], %s317_s22, %s317_s22, %s318_s23  }
   0x7   :  { %s39_s1 = sshll.u32 %s415_s2, 4  ;;  %s319_s26 = smov [#allocation6]   ;;  %s40_s1 = int_to_ptr.hbm [resolvable:$true] %s39_s1 }
   0x8   :  { %s41_s27 = sshll.u32 %s319_s26, 4  ;;  %s42_s27 = int_to_ptr.vmem [resolvable:$true] %s41_s27 }
   0x9   :  { %44 = dma.hbm_to_vmem [thread:$0]  %s40_s1, 16, %s42_s27, [#allocation5]  }
   0xa   :  { %311 = dma.done.wait [#allocation3], 2048  }
   0xb   :  { %312 = vsyncadd [#allocation3], 4294965248 }
   0xc   :  { %313 = dma.done.wait [#allocation5], 144  }
   0xd   :  { %314 = vsyncadd [#allocation5], 4294967152  ;;  %vm78_vm0 = vcmask 64512   ;;  %v73_v0 = vld [vmem:[#allocation4] sm:$0xff]  ;;  %v66_v5 = vld [vmem:[#allocation2 + $0x48] sm:$0xff] }
   0xe   :  { %v65_v1 = vld [vmem:[#allocation2 + $0x40] sm:$0xff]  ;;  %231 = vmatpush.msra.mxu2 %v73_v0  ;;  %232 = vmatpush.msra.mxu3 %v73_v0  ;;  %v70_v6 = vld [vmem:[#allocation2 + $0x68] sm:$0xff]  ;;  %v67_v9 = vld [vmem:[#allocation2 + $0x50] sm:$0xff] }
   0xf   :  { %v69_v2 = vld [vmem:[#allocation2 + $0x60] sm:$0xff]  ;;  %222 = vmatmul.msk.f32.vlgmr.msra.gmra.mxu2 %vm78_vm0, %v65_v1  ;;  %142 = vmatpush.msra.mxu0 %v73_v0  ;;  %v58_v7 = vld [vmem:[#allocation2 + $0x8] sm:$0xff]  ;;  %v71_v10 = vld [vmem:[#allocation2 + $0x70] sm:$0xff] }
  0x10   :  { %v57_v3 = vld [vmem:[#allocation2] sm:$0xff]  ;;  %226 = vmatmul.msk.f32.vlgmr.msra.gmra.mxu3 %vm78_vm0, %v69_v2  ;;  %230 = vmatpush.msra.mxu1 %v73_v0  ;;  %v62_v8 = vld [vmem:[#allocation2 + $0x28] sm:$0xff]  ;;  %v59_v11 = vld [vmem:[#allocation2 + $0x10] sm:$0xff] }
  0x11   :  { %v61_v4 = vld [vmem:[#allocation2 + $0x20] sm:$0xff]  ;;  %214 = vmatmul.msk.f32.vlgmr.msra.gmra.mxu0 %vm78_vm0, %v57_v3  ;;  %v63_v12 = vld [vmem:[#allocation2 + $0x30] sm:$0xff]  ;;  %v68_v13 = vld [vmem:[#allocation2 + $0x58] sm:$0xff] }
  0x12   :  { %218 = vmatmul.msk.f32.vlgmr.msra.gmra.mxu1 %vm78_vm0, %v61_v4  ;;  %v72_v14 = vld [vmem:[#allocation2 + $0x78] sm:$0xff]  ;;  %v238_v17 = vld [vmem:[#allocation6] ss:$0 sm:$0xff] }
  0x13   :  { %v60_v15 = vld [vmem:[#allocation2 + $0x18] sm:$0xff] }
  0x14   :  { %v64_v16 = vld [vmem:[#allocation2 + $0x38] sm:$0xff] }
  0x17   :  { %223 = vmatmul.msk.f32.gmra.mxu2 %vm78_vm0, %v66_v5 }
  0x18   :  { %227 = vmatmul.msk.f32.gmra.mxu3 %vm78_vm0, %v70_v6 }
  0x19   :  { %215 = vmatmul.msk.f32.gmra.mxu0 %vm78_vm0, %v58_v7 }
  0x1a   :  { %219 = vmatmul.msk.f32.gmra.mxu1 %vm78_vm0, %v62_v8 }
  0x1f   :  { %224 = vmatmul.msk.f32.gmra.mxu2 %vm78_vm0, %v67_v9 }
  0x20   :  { %228 = vmatmul.msk.f32.gmra.mxu3 %vm78_vm0, %v71_v10 }
  0x21   :  { %216 = vmatmul.msk.f32.gmra.mxu0 %vm78_vm0, %v59_v11 }
  0x22   :  { %220 = vmatmul.msk.f32.gmra.mxu1 %vm78_vm0, %v63_v12 }
  0x27   :  { %225 = vmatmul.msk.f32.gmra.mxu2 %vm78_vm0, %v68_v13 }
  0x28   :  { %229 = vmatmul.msk.f32.gmra.mxu3 %vm78_vm0, %v72_v14 }
  0x29   :  { %217 = vmatmul.msk.f32.gmra.mxu0 %vm78_vm0, %v60_v15 }
  0x2a   :  { %221 = vmatmul.msk.f32.gmra.mxu1 %vm78_vm0, %v64_v16 }
  0x8e   :  { %v144_v18 = vpop.f32.mrf.mxu0 }
  0x8f   :  { %v156_v19 = vpop.f32.mrf.mxu1  ;;  %v145_v20 = vadd.f32 %v238_v17, %v144_v18 }
  0x90   :  { %v157_v21 = vadd.f32 %v238_v17, %v156_v19 }
  0x91   :  { %192 = vst [vmem:[%s416_s3] sm:$0xff] %v145_v20 }
  0x92   :  { %196 = vst [vmem:[%s416_s3 + $0x20] sm:$0xff] %v157_v21  ;;  %v168_v22 = vpop.f32.mrf.mxu2 }
  0x93   :  { %v180_v23 = vpop.f32.mrf.mxu3  ;;  %v169_v24 = vadd.f32 %v238_v17, %v168_v22 }
  0x94   :  { %v181_v25 = vadd.f32 %v238_v17, %v180_v23 }
  0x95   :  { %200 = vst [vmem:[%s416_s3 + $0x40] sm:$0xff] %v169_v24 }
  0x96   :  { %204 = vst [vmem:[%s416_s3 + $0x60] sm:$0xff] %v181_v25  ;;  %v147_v26 = vpop.f32.mrf.mxu0 }
  0x97   :  { %v159_v27 = vpop.f32.mrf.mxu1  ;;  %v148_v28 = vadd.f32 %v238_v17, %v147_v26 }
  0x98   :  { %v160_v29 = vadd.f32 %v238_v17, %v159_v27 }
  0x99   :  { %193 = vst [vmem:[%s416_s3 + $0x8] sm:$0xff] %v148_v28 }
  0x9a   :  { %197 = vst [vmem:[%s416_s3 + $0x28] sm:$0xff] %v160_v29  ;;  %v171_v30 = vpop.f32.mrf.mxu2 }
  0x9b   :  { %v183_v31 = vpop.f32.mrf.mxu3  ;;  %v172_v32 = vadd.f32 %v238_v17, %v171_v30 }
  0x9c   :  { %v184_v33 = vadd.f32 %v238_v17, %v183_v31 }
  0x9d   :  { %201 = vst [vmem:[%s416_s3 + $0x48] sm:$0xff] %v172_v32 }
  0x9e   :  { %205 = vst [vmem:[%s416_s3 + $0x68] sm:$0xff] %v184_v33  ;;  %v150_v34 = vpop.f32.mrf.mxu0 }
  0x9f   :  { %v162_v35 = vpop.f32.mrf.mxu1  ;;  %v151_v36 = vadd.f32 %v238_v17, %v150_v34 }
  0xa0   :  { %v163_v37 = vadd.f32 %v238_v17, %v162_v35 }
  0xa1   :  { %194 = vst [vmem:[%s416_s3 + $0x10] sm:$0xff] %v151_v36 }
  0xa2   :  { %198 = vst [vmem:[%s416_s3 + $0x30] sm:$0xff] %v163_v37  ;;  %v174_v38 = vpop.f32.mrf.mxu2 }
  0xa3   :  { %v186_v39 = vpop.f32.mrf.mxu3  ;;  %v175_v40 = vadd.f32 %v238_v17, %v174_v38 }
  0xa4   :  { %v187_v41 = vadd.f32 %v238_v17, %v186_v39 }
  0xa5   :  { %202 = vst [vmem:[%s416_s3 + $0x50] sm:$0xff] %v175_v40 }
  0xa6   :  { %206 = vst [vmem:[%s416_s3 + $0x70] sm:$0xff] %v187_v41  ;;  %v153_v42 = vpop.f32.mrf.mxu0 }
  0xa7   :  { %v165_v43 = vpop.f32.mrf.mxu1  ;;  %v154_v44 = vadd.f32 %v238_v17, %v153_v42 }
  0xa8   :  { %v166_v45 = vadd.f32 %v238_v17, %v165_v43 }
  0xa9   :  { %195 = vst [vmem:[%s416_s3 + $0x18] sm:$0xff] %v154_v44 }
  0xaa   :  { %199 = vst [vmem:[%s416_s3 + $0x38] sm:$0xff] %v166_v45  ;;  %v177_v46 = vpop.f32.mrf.mxu2 }
  0xab   :  { %v189_v47 = vpop.f32.mrf.mxu3  ;;  %v178_v48 = vadd.f32 %v238_v17, %v177_v46 }
  0xac   :  { %v190_v49 = vadd.f32 %v238_v17, %v189_v47 }
  0xad   :  { %203 = vst [vmem:[%s416_s3 + $0x58] sm:$0xff] %v178_v48 }
  0xae   :  { %207 = vst [vmem:[%s416_s3 + $0x78] sm:$0xff] %v190_v49 }
  0xaf   :  { %212 = vsyncpa [#allocation3], 1 }
  0xb0   :  { %213 = vsyncpa [#allocation5], 1 }

// kernel: unet_up_forward.4
= control target key start
LH: loop header
LB: loop body
LE: loop exit
PB: predicated region body
PF: predicated region fallthrough
CT: control target
= control target key end

     0   :  { %s2330_s27 = smov 0   ;;  %s2332_s28 = smov 0   ;;  %s3155_s0 = inlined_call_operand.vmem [shape: f32[2,10,10,10,8], index: 0, kind: input, shape index: {}, may-alias: {0,1,2}]   ;;  %s3156_s1 = inlined_call_operand.vmem [shape: f32[2,10,10,10,8], index: 1, kind: input, shape index: {}, may-alias: {0,1,2}]   ;;  %s3157_s2 = inlined_call_operand.vmem [shape: f32[2,10,10,10,8], index: 2, kind: input, shape index: {}, may-alias: {0,1,2}]   ;;  %s3158_s3 = inlined_call_operand.vmem [shape: f32[2,10,10,10,8], index: 3, kind: input, shape index: {}, may-alias: {3,4,5}]   ;;  %s3159_s4 = inlined_call_operand.vmem [shape: f32[2,10,10,10,8], index: 4, kind: input, shape index: {}, may-alias: {3,4,5}]   ;;  %s3160_s5 = inlined_call_operand.vmem [shape: f32[2,10,10,10,8], index: 5, kind: input, shape index: {}, may-alias: {3,4,5}]   ;;  %s3161_s6 = inlined_call_operand.vmem [shape: f32[3,3,48,128], index: 6, kind: input, shape index: {}]   ;;  %s3162_s7 = inlined_call_operand.vmem [shape: f32[1,128], index: 7, kind: input, shape index: {}]   ;;  %s3163_s8 = inlined_call_operand.vmem [shape: f32[2,8,8,8,128], index: 8, kind: output, shape index: {}]  }
   0x1   :  { %3175 = sst [smem:[#allocation3_spill]] %s3155_s0  ;;  %s2334_s29 = smov 0  }
   0x2   :  { %3176 = sst [smem:[#allocation4_spill]] %s3156_s1  ;;  %s2336_s30 = smov 0  }
   0x3   :  { %3177 = sst [smem:[#allocation5_spill]] %s3157_s2  ;;  %s2338_s9 = smov 0  }
   0x4   :  { %3178 = sst [smem:[#allocation6_spill]] %s3158_s3 }
   0x5 LB: > { %s27_s10 = sadd.s32 1, %s2270_s29  ;;  %s30_s11 = sadd.s32 1, %s2274_s30  ;;  %s2278_s9 = sphi %s2338_s9, %s18_s9   ;;  %s2274_s30 = sphi %s2336_s30, %s3192_s30   ;;  %s2270_s29 = sphi %s2334_s29, %s3191_s29   ;;  %s2266_s28 = sphi %s2332_s28, %s3190_s28   ;;  %s2262_s27 = sphi %s2330_s27, %s3189_s27  }
   0x6   : > { %p28_p0 = scmp.ge.s32.totalorder %s27_s10, 8  ;;  %p2040_p1 = scmp.ge.s32.totalorder %s2278_s9, 1 }
   0x7   : > { %p378_p2 = scmp.lt.s32.totalorder %s2278_s9, 17 }
   0x8   : > { %s3194_s10 = smov (%p28_p0, %s27_s10), 0  ;;  %s3196_s11 = smov (!%p28_p0, %s30_s11), %s2274_s30 }
   0x9   : > { %p379_p3 = pnand %p2040_p1, %p378_p2  ;;  %p32_p4 = scmp.ge.s32.totalorder %s3196_s11, 2 }
   0xa   : > { %p469_p5 = scmp.lt.s32.totalorder (!%p379_p3), %s2266_s28, 1  ;;  %p471_p6 = scmp.lt.s32.totalorder (!%p379_p3), %s2262_s27, 9 }
   0xb   : > { %s3198_s11 = smov (%p32_p4, %s3196_s11), 0  ;;  %382 = sbr.rel (%p379_p3) target bundleno = 593 (0x251), region = 52 }
   0xc   : > { %s478_s12 = sadd.s32 (!%p379_p3), 1, %s2262_s27  ;;  %s489_s17 = sadd.s32 (!%p379_p3), 2, %s2262_s27 }
   0xd   : > { %p481_p7 = scmp.lt.s32.totalorder (!%p379_p3), %s478_s12, 9  ;;  %s3179_s3 = sld [smem:[#allocation6_spill]] (!%p379_p3) }
   0xe   : > { %p492_p8 = scmp.lt.s32.totalorder (!%p379_p3), %s489_s17, 9  ;;  %s3165_s24 = smov (!%p379_p3), 24  }
   0xf   : > { %s3180_s1 = sld [smem:[#allocation4_spill]] (!%p379_p3)  ;;  %p533_p9 = scmp.lt.s32.totalorder (!%p379_p3), %s2262_s27, 7 }
  0x10   : > { %s3200_s28 = smov (!%p469_p5, %s2266_s28), 1  ;;  %s3202_s12 = smov (!%p481_p7, %s478_s12), 9  ;;  %vm560_vm0 = vcmask 64512   ;;  %v1211_v43 = vld [vmem:[%s3161_s6 + $0x28] sm:$0xff]  ;;  %v1210_v46 = vld [vmem:[%s3161_s6 + $0x20] sm:$0xff]  ;;  %v1209_v49 = vld [vmem:[%s3161_s6 + $0x18] sm:$0xff] }
  0x11   : > { %s472_s13 = scalar_select %p471_p6, %s2262_s27, 9  ;;  %2173 = vmatpush.msra.mxu2 %v1211_v43  ;;  %2174 = vmatpush.msra.mxu3 %v1211_v43  ;;  %v1208_v52 = vld [vmem:[%s3161_s6 + $0x10] sm:$0xff]  ;;  %v1207_v53 = vld [vmem:[%s3161_s6 + $0x8] sm:$0xff]  ;;  %vm682_vm1 = vcmask 130112   ;;  %v1206_v56 = vld [vmem:[%s3161_s6] sm:$0xff]  ;;  %vm804_vm2 = vcmask 195712  }
  0x12   : > { %s2191_s14 = smul.u32 200, %s3200_s28  ;;  %s3204_s17 = smov (!%p492_p8, %s489_s17), 9  ;;  %2172 = vmatpush.msra.mxu1 %v1211_v43  ;;  %1247 = vmatpush.msra.mxu0 %v1211_v43  ;;  %vm926_vm3 = vcmask 261312   ;;  %vm1048_vm4 = vcmask 326912   ;;  %vm1170_vm5 = vcmask 392512   ;;  %vm1212_vm6 = vcmask 392192  }
  0x13   : > { %s2190_s15 = smul.u32 20, %s472_s13  ;;  %s3181_s2 = sld [smem:[#allocation5_spill]]  ;;  %2176 = vmatpush.msra.mxu2 %v1210_v46  ;;  %2177 = vmatpush.msra.mxu3 %v1210_v46  ;;  %vm562_vm7 = vcmask 58368   ;;  %vm684_vm8 = vcmask 123968   ;;  %vm806_vm9 = vcmask 189568   ;;  %vm928_vm10 = vcmask 255168  }
  0x14   : > { %s2192_s19 = smul.u32 20, %s3202_s12  ;;  %s3167_s12 = smov 8   ;;  %2175 = vmatpush.msra.mxu1 %v1210_v46  ;;  %1248 = vmatpush.msra.mxu0 %v1210_v46  ;;  %vm1050_vm11 = vcmask 320768   ;;  %vm1172_vm12 = vcmask 386368  }
  0x15   : > { %s2368_s16 = sadd.s32 %s2191_s14, %s2190_s15  ;;  %s3169_s13 = smov 16   ;;  %2179 = vmatpush.msra.mxu2 %v1209_v49  ;;  %2180 = vmatpush.msra.mxu3 %v1209_v49 }
  0x16   : > { %s3164_s18 = sshll.u32 %s2368_s16, 3  ;;  %s485_s23 = sadd.s32 %s2192_s19, %s2191_s14  ;;  %2178 = vmatpush.msra.mxu1 %v1209_v49  ;;  %1249 = vmatpush.msra.mxu0 %v1209_v49 }
  0x17   : > { %s2377_s22 = scalar_lea.vmem %s3179_s3, %s3164_s18  ;;  %s2042_s25 = sshll.u32 %s485_s23, 3  ;;  %2182 = vmatpush.msra.mxu2 %v1208_v52  ;;  %2183 = vmatpush.msra.mxu3 %v1208_v52 }
  0x18   : > { %v834_v0 = vld [vmem:[%s2377_s22 + $0x40] sm:$0xff]  ;;  %s2384_s15 = scalar_lea.vmem %s3180_s1, %s2042_s25  ;;  %s2193_s19 = smul.u32 20, %s3204_s17  ;;  %v836_v17 = vld [vmem:[%s2377_s22 + $0x50] sm:$0xff]  ;;  %v827_v45 = vld [vmem:[%s2377_s22 + $0x8] sm:$0x3]  ;;  %2181 = vmatpush.msra.mxu1 %v1208_v52  ;;  %1250 = vmatpush.msra.mxu0 %v1208_v52 }
  0x19   : > { %882 = vrot.lane.b32.xlu1 %v834_v0, %s3165_s24  ;;  %v590_v1 = vld [vmem:[%s2384_s15 + $0x40] sm:$0xff]  ;;  %s3173_s18 = smov 32   ;;  %s3171_s17 = smov 40   ;;  %v592_v15 = vld [vmem:[%s2384_s15 + $0x50] sm:$0xff]  ;;  %v583_v38 = vld [vmem:[%s2384_s15 + $0x8] sm:$0x3]  ;;  %2185 = vmatpush.msra.mxu2 %v1207_v53 }
  0x1a   : > { %638 = vrot.lane.b32.xlu0 %v590_v1, %s3167_s12  ;;  %v594_v2 = vld [vmem:[%s2384_s15 + $0x60] sm:$0xff]  ;;  %s496_s20 = sadd.s32 %s2193_s19, %s2191_s14  ;;  %s2402_s19 = scalar_lea.vmem %s3159_s4, %s2042_s25  ;;  %v596_v19 = vld [vmem:[%s2384_s15 + $0x70] sm:$0xff]  ;;  %2186 = vmatpush.msra.mxu3 %v1207_v53  ;;  %v585_v62 = vld [vmem:[%s2384_s15 + $0x18] sm:$0x3] }
  0x1b   : > { %s2043_s21 = sshll.u32 %s496_s20, 3  ;;  %v838_v5 = vld [vmem:[%s2377_s22 + $0x60] sm:$0xff]  ;;  %v958_v20 = vld [vmem:[%s2402_s19 + $0x50] sm:$0xff]  ;;  %s3183_s0 = sld [smem:[#allocation3_spill]]  ;;  %v949_v50 = vld [vmem:[%s2402_s19 + $0x8] sm:$0x3]  ;;  %2188 = vmatpush.msra.mxu2 %v1206_v56  ;;  %2184 = vmatpush.msra.mxu1 %v1207_v53 }
  0x1c   : > { %s2393_s26 = scalar_lea.vmem %s3181_s2, %s2043_s21  ;;  %v956_v6 = vld [vmem:[%s2402_s19 + $0x40] sm:$0xff]  ;;  %s2413_s25 = scalar_lea.vmem %s3160_s5, %s2043_s21  ;;  %v840_v23 = vld [vmem:[%s2377_s22 + $0x70] sm:$0xff]  ;;  %2189 = vmatpush.msra.mxu3 %v1206_v56  ;;  %1251 = vmatpush.msra.mxu0 %v1207_v53 }
  0x1d   : > { %v712_v3 = vld [vmem:[%s2393_s26 + $0x40] sm:$0xff]  ;;  %v714_v14 = vld [vmem:[%s2393_s26 + $0x50] sm:$0xff]  ;;  %s3182_s21 = sshll.u32 %s2368_s16, 3  ;;  %v705_v37 = vld [vmem:[%s2393_s26 + $0x8] sm:$0x3]  ;;  %2187 = vmatpush.msra.mxu1 %v1206_v56  ;;  %s3184_s16 = smov 8  }
  0x1e   : > { %v716_v4 = vld [vmem:[%s2393_s26 + $0x60] sm:$0xff]  ;;  %v718_v22 = vld [vmem:[%s2393_s26 + $0x70] sm:$0xff]  ;;  %v1071_v48 = vld [vmem:[%s2413_s25 + $0x8] sm:$0x3]  ;;  %1252 = vmatpush.msra.mxu0 %v1206_v56  ;;  %s3187_s14 = smov 40   ;;  %s3206_s27 = smov (!%p533_p9, %s2262_s27), 7 }
  0x1f   : > { %768 = vrot.lane.b32.xlu2 %v716_v4, %s3169_s13  ;;  %v586_v7 = vld [vmem:[%s2384_s15 + $0x20] sm:$0xff]  ;;  %v588_v24 = vld [vmem:[%s2384_s15 + $0x30] sm:$0xff]  ;;  %v707_v59 = vld [vmem:[%s2393_s26 + $0x18] sm:$0x3]  ;;  %s2047_s20 = sshll.u32 %s3206_s27, 3  ;;  %s2048_s1 = sshll.u32 %s3200_s28, 6 }
  0x20   : > { %v960_v8 = vld [vmem:[%s2402_s19 + $0x60] sm:$0xff]  ;;  %v1080_v27 = vld [vmem:[%s2413_s25 + $0x50] sm:$0xff]  ;;  %v951_v4 = vld [vmem:[%s2402_s19 + $0x18] sm:$0x3]  ;;  %s537_s2 = sadd.s32 %s2048_s1, %s2047_s20 }
  0x21   : > { %646 = vrot.lane.b32.xlu1 %v594_v2, %s3167_s12  ;;  %v1078_v9 = vld [vmem:[%s2413_s25 + $0x40] sm:$0xff]  ;;  %v710_v28 = vld [vmem:[%s2393_s26 + $0x30] sm:$0xff]  ;;  %s2466_s23 = scalar_lea.vmem %s3183_s0, %s3182_s21  ;;  %v1073_v2 = vld [vmem:[%s2413_s25 + $0x18] sm:$0x3]  ;;  %s3185_s21 = smov 24  }
  0x22   : > { %760 = vrot.lane.b32.xlu0 %v712_v3, %s3169_s13  ;;  %v708_v10 = vld [vmem:[%s2393_s26 + $0x20] sm:$0xff]  ;;  %v962_v30 = vld [vmem:[%s2402_s19 + $0x70] sm:$0xff]  ;;  %v829_v3 = vld [vmem:[%s2377_s22 + $0x18] sm:$0x3]  ;;  %s3186_s0 = smov 16   ;;  %s2049_s3 = sshll.u32 %s537_s2, 3 }
  0x23   : > { %v952_v11 = vld [vmem:[%s2402_s19 + $0x20] sm:$0xff]  ;;  %v832_v31 = vld [vmem:[%s2377_s22 + $0x30] sm:$0xff]  ;;  %v1079_v43 = vld [vmem:[%s2413_s25 + $0x48] sm:$0x3]  ;;  %s3100_s28 = scalar_lea.vmem %s3163_s8, %s2049_s3 }
  0x24   : > { %v830_v12 = vld [vmem:[%s2377_s22 + $0x20] sm:$0xff]  ;;  %v1076_v33 = vld [vmem:[%s2413_s25 + $0x30] sm:$0xff]  ;;  %v715_v52 = vld [vmem:[%s2393_s26 + $0x58] sm:$0x3] }
  0x25   : > { %v1082_v13 = vld [vmem:[%s2413_s25 + $0x60] sm:$0xff]  ;;  %v1084_v34 = vld [vmem:[%s2413_s25 + $0x70] sm:$0xff] }
  0x26   : > { %v1074_v16 = vld [vmem:[%s2413_s25 + $0x20] sm:$0xff]  ;;  %v954_v35 = vld [vmem:[%s2402_s19 + $0x30] sm:$0xff] }
  0x27   : > { %1004 = vrot.lane.b32.xlu2 %v956_v6, %s3173_s18  ;;  %v582_v18 = vld [vmem:[%s2384_s15] sm:$0xff]  ;;  %v584_v39 = vld [vmem:[%s2384_s15 + $0x10] sm:$0xff] }
  0x28   : > { %v704_v21 = vld [vmem:[%s2393_s26] sm:$0xff]  ;;  %v828_v42 = vld [vmem:[%s2377_s22 + $0x10] sm:$0xff] }
  0x29   : > { %890 = vrot.lane.b32.xlu1 %v838_v5, %s3165_s24  ;;  %v826_v25 = vld [vmem:[%s2377_s22] sm:$0xff]  ;;  %v706_v44 = vld [vmem:[%s2393_s26 + $0x10] sm:$0xff] }
  0x2a   : > { %630 = vrot.lane.b32.xlu0 %v586_v7, %s3167_s12  ;;  %v948_v26 = vld [vmem:[%s2402_s19] sm:$0xff]  ;;  %v550_v51 = vld [vmem:[%s2466_s23 + $0x50] sm:$0xff] }
  0x2b   : > { %v1070_v29 = vld [vmem:[%s2413_s25] sm:$0xff]  ;;  %v950_v54 = vld [vmem:[%s2402_s19 + $0x10] sm:$0xff]  ;;  %572 = vst.msk [vmem:[#allocation2 + $0x50] sm:$0xff] %vm560_vm0, %v550_v51  ;;  %v593_v51 = vld [vmem:[%s2384_s15 + $0x58] sm:$0x3] }
  0x2c   : > { %v548_v32 = vld [vmem:[%s2466_s23 + $0x40] sm:$0xff]  ;;  %v1072_v61 = vld [vmem:[%s2413_s25 + $0x10] sm:$0xff] }
  0x2d   : > { %570 = vst.msk [vmem:[#allocation2 + $0x40] sm:$0xff] %vm560_vm0, %v548_v32  ;;  %v552_v36 = vld [vmem:[%s2466_s23 + $0x60] sm:$0xff]  ;;  %v554_v7 = vld [vmem:[%s2466_s23 + $0x70] sm:$0xff] }
  0x2e   : > { %574 = vst.msk [vmem:[#allocation2 + $0x60] sm:$0xff] %vm560_vm0, %v552_v36  ;;  %v544_v41 = vld [vmem:[%s2466_s23 + $0x20] sm:$0xff]  ;;  %v713_v36 = vld [vmem:[%s2393_s26 + $0x48] sm:$0x3]  ;;  %v542_v56 = vld [vmem:[%s2466_s23 + $0x10] sm:$0xff] }
  0x2f   : > { %1126 = vrot.lane.b32.xlu2 %v1078_v9, %s3171_s17  ;;  %566 = vst.msk [vmem:[#allocation2 + $0x20] sm:$0xff] %vm560_vm0, %v544_v41  ;;  %v540_v60 = vld [vmem:[%s2466_s23] sm:$0xff]  ;;  %v831_v9 = vld [vmem:[%s2377_s22 + $0x28] sm:$0x3] }
  0x30   : > { %561 = vst.msk [vmem:[#allocation2] sm:$0xff] %vm560_vm0, %v540_v60  ;;  %v2072_v32 = vld [vmem:[%s3161_s6 + $0x120] sm:$0xff]  ;;  %v1081_v60 = vld [vmem:[%s2413_s25 + $0x58] sm:$0x3] }
  0x31   : > { %1012 = vrot.lane.b32.xlu1 %v960_v8, %s3173_s18  ;;  %576 = vst.msk [vmem:[#allocation2 + $0x70] sm:$0xff] %vm560_vm0, %v554_v7  ;;  %v2090_v7 = vld [vmem:[%s3161_s6 + $0x50] sm:$0xff] }
  0x32   : > { %752 = vrot.lane.b32.xlu0 %v708_v10, %s3169_s13  ;;  %v546_v10 = vld [vmem:[%s2466_s23 + $0x30] sm:$0xff]  ;;  %564 = vst.msk [vmem:[#allocation2 + $0x10] sm:$0xff] %vm560_vm0, %v542_v56 }
  0x33   : > { %568 = vst.msk [vmem:[#allocation2 + $0x30] sm:$0xff] %vm560_vm0, %v546_v10  ;;  %v839_v10 = vld [vmem:[%s2377_s22 + $0x68] sm:$0x3] }
  0x37   : > { %874 = vrot.lane.b32.xlu2 %v830_v12, %s3165_s24  ;;  %v709_v12 = vld [vmem:[%s2393_s26 + $0x28] sm:$0x3] }
  0x39   : > { %996 = vrot.lane.b32.xlu1 %v952_v11, %s3173_s18  ;;  %v587_v11 = vld [vmem:[%s2384_s15 + $0x28] sm:$0x3] }
  0x3a   : > { %1134 = vrot.lane.b32.xlu0 %v1082_v13, %s3171_s17 }
  0x3f   : > { %642 = vrot.lane.b32.xlu2 %v592_v15, %s3167_s12 }
  0x41   : > { %764 = vrot.lane.b32.xlu1 %v714_v14, %s3169_s13 }
  0x42   : > { %1118 = vrot.lane.b32.xlu0 %v1074_v16, %s3171_s17 }
  0x47   : > { %622 = vrot.lane.b32.xlu2 %v582_v18, %s3167_s12  ;;  %v953_v18 = vld [vmem:[%s2402_s19 + $0x28] sm:$0x3] }
  0x49   : > { %886 = vrot.lane.b32.xlu1 %v836_v17, %s3165_s24  ;;  %v589_v17 = vld [vmem:[%s2384_s15 + $0x38] sm:$0x3] }
  0x4a   : > { %650 = vrot.lane.b32.xlu0 %v596_v19, %s3167_s12  ;;  %v1075_v19 = vld [vmem:[%s2413_s25 + $0x28] sm:$0x3] }
  0x4f   : > { %744 = vrot.lane.b32.xlu2 %v704_v21, %s3169_s13 }
  0x51   : > { %1008 = vrot.lane.b32.xlu1 %v958_v20, %s3173_s18  ;;  %v2077_v20 = vld [vmem:[%s3161_s6 + $0x148] sm:$0xff] }
  0x52   : > { %772 = vrot.lane.b32.xlu0 %v718_v22, %s3169_s13  ;;  %1365 = vmatpush.msrb.mxu2 %v2077_v20  ;;  %v2076_v22 = vld [vmem:[%s3161_s6 + $0x140] sm:$0xff] }
  0x54   : > { %1366 = vmatpush.msrb.mxu2 %v2076_v22  ;;  %v2059_v22 = vld [vmem:[%s3161_s6 + $0x98] sm:$0xff] }
  0x57   : > { %634 = vrot.lane.b32.xlu2 %v588_v24, %s3167_s12 }
  0x59   : > { %894 = vrot.lane.b32.xlu1 %v840_v23, %s3165_s24 }
  0x5a   : > { %866 = vrot.lane.b32.xlu0 %v826_v25, %s3165_s24  ;;  %v955_v25 = vld [vmem:[%s2402_s19 + $0x38] sm:$0x3] }
  0x5f   : > { %1130 = vrot.lane.b32.xlu2 %v1080_v27, %s3171_s17  ;;  %v2074_v27 = vld [vmem:[%s3161_s6 + $0x130] sm:$0xff] }
  0x61   : > { %988 = vrot.lane.b32.xlu1 %v948_v26, %s3173_s18  ;;  %v2075_v26 = vld [vmem:[%s3161_s6 + $0x138] sm:$0xff] }
  0x62   : > { %756 = vrot.lane.b32.xlu0 %v710_v28, %s3169_s13  ;;  %v711_v28 = vld [vmem:[%s2393_s26 + $0x38] sm:$0x3]  ;;  %1367 = vmatpush.msrb.mxu2 %v2075_v26 }
  0x64   : > { %1368 = vmatpush.msrb.mxu2 %v2074_v27  ;;  %v1083_v27 = vld [vmem:[%s2413_s25 + $0x68] sm:$0x3] }
  0x67   : > { %1016 = vrot.lane.b32.xlu2 %v962_v30, %s3173_s18  ;;  %v2073_v30 = vld [vmem:[%s3161_s6 + $0x128] sm:$0xff] }
  0x68   : > { %1369 = vmatpush.msrb.mxu2 %v2073_v30  ;;  %v961_v30 = vld [vmem:[%s2402_s19 + $0x68] sm:$0x3] }
  0x69   : > { %1110 = vrot.lane.b32.xlu1 %v1070_v29, %s3171_s17  ;;  %v833_v29 = vld [vmem:[%s2377_s22 + $0x38] sm:$0x3] }
  0x6a   : > { %878 = vrot.lane.b32.xlu0 %v832_v31, %s3165_s24  ;;  %1370 = vmatpush.msrb.mxu2 %v2072_v32  ;;  %v2105_v32 = vld [vmem:[%s3161_s6 + $0xe8] sm:$0xff] }
  0x6b   : > { %1514 = vmatpush.msrb.mxu0 %v2105_v32 }
  0x6f   : > { %1138 = vrot.lane.b32.xlu2 %v1084_v34, %s3171_s17 }
  0x71   : > { %1122 = vrot.lane.b32.xlu1 %v1076_v33, %s3171_s17 }
  0x72   : > { %1000 = vrot.lane.b32.xlu0 %v954_v35, %s3173_s18 }
  0x77   : > { %624 = vrot.lane.b32.xlu2 %v583_v38, %s3167_s12  ;;  %v591_v38 = vld [vmem:[%s2384_s15 + $0x48] sm:$0x3] }
  0x79   : > { %746 = vrot.lane.b32.xlu1 %v705_v37, %s3169_s13  ;;  %v2486_v40 = vpop.permute.xlu2 %768  ;;  %v1077_v37 = vld [vmem:[%s2413_s25 + $0x38] sm:$0x3] }
  0x7a   : > { %626 = vrot.lane.b32.xlu0 %v584_v39, %s3167_s12 }
  0x7f   : > { %748 = vrot.lane.b32.xlu2 %v706_v44, %s3169_s13  ;;  %v835_v44 = vld [vmem:[%s2377_s22 + $0x48] sm:$0x3] }
  0x81   : > { %870 = vrot.lane.b32.xlu1 %v828_v42, %s3165_s24  ;;  %v1005_v47 = vpop.permute.xlu2 %1004 }
  0x82   : > { %868 = vrot.lane.b32.xlu0 %v827_v45, %s3165_s24  ;;  %v957_v45 = vld [vmem:[%s2402_s19 + $0x48] sm:$0x3]  ;;  %s3188_s24 = smov 32  }
  0x87   : > { %990 = vrot.lane.b32.xlu2 %v949_v50, %s3173_s18  ;;  %v837_v50 = vld [vmem:[%s2377_s22 + $0x58] sm:$0x3] }
  0x89   : > { %1112 = vrot.lane.b32.xlu1 %v1071_v48, %s3171_s17  ;;  %v1127_v57 = vpop.permute.xlu2 %1126 }
  0x8a   : > { %992 = vrot.lane.b32.xlu0 %v950_v54, %s3173_s18 }
  0x8b   : > { %v883_v55 = vpop.permute.xlu1 %882 }
  0x8c   : > { %v639_v58 = vpop.permute.xlu0 %638 }
  0x8d   : > { %692 = vst.msk [vmem:[#allocation2 + $0x40] sm:$0xff] %vm682_vm1, %v639_v58  ;;  %v598_v58 = vld [vmem:[%s2384_s15 + $0x80] sm:$0xff] }
  0x8f   : > { %1114 = vrot.lane.b32.xlu2 %v1072_v61, %s3171_s17 }
  0x91   : > { %750 = vrot.lane.b32.xlu1 %v707_v59, %s3169_s13  ;;  %v875_v0 = vpop.permute.xlu2 %874  ;;  %v959_v59 = vld [vmem:[%s2402_s19 + $0x58] sm:$0x3] }
  0x92   : > { %628 = vrot.lane.b32.xlu0 %v585_v62, %s3184_s16 }
  0x93   : > { %v647_v63 = vpop.permute.xlu1 %646 }
  0x94   : > { %696 = vst.msk [vmem:[#allocation2 + $0x60] sm:$0xff] %vm682_vm1, %v647_v63  ;;  %v761_v1 = vpop.permute.xlu0 %760 }
  0x95   : > { %818 = vst.msk [vmem:[#allocation2 + $0x60] sm:$0xff] %vm804_vm2, %v2486_v40 }
  0x96   : > { %814 = vst.msk [vmem:[#allocation2 + $0x40] sm:$0xff] %vm804_vm2, %v761_v1  ;;  %v842_v1 = vld [vmem:[%s2377_s22 + $0x80] sm:$0xff] }
  0x97   : > { %936 = vst.msk [vmem:[#allocation2 + $0x40] sm:$0xff] %vm926_vm3, %v883_v55  ;;  %872 = vrot.lane.b32.xlu2 %v829_v3, %s3185_s21  ;;  %v2091_v3 = vld [vmem:[%s3161_s6 + $0x58] sm:$0xff] }
  0x98   : > { %1058 = vst.msk [vmem:[#allocation2 + $0x40] sm:$0xff] %vm1048_vm4, %v1005_v47  ;;  %v541_v47 = vld [vmem:[%s2466_s23 + $0x8] sm:$0x3]  ;;  %1455 = vmatpush.msrb.mxu3 %v2091_v3 }
  0x99   : > { %1116 = vrot.lane.b32.xlu1 %v1073_v2, %s3171_s17  ;;  %1180 = vst.msk [vmem:[#allocation2 + $0x40] sm:$0xff] %vm1170_vm5, %v1127_v57  ;;  %v643_v6 = vpop.permute.xlu2 %642  ;;  %v720_v2 = vld [vmem:[%s2393_s26 + $0x80] sm:$0xff] }
  0x9a   : > { %994 = vrot.lane.b32.xlu0 %v951_v4, %s3173_s18  ;;  %694 = vst.msk [vmem:[#allocation2 + $0x50] sm:$0xff] %vm682_vm1, %v643_v6  ;;  %v595_v4 = vld [vmem:[%s2384_s15 + $0x68] sm:$0x3]  ;;  %v2063_v6 = vld [vmem:[%s3161_s6 + $0xb8] sm:$0xff]  ;;  %1456 = vmatpush.msrb.mxu3 %v2090_v7 }
  0x9b   : > { %v891_v5 = vpop.permute.xlu1 %890  ;;  %563 = vst.msk [vmem:[#allocation2 + $0x8] sm:$0x3] %vm562_vm7, %v541_v47  ;;  %1306 = vmatpush.msrb.mxu1 %v2063_v6 }
  0x9c   : > { %940 = vst.msk [vmem:[#allocation2 + $0x60] sm:$0xff] %vm926_vm3, %v891_v5  ;;  %v631_v8 = vpop.permute.xlu0 %630 }
  0x9d   : > { %688 = vst.msk [vmem:[#allocation2 + $0x20] sm:$0xff] %vm682_vm1, %v631_v8 }
  0x9f   : > { %632 = vrot.lane.b32.xlu2 %v587_v11, %s3184_s16  ;;  %v2062_v11 = vld [vmem:[%s3161_s6 + $0xb0] sm:$0xff] }
  0xa0   : > { %v2554_v13 = vld [vmem:[#allocation2 + $0x40] sm:$0xff]  ;;  %1307 = vmatpush.msrb.mxu1 %v2062_v11  ;;  %v843_v11 = vld [vmem:[%s2377_s22 + $0x88] sm:$0x3] }
  0xa1   : > { %876 = vrot.lane.b32.xlu1 %v831_v9, %s3185_s21  ;;  %2054 = vmatmul.msk.f32.vlgmr.msra.gmra.mxu2 %vm1212_vm6, %v2554_v13  ;;  %v623_v15 = vpop.permute.xlu2 %622 }
  0xa2   : > { %754 = vrot.lane.b32.xlu0 %v709_v12, %s3169_s13  ;;  %683 = vst.msk [vmem:[#allocation2] sm:$0xff] %vm682_vm1, %v623_v15  ;;  %v2089_v12 = vld [vmem:[%s3161_s6 + $0x48] sm:$0xff] }
  0xa3   : > { %v1013_v14 = vpop.permute.xlu1 %1012  ;;  %1457 = vmatpush.msrb.mxu3 %v2089_v12  ;;  %v2061_v15 = vld [vmem:[%s3161_s6 + $0xa8] sm:$0xff] }
  0xa4   : > { %1062 = vst.msk [vmem:[#allocation2 + $0x60] sm:$0xff] %vm1048_vm4, %v1013_v14  ;;  %v753_v16 = vpop.permute.xlu0 %752  ;;  %v717_v14 = vld [vmem:[%s2393_s26 + $0x68] sm:$0x3]  ;;  %1308 = vmatpush.msrb.mxu1 %v2061_v15  ;;  %v551_v15 = vld [vmem:[%s2466_s23 + $0x58] sm:$0x3] }
  0xa5   : > { %810 = vst.msk [vmem:[#allocation2 + $0x20] sm:$0xff] %vm804_vm2, %v753_v16  ;;  %v2088_v16 = vld [vmem:[%s3161_s6 + $0x40] sm:$0xff]  ;;  %v965_v12 = vld [vmem:[%s2402_s19 + $0x88] sm:$0x3] }
  0xa6   : > { %932 = vst.msk [vmem:[#allocation2 + $0x20] sm:$0xff] %vm926_vm3, %v875_v0  ;;  %1458 = vmatpush.msrb.mxu3 %v2088_v16 }
  0xa7   : > { %998 = vrot.lane.b32.xlu2 %v953_v18, %s3173_s18  ;;  %v964_v18 = vld [vmem:[%s2402_s19 + $0x80] sm:$0xff]  ;;  %573 = vst.msk [vmem:[#allocation2 + $0x58] sm:$0x3] %vm562_vm7, %v551_v15  ;;  %v557_v15 = vld [vmem:[%s2466_s23 + $0x88] sm:$0x3] }
  0xa8   : > { %579 = vst.msk [vmem:[#allocation2 + $0x88] sm:$0x3] %vm562_vm7, %v557_v15 }
  0xa9   : > { %636 = vrot.lane.b32.xlu1 %v589_v17, %s3184_s16  ;;  %v745_v23 = vpop.permute.xlu2 %744  ;;  %v2060_v17 = vld [vmem:[%s3161_s6 + $0xa0] sm:$0xff] }
  0xaa   : > { %1120 = vrot.lane.b32.xlu0 %v1075_v19, %s3171_s17  ;;  %805 = vst.msk [vmem:[#allocation2] sm:$0xff] %vm804_vm2, %v745_v23  ;;  %v2087_v19 = vld [vmem:[%s3161_s6 + $0x38] sm:$0xff]  ;;  %1309 = vmatpush.msrb.mxu1 %v2060_v17  ;;  %v2086_v23 = vld [vmem:[%s3161_s6 + $0x30] sm:$0xff] }
  0xab   : > { %v997_v21 = vpop.permute.xlu1 %996  ;;  %1459 = vmatpush.msrb.mxu3 %v2087_v19  ;;  %v845_v17 = vld [vmem:[%s2377_s22 + $0x98] sm:$0x3] }
  0xac   : > { %1054 = vst.msk [vmem:[#allocation2 + $0x20] sm:$0xff] %vm1048_vm4, %v997_v21  ;;  %v1135_v24 = vpop.permute.xlu0 %1134  ;;  %1310 = vmatpush.msrb.mxu1 %v2059_v22  ;;  %v601_v19 = vld [vmem:[%s2384_s15 + $0x98] sm:$0x3] }
  0xad   : > { %1184 = vst.msk [vmem:[#allocation2 + $0x60] sm:$0xff] %vm1170_vm5, %v1135_v24  ;;  %1460 = vmatpush.msrb.mxu3 %v2086_v23 }
  0xaf   : > { %758 = vrot.lane.b32.xlu2 %v711_v28, %s3186_s0  ;;  %v2058_v28 = vld [vmem:[%s3161_s6 + $0x90] sm:$0xff] }
  0xb0   : > { %1311 = vmatpush.msrb.mxu1 %v2058_v28 }
  0xb1   : > { %1002 = vrot.lane.b32.xlu1 %v955_v25, %s3173_s18  ;;  %v635_v33 = vpop.permute.xlu2 %634  ;;  %v543_v25 = vld [vmem:[%s2466_s23 + $0x18] sm:$0x3] }
  0xb2   : > { %880 = vrot.lane.b32.xlu0 %v833_v29, %s3185_s21  ;;  %690 = vst.msk [vmem:[#allocation2 + $0x30] sm:$0xff] %vm682_vm1, %v635_v33  ;;  %v1086_v29 = vld [vmem:[%s2413_s25 + $0x80] sm:$0xff] }
  0xb3   : > { %v765_v31 = vpop.permute.xlu1 %764  ;;  %565 = vst.msk [vmem:[#allocation2 + $0x18] sm:$0x3] %vm562_vm7, %v543_v25  ;;  %v1089_v25 = vld [vmem:[%s2413_s25 + $0x98] sm:$0x3] }
  0xb4   : > { %816 = vst.msk [vmem:[#allocation2 + $0x50] sm:$0xff] %vm804_vm2, %v765_v31  ;;  %v1119_v34 = vpop.permute.xlu0 %1118  ;;  %v2599_v35 = vld [vmem:[#allocation2 + $0x60] sm:$0xff] }
  0xb5   : > { %1176 = vst.msk [vmem:[#allocation2 + $0x20] sm:$0xff] %vm1170_vm5, %v1119_v34  ;;  %2056 = vmatmul.msk.f32.vlgmr.msra.gmra.mxu3 %vm1212_vm6, %v2599_v35  ;;  %v545_v34 = vld [vmem:[%s2466_s23 + $0x28] sm:$0x3] }
  0xb6   : > { %567 = vst.msk [vmem:[#allocation2 + $0x28] sm:$0x3] %vm562_vm7, %v545_v34 }
  0xb7   : > { %1124 = vrot.lane.b32.xlu2 %v1077_v37, %s3187_s14  ;;  %v597_v37 = vld [vmem:[%s2384_s15 + $0x78] sm:$0x3] }
  0xb9   : > { %762 = vrot.lane.b32.xlu1 %v713_v36, %s3186_s0  ;;  %v1131_v40 = vpop.permute.xlu2 %1130 }
  0xba   : > { %640 = vrot.lane.b32.xlu0 %v591_v38, %s3184_s16  ;;  %v2104_v38 = vld [vmem:[%s3161_s6 + $0xe0] sm:$0xff] }
  0xbb   : > { %v887_v39 = vpop.permute.xlu1 %886  ;;  %1515 = vmatpush.msrb.mxu0 %v2104_v38 }
  0xbc   : > { %938 = vst.msk [vmem:[#allocation2 + $0x50] sm:$0xff] %vm926_vm3, %v887_v39  ;;  %v651_v41 = vpop.permute.xlu0 %650  ;;  %v2612_v42 = vld [vmem:[#allocation2 + $0x20] sm:$0xff] }
  0xbd   : > { %698 = vst.msk [vmem:[#allocation2 + $0x70] sm:$0xff] %vm682_vm1, %v651_v41  ;;  %2052 = vmatmul.msk.f32.vlgmr.msra.gmra.mxu1 %vm1212_vm6, %v2612_v42  ;;  %v2103_v41 = vld [vmem:[%s3161_s6 + $0xd8] sm:$0xff] }
  0xbe   : > { %1516 = vmatpush.msrb.mxu0 %v2103_v41  ;;  %v2132_v41 = vld [vmem:[%s3161_s6 + $0x80] sm:$0xff] }
  0xbf   : > { %884 = vrot.lane.b32.xlu2 %v835_v44, %s3185_s21  ;;  %v722_v44 = vld [vmem:[%s2393_s26 + $0x90] sm:$0xff] }
  0xc1   : > { %1128 = vrot.lane.b32.xlu1 %v1079_v43, %s3187_s14  ;;  %v1017_v48 = vpop.permute.xlu2 %1016  ;;  %v2102_v43 = vld [vmem:[%s3161_s6 + $0xd0] sm:$0xff] }
  0xc2   : > { %1006 = vrot.lane.b32.xlu0 %v957_v45, %s3173_s18  ;;  %1517 = vmatpush.msrb.mxu0 %v2102_v43  ;;  %v2146_v43 = vld [vmem:[%s3161_s6 + $0x110] sm:$0xff] }
  0xc3   : > { %v1009_v46 = vpop.permute.xlu1 %1008 }
  0xc4   : > { %1060 = vst.msk [vmem:[#allocation2 + $0x50] sm:$0xff] %vm1048_vm4, %v1009_v46  ;;  %v773_v49 = vpop.permute.xlu0 %772  ;;  %v2101_v46 = vld [vmem:[%s3161_s6 + $0xc8] sm:$0xff] }
  0xc5   : > { %1182 = vst.msk [vmem:[#allocation2 + $0x50] sm:$0xff] %vm1170_vm5, %v1131_v40  ;;  %v600_v40 = vld [vmem:[%s2384_s15 + $0x90] sm:$0xff]  ;;  %1518 = vmatpush.msrb.mxu0 %v2101_v46 }
  0xc6   : > { %820 = vst.msk [vmem:[#allocation2 + $0x70] sm:$0xff] %vm804_vm2, %v773_v49  ;;  %v966_v49 = vld [vmem:[%s2402_s19 + $0x90] sm:$0xff] }
  0xc7   : > { %644 = vrot.lane.b32.xlu2 %v593_v51, %s3184_s16  ;;  %v844_v51 = vld [vmem:[%s2377_s22 + $0x90] sm:$0xff] }
  0xc9   : > { %888 = vrot.lane.b32.xlu1 %v837_v50, %s3185_s21  ;;  %v1139_v55 = vpop.permute.xlu2 %1138  ;;  %v2100_v50 = vld [vmem:[%s3161_s6 + $0xc0] sm:$0xff] }
  0xca   : > { %766 = vrot.lane.b32.xlu0 %v715_v52, %s3186_s0  ;;  %1519 = vmatpush.msrb.mxu0 %v2100_v50  ;;  %v719_v52 = vld [vmem:[%s2393_s26 + $0x78] sm:$0x3]  ;;  %v2116_v50 = vld [vmem:[%s3161_s6 + $0x160] sm:$0xff] }
  0xcb   : > { %v895_v53 = vpop.permute.xlu1 %894 }
  0xcc   : > { %942 = vst.msk [vmem:[#allocation2 + $0x70] sm:$0xff] %vm926_vm3, %v895_v53  ;;  %v2635_v54 = vld [vmem:[#allocation2 + $0x50] sm:$0xff]  ;;  %v867_v57 = vpop.permute.xlu0 %866 }
  0xcd   : > { %2055 = vmatmul.msk.f32.gmra.mxu2 %vm1212_vm6, %v2635_v54  ;;  %1064 = vst.msk [vmem:[#allocation2 + $0x70] sm:$0xff] %vm1048_vm4, %v1017_v48 }
  0xce   : > { %1186 = vst.msk [vmem:[#allocation2 + $0x70] sm:$0xff] %vm1170_vm5, %v1139_v55  ;;  %v547_v55 = vld [vmem:[%s2466_s23 + $0x38] sm:$0x3] }
  0xcf   : > { %927 = vst.msk [vmem:[#allocation2] sm:$0xff] %vm926_vm3, %v867_v57  ;;  %1010 = vrot.lane.b32.xlu2 %v959_v59, %s3173_s18  ;;  %v841_v59 = vld [vmem:[%s2377_s22 + $0x78] sm:$0x3] }
  0xd0   : > { %569 = vst.msk [vmem:[#allocation2 + $0x38] sm:$0x3] %vm562_vm7, %v547_v55  ;;  %v555_v55 = vld [vmem:[%s2466_s23 + $0x78] sm:$0x3] }
  0xd1   : > { %654 = vrot.lane.b32.xlu1 %v598_v58, %s3184_s16  ;;  %v625_v62 = vpop.permute.xlu2 %624  ;;  %v963_v58 = vld [vmem:[%s2402_s19 + $0x78] sm:$0x3]  ;;  %577 = vst.msk [vmem:[#allocation2 + $0x78] sm:$0x3] %vm562_vm7, %v555_v55 }
  0xd2   : > { %1132 = vrot.lane.b32.xlu0 %v1081_v60, %s3187_s14  ;;  %685 = vst.msk [vmem:[#allocation2 + $0x8] sm:$0x3] %vm684_vm8, %v625_v62  ;;  %v1088_v60 = vld [vmem:[%s2413_s25 + $0x90] sm:$0xff] }
  0xd3   : > { %v989_v61 = vpop.permute.xlu1 %988 }
  0xd4   : > { %1049 = vst.msk [vmem:[#allocation2] sm:$0xff] %vm1048_vm4, %v989_v61  ;;  %v757_v0 = vpop.permute.xlu0 %756 }
  0xd5   : > { %2078 = vmatmul.msk.f32.vlgmr.msrb.gmra.mxu2 %vm1212_vm6, %v2612_v42  ;;  %v2653_v63 = vld [vmem:[#allocation2 + $0x70] sm:$0xff]  ;;  %812 = vst.msk [vmem:[#allocation2 + $0x30] sm:$0xff] %vm804_vm2, %v757_v0 }
  0xd6   : > { %2057 = vmatmul.msk.f32.gmra.mxu3 %vm1212_vm6, %v2653_v63 }
  0xd7   : > { %776 = vrot.lane.b32.xlu2 %v720_v2, %s3186_s0  ;;  %v721_v2 = vld [vmem:[%s2393_s26 + $0x88] sm:$0x3] }
  0xd9   : > { %898 = vrot.lane.b32.xlu1 %v842_v1, %s3185_s21  ;;  %v749_v8 = vpop.permute.xlu2 %748 }
  0xda   : > { %648 = vrot.lane.b32.xlu0 %v595_v4, %s3184_s16  ;;  %v1085_v4 = vld [vmem:[%s2413_s25 + $0x78] sm:$0x3] }
  0xdb   : > { %v1111_v5 = vpop.permute.xlu1 %1110 }
  0xdc   : > { %1171 = vst.msk [vmem:[#allocation2] sm:$0xff] %vm1170_vm5, %v1111_v5  ;;  %v879_v9 = vpop.permute.xlu0 %878  ;;  %v599_v5 = vld [vmem:[%s2384_s15 + $0x88] sm:$0x3] }
  0xdd   : > { %934 = vst.msk [vmem:[#allocation2 + $0x30] sm:$0xff] %vm926_vm3, %v879_v9  ;;  %v1087_v9 = vld [vmem:[%s2413_s25 + $0x88] sm:$0x3] }
  0xdf   : > { %770 = vrot.lane.b32.xlu2 %v717_v14, %s3186_s0 }
  0xe1   : > { %892 = vrot.lane.b32.xlu1 %v839_v10, %s3185_s21  ;;  %v991_v24 = vpop.permute.xlu2 %990  ;;  %v549_v10 = vld [vmem:[%s2466_s23 + $0x48] sm:$0x3] }
  0xe2   : > { %1020 = vrot.lane.b32.xlu0 %v964_v18, %s3188_s24  ;;  %571 = vst.msk [vmem:[#allocation2 + $0x48] sm:$0x3] %vm562_vm7, %v549_v10 }
  0xe3   : > { %v1123_v20 = vpop.permute.xlu1 %1122  ;;  %v1196_v21 = vld [vmem:[#allocation2] sm:$0xff] }
  0xe4   : > { %2050 = vmatmul.msk.f32.vlgmr.msra.gmra.mxu0 %vm1212_vm6, %v1196_v21  ;;  %v1001_v26 = vpop.permute.xlu0 %1000 }
  0xe5   : > { %1056 = vst.msk [vmem:[#allocation2 + $0x30] sm:$0xff] %vm1048_vm4, %v1001_v26 }
  0xe6   : > { %1178 = vst.msk [vmem:[#allocation2 + $0x30] sm:$0xff] %vm1170_vm5, %v1123_v20  ;;  %v723_v20 = vld [vmem:[%s2393_s26 + $0x98] sm:$0x3] }
  0xe7   : > { %1142 = vrot.lane.b32.xlu2 %v1086_v29, %s3187_s14 }
  0xe9   : > { %1136 = vrot.lane.b32.xlu1 %v1083_v27, %s3187_s14  ;;  %v1115_v33 = vpop.permute.xlu2 %1114  ;;  %v556_v27 = vld [vmem:[%s2466_s23 + $0x80] sm:$0xff] }
  0xea   : > { %1014 = vrot.lane.b32.xlu0 %v961_v30, %s3188_s24  ;;  %578 = vst.msk [vmem:[#allocation2 + $0x80] sm:$0xff] %vm560_vm0, %v556_v27  ;;  %v2156_v27 = vld [vmem:[%s3161_s6 + $0x180] sm:$0xff] }
  0xeb   : > { %v747_v31 = vpop.permute.xlu1 %746 }
  0xec   : > { %807 = vst.msk [vmem:[#allocation2 + $0x8] sm:$0x3] %vm806_vm9, %v747_v31  ;;  %v627_v36 = vpop.permute.xlu0 %626 }
  0xed   : > { %686 = vst.msk [vmem:[#allocation2 + $0x10] sm:$0xff] %vm682_vm1, %v627_v36  ;;  %v2731_v39 = vld [vmem:[#allocation2 + $0x30] sm:$0xff]  ;;  %v2133_v36 = vld [vmem:[%s3161_s6 + $0x88] sm:$0xff] }
  0xee   : > { %808 = vst.msk [vmem:[#allocation2 + $0x10] sm:$0xff] %vm804_vm2, %v749_v8  ;;  %2053 = vmatmul.msk.f32.gmra.mxu1 %vm1212_vm6, %v2731_v39  ;;  %2079 = vmatmul.msk.f32.gmra.mxu2 %vm1212_vm6, %v2731_v39 }
  0xef   : > { %658 = vrot.lane.b32.xlu2 %v600_v40, %s3184_s16  ;;  %1663 = vmatpush.msra.mxu2 %v2133_v36  ;;  %v2161_v40 = vld [vmem:[%s3161_s6 + $0x1a8] sm:$0xff] }
  0xf0   : > { %1781 = vmatpush.msra.mxu0 %v2161_v40 }
  0xf1   : > { %652 = vrot.lane.b32.xlu1 %v597_v37, %s3184_s16  ;;  %v873_v47 = vpop.permute.xlu2 %872  ;;  %1664 = vmatpush.msra.mxu2 %v2132_v41 }
  0xf2   : > { %780 = vrot.lane.b32.xlu0 %v722_v44, %s3186_s0 }
  0xf3   : > { %v871_v45 = vpop.permute.xlu1 %870 }
  0xf4   : > { %930 = vst.msk [vmem:[#allocation2 + $0x10] sm:$0xff] %vm926_vm3, %v871_v45  ;;  %v869_v48 = vpop.permute.xlu0 %868  ;;  %v558_v45 = vld [vmem:[%s2466_s23 + $0x90] sm:$0xff] }
  0xf5   : > { %929 = vst.msk [vmem:[#allocation2 + $0x8] sm:$0x3] %vm928_vm10, %v869_v48 }
  0xf6   : > { %2080 = vmatmul.msk.f32.gmra.mxu2 %vm1212_vm6, %v2554_v13  ;;  %1051 = vst.msk [vmem:[#allocation2 + $0x8] sm:$0x3] %vm1050_vm11, %v991_v24  ;;  %v967_v24 = vld [vmem:[%s2402_s19 + $0x98] sm:$0x3] }
  0xf7   : > { %902 = vrot.lane.b32.xlu2 %v844_v51, %s3185_s21  ;;  %580 = vst.msk [vmem:[#allocation2 + $0x90] sm:$0xff] %vm560_vm0, %v558_v45  ;;  %v2160_v51 = vld [vmem:[%s3161_s6 + $0x1a0] sm:$0xff] }
  0xf8   : > { %1782 = vmatpush.msra.mxu0 %v2160_v51 }
  0xf9   : > { %1024 = vrot.lane.b32.xlu1 %v966_v49, %s3188_s24  ;;  %v633_v56 = vpop.permute.xlu2 %632  ;;  %v2117_v49 = vld [vmem:[%s3161_s6 + $0x168] sm:$0xff] }
  0xfa   : > { %774 = vrot.lane.b32.xlu0 %v719_v52, %s3186_s0  ;;  %689 = vst.msk [vmem:[#allocation2 + $0x28] sm:$0x3] %vm684_vm8, %v633_v56  ;;  %v2131_v52 = vld [vmem:[%s3161_s6 + $0x78] sm:$0xff] }
  0xfb   : > { %v1113_v53 = vpop.permute.xlu1 %1112  ;;  %1665 = vmatpush.msra.mxu2 %v2131_v52  ;;  %v2115_v56 = vld [vmem:[%s3161_s6 + $0x158] sm:$0xff] }
  0xfc   : > { %1173 = vst.msk [vmem:[#allocation2 + $0x8] sm:$0x3] %vm1172_vm12, %v1113_v53  ;;  %v993_v57 = vpop.permute.xlu0 %992 }
  0xfd   : > { %1052 = vst.msk [vmem:[#allocation2 + $0x10] sm:$0xff] %vm1048_vm4, %v993_v57 }
  0xfe   : > { %1174 = vst.msk [vmem:[#allocation2 + $0x10] sm:$0xff] %vm1170_vm5, %v1115_v33  ;;  %2081 = vmatmul.msk.f32.gmra.mxu2 %vm1212_vm6, %v2635_v54  ;;  %v553_v33 = vld [vmem:[%s2466_s23 + $0x68] sm:$0x3] }
  0xff   : > { %896 = vrot.lane.b32.xlu2 %v841_v59, %s3185_s21  ;;  %575 = vst.msk [vmem:[#allocation2 + $0x68] sm:$0x3] %vm562_vm7, %v553_v33  ;;  %v2114_v59 = vld [vmem:[%s3161_s6 + $0x150] sm:$0xff] }
 0x101   : > { %1018 = vrot.lane.b32.xlu1 %v963_v58, %s3188_s24  ;;  %v999_v0 = vpop.permute.xlu2 %998 }
 0x102   : > { %1146 = vrot.lane.b32.xlu0 %v1088_v60, %s3187_s14  ;;  %v2145_v60 = vld [vmem:[%s3161_s6 + $0x108] sm:$0xff] }
 0x103   : > { %v751_v61 = vpop.permute.xlu1 %750  ;;  %v1404_v62 = vld [vmem:[#allocation2 + $0x1] sm:$0xff] }
 0x104   : > { %2092 = vmatmul.msk.f32.vlgmr.msrb.gmra.mxu3 %vm1212_vm6, %v1404_v62  ;;  %v629_v1 = vpop.permute.xlu0 %628 }
 0x105   : > { %687 = vst.msk [vmem:[#allocation2 + $0x18] sm:$0x3] %vm684_vm8, %v629_v1  ;;  %v1197_v3 = vld [vmem:[#allocation2 + $0x10] sm:$0xff] }
 0x106   : > { %809 = vst.msk [vmem:[#allocation2 + $0x18] sm:$0x3] %vm806_vm9, %v751_v61  ;;  %2064 = vmatmul.msk.f32.vlgmr.msrb.gmra.mxu1 %vm1212_vm6, %v1197_v3  ;;  %2082 = vmatmul.msk.f32.gmra.mxu2 %vm1212_vm6, %v2599_v35 }
 0x107   : > { %931 = vst.msk [vmem:[#allocation2 + $0x18] sm:$0x3] %vm928_vm10, %v873_v47  ;;  %2051 = vmatmul.msk.f32.gmra.mxu0 %vm1212_vm6, %v1197_v3  ;;  %1140 = vrot.lane.b32.xlu2 %v1085_v4, %s3187_s14  ;;  %v2159_v3 = vld [vmem:[%s3161_s6 + $0x198] sm:$0xff]  ;;  %v2144_v4 = vld [vmem:[%s3161_s6 + $0x100] sm:$0xff] }
 0x108   : > { %1783 = vmatpush.msra.mxu0 %v2159_v3 }
 0x109   : > { %778 = vrot.lane.b32.xlu1 %v721_v2, %s3186_s0  ;;  %v759_v7 = vpop.permute.xlu2 %758  ;;  %v2130_v2 = vld [vmem:[%s3161_s6 + $0x70] sm:$0xff] }
 0x10a   : > { %656 = vrot.lane.b32.xlu0 %v599_v5, %s3184_s16  ;;  %1666 = vmatpush.msra.mxu2 %v2130_v2 }
 0x10b   : > { %v1117_v6 = vpop.permute.xlu1 %1116 }
 0x10c   : > { %v995_v8 = vpop.permute.xlu0 %994 }
 0x10d   : > { %1053 = vst.msk [vmem:[#allocation2 + $0x18] sm:$0x3] %vm1050_vm11, %v995_v8  ;;  %v2158_v8 = vld [vmem:[%s3161_s6 + $0x190] sm:$0xff] }
 0x10e   : > { %1175 = vst.msk [vmem:[#allocation2 + $0x18] sm:$0x3] %vm1172_vm12, %v1117_v6  ;;  %2065 = vmatmul.msk.f32.gmra.mxu1 %vm1212_vm6, %v2612_v42  ;;  %2083 = vmatmul.msk.f32.gmra.mxu2 %vm1212_vm6, %v2653_v63 }
 0x10f   : > { %900 = vrot.lane.b32.xlu2 %v843_v11, %s3185_s21  ;;  %1784 = vmatpush.msra.mxu0 %v2158_v8  ;;  %v2143_v11 = vld [vmem:[%s3161_s6 + $0xf8] sm:$0xff] }
 0x111   : > { %1144 = vrot.lane.b32.xlu1 %v1087_v9, %s3187_s14  ;;  %v1125_v42 = vpop.permute.xlu2 %1124  ;;  %v2129_v9 = vld [vmem:[%s3161_s6 + $0x68] sm:$0xff] }
 0x112   : > { %1022 = vrot.lane.b32.xlu0 %v965_v12, %s3188_s24  ;;  %1667 = vmatpush.msra.mxu2 %v2129_v9 }
 0x113   : > { %v877_v14 = vpop.permute.xlu1 %876 }
 0x114   : > { %v755_v16 = vpop.permute.xlu0 %754 }
 0x115   : > { %811 = vst.msk [vmem:[#allocation2 + $0x28] sm:$0x3] %vm806_vm9, %v755_v16  ;;  %v1405_v18 = vld [vmem:[#allocation2 + $0x11] sm:$0xff] }
 0x116   : > { %933 = vst.msk [vmem:[#allocation2 + $0x28] sm:$0x3] %vm928_vm10, %v877_v14  ;;  %2066 = vmatmul.msk.f32.gmra.mxu1 %vm1212_vm6, %v2731_v39  ;;  %2093 = vmatmul.msk.f32.gmra.mxu3 %vm1212_vm6, %v1405_v18 }
 0x117   : > { %1055 = vst.msk [vmem:[#allocation2 + $0x28] sm:$0x3] %vm1050_vm11, %v999_v0  ;;  %2106 = vmatmul.msk.f32.vlgmr.msrb.gmra.mxu0 %vm1212_vm6, %v1405_v18  ;;  %660 = vrot.lane.b32.xlu2 %v601_v19, %s3184_s16  ;;  %v2128_v18 = vld [vmem:[%s3161_s6 + $0x60] sm:$0xff] }
 0x118   : > { %1668 = vmatpush.msra.mxu2 %v2128_v18 }
 0x119   : > { %904 = vrot.lane.b32.xlu1 %v845_v17, %s3185_s21  ;;  %v885_v22 = vpop.permute.xlu2 %884  ;;  %v2157_v17 = vld [vmem:[%s3161_s6 + $0x188] sm:$0xff] }
 0x11a   : > { %782 = vrot.lane.b32.xlu0 %v723_v20, %s3186_s0  ;;  %1785 = vmatpush.msra.mxu0 %v2157_v17 }
 0x11b   : > { %v637_v21 = vpop.permute.xlu1 %636 }
 0x11c   : > { %691 = vst.msk [vmem:[#allocation2 + $0x38] sm:$0x3] %vm684_vm8, %v637_v21  ;;  %v1121_v23 = vpop.permute.xlu0 %1120  ;;  %v2142_v21 = vld [vmem:[%s3161_s6 + $0xf0] sm:$0xff]  ;;  %1786 = vmatpush.msra.mxu0 %v2156_v27 }
 0x11d   : > { %813 = vst.msk [vmem:[#allocation2 + $0x38] sm:$0x3] %vm806_vm9, %v759_v7 }
 0x11e   : > { %1177 = vst.msk [vmem:[#allocation2 + $0x28] sm:$0x3] %vm1172_vm12, %v1121_v23  ;;  %2067 = vmatmul.msk.f32.gmra.mxu1 %vm1212_vm6, %v2554_v13 }
 0x11f   : > { %1026 = vrot.lane.b32.xlu2 %v967_v24, %s3188_s24  ;;  %v559_v24 = vld [vmem:[%s2466_s23 + $0x98] sm:$0x3] }
 0x120   : > { %581 = vst.msk [vmem:[#allocation2 + $0x98] sm:$0x3] %vm562_vm7, %v559_v24 }
 0x121   : > { %v645_v28 = vpop.permute.xlu2 %644 }
 0x122   : > { %1148 = vrot.lane.b32.xlu0 %v1089_v25, %s3187_s14  ;;  %695 = vst.msk [vmem:[#allocation2 + $0x58] sm:$0x3] %vm684_vm8, %v645_v28 }
 0x123   : > { %v1003_v26 = vpop.permute.xlu1 %1002 }
 0x124   : > { %v881_v29 = vpop.permute.xlu0 %880  ;;  %v3028_v51 = vpop.f32.mrf.mxu2 }
 0x125   : > { %v2834_v30 = vld [vmem:[#allocation2 + $0x21] sm:$0xff]  ;;  %935 = vst.msk [vmem:[#allocation2 + $0x38] sm:$0x3] %vm928_vm10, %v881_v29 }
 0x126   : > { %2094 = vmatmul.msk.f32.gmra.mxu3 %vm1212_vm6, %v2834_v30  ;;  %2107 = vmatmul.msk.f32.gmra.mxu0 %vm1212_vm6, %v2834_v30  ;;  %1057 = vst.msk [vmem:[#allocation2 + $0x38] sm:$0x3] %vm1050_vm11, %v1003_v26 }
 0x127   : > { %2068 = vmatmul.msk.f32.gmra.mxu1 %vm1212_vm6, %v2635_v54  ;;  %1179 = vst.msk [vmem:[#allocation2 + $0x38] sm:$0x3] %vm1172_vm12, %v1125_v42  ;;  %v2147_v54 = vld [vmem:[%s3161_s6 + $0x118] sm:$0xff] }
 0x128   : > { %1722 = vmatpush.msra.mxu3 %v2147_v54 }
 0x129   : > { %v1011_v31 = vpop.permute.xlu2 %1010 }
 0x12a   : > { %1723 = vmatpush.msra.mxu3 %v2146_v43 }
 0x12b   : > { %v763_v13 = vpop.permute.xlu1 %762 }
 0x12c   : > { %v641_v32 = vpop.permute.xlu0 %640  ;;  %1724 = vmatpush.msra.mxu3 %v2145_v60 }
 0x12d   : > { %693 = vst.msk [vmem:[#allocation2 + $0x48] sm:$0x3] %vm684_vm8, %v641_v32 }
 0x12e   : > { %815 = vst.msk [vmem:[#allocation2 + $0x48] sm:$0x3] %vm806_vm9, %v763_v13  ;;  %v2851_v34 = vld [vmem:[#allocation2 + $0x31] sm:$0xff]  ;;  %1725 = vmatpush.msra.mxu3 %v2144_v4 }
 0x12f   : > { %2069 = vmatmul.msk.f32.gmra.mxu1 %vm1212_vm6, %v2599_v35  ;;  %937 = vst.msk [vmem:[#allocation2 + $0x48] sm:$0x3] %vm928_vm10, %v885_v22  ;;  %2095 = vmatmul.msk.f32.gmra.mxu3 %vm1212_vm6, %v2851_v34  ;;  %v2119_v35 = vld [vmem:[%s3161_s6 + $0x178] sm:$0xff] }
 0x130   : > { %2108 = vmatmul.msk.f32.gmra.mxu0 %vm1212_vm6, %v2851_v34  ;;  %1573 = vmatpush.msra.mxu1 %v2119_v35  ;;  %v1612_v35 = vld [vmem:[#allocation2 + $0x2] sm:$0xff]  ;;  %v1615_v43 = vld [vmem:[#allocation2 + $0x32] sm:$0xff] }
 0x131   : > { %v777_v38 = vpop.permute.xlu2 %776  ;;  %1726 = vmatpush.msra.mxu3 %v2143_v11 }
 0x133   : > { %v1129_v37 = vpop.permute.xlu1 %1128  ;;  %1727 = vmatpush.msra.mxu3 %v2142_v21 }
 0x134   : > { %v1007_v39 = vpop.permute.xlu0 %1006 }
 0x135   : > { %1059 = vst.msk [vmem:[#allocation2 + $0x48] sm:$0x3] %vm1050_vm11, %v1007_v39 }
 0x136   : > { %1181 = vst.msk [vmem:[#allocation2 + $0x48] sm:$0x3] %vm1172_vm12, %v1129_v37  ;;  %v1614_v37 = vld [vmem:[#allocation2 + $0x22] sm:$0xff] }
 0x137   : > { %2070 = vmatmul.msk.f32.gmra.mxu1 %vm1212_vm6, %v2653_v63  ;;  %v2118_v63 = vld [vmem:[%s3161_s6 + $0x170] sm:$0xff] }
 0x138   : > { %1574 = vmatpush.msra.mxu1 %v2118_v63 }
 0x139   : > { %v771_v46 = vpop.permute.xlu2 %770 }
 0x13a   : > { %1575 = vmatpush.msra.mxu1 %v2117_v49 }
 0x13b   : > { %v889_v44 = vpop.permute.xlu1 %888 }
 0x13c   : > { %v767_v47 = vpop.permute.xlu0 %766  ;;  %1576 = vmatpush.msra.mxu1 %v2116_v50 }
 0x13d   : > { %817 = vst.msk [vmem:[#allocation2 + $0x58] sm:$0x3] %vm806_vm9, %v767_v47  ;;  %v2887_v48 = vld [vmem:[#allocation2 + $0x41] sm:$0xff] }
 0x13e   : > { %939 = vst.msk [vmem:[#allocation2 + $0x58] sm:$0x3] %vm928_vm10, %v889_v44  ;;  %2096 = vmatmul.msk.f32.gmra.mxu3 %vm1212_vm6, %v2887_v48  ;;  %2109 = vmatmul.msk.f32.gmra.mxu0 %vm1212_vm6, %v2887_v48  ;;  %v1616_v63 = vld [vmem:[#allocation2 + $0x42] sm:$0xff] }
 0x13f   : > { %1061 = vst.msk [vmem:[#allocation2 + $0x58] sm:$0x3] %vm1050_vm11, %v1011_v31  ;;  %1577 = vmatpush.msra.mxu1 %v2115_v56 }
 0x141   : > { %v1143_v57 = vpop.permute.xlu2 %1142  ;;  %1578 = vmatpush.msra.mxu1 %v2114_v59 }
 0x143   : > { %v655_v53 = vpop.permute.xlu1 %654 }
 0x144   : > { %700 = vst.msk [vmem:[#allocation2 + $0x80] sm:$0xff] %vm682_vm1, %v655_v53  ;;  %v1133_v58 = vpop.permute.xlu0 %1132  ;;  %v3033_v53 = vpop.f32.mrf.mxu3 }
 0x145   : > { %822 = vst.msk [vmem:[#allocation2 + $0x80] sm:$0xff] %vm804_vm2, %v777_v38 }
 0x146   : > { %1183 = vst.msk [vmem:[#allocation2 + $0x58] sm:$0x3] %vm1172_vm12, %v1133_v58 }
 0x149   : > { %v659_v62 = vpop.permute.xlu2 %658 }
 0x14a   : > { %702 = vst.msk [vmem:[#allocation2 + $0x90] sm:$0xff] %vm682_vm1, %v659_v62 }
 0x14b   : > { %v899_v61 = vpop.permute.xlu1 %898 }
 0x14c   : > { %944 = vst.msk [vmem:[#allocation2 + $0x80] sm:$0xff] %vm926_vm3, %v899_v61  ;;  %v649_v0 = vpop.permute.xlu0 %648 }
 0x14d   : > { %v2922_v1 = vld [vmem:[#allocation2 + $0x51] sm:$0xff]  ;;  %697 = vst.msk [vmem:[#allocation2 + $0x68] sm:$0x3] %vm684_vm8, %v649_v0 }
 0x14e   : > { %2097 = vmatmul.msk.f32.gmra.mxu3 %vm1212_vm6, %v2922_v1  ;;  %2110 = vmatmul.msk.f32.gmra.mxu0 %vm1212_vm6, %v2922_v1  ;;  %819 = vst.msk [vmem:[#allocation2 + $0x68] sm:$0x3] %vm806_vm9, %v771_v46  ;;  %v3016_v46 = vpop.f32.mrf.mxu1  ;;  %v1617_v47 = vld [vmem:[#allocation2 + $0x52] sm:$0xff] }
 0x150   : > { %v3035_v55 = vpop.f32.mrf.mxu2 }
 0x151   : > { %v903_v6 = vpop.permute.xlu2 %902 }
 0x153   : > { %v893_v5 = vpop.permute.xlu1 %892 }
 0x154   : > { %941 = vst.msk [vmem:[#allocation2 + $0x68] sm:$0x3] %vm928_vm10, %v893_v5  ;;  %v1021_v7 = vpop.permute.xlu0 %1020 }
 0x155   : > { %1066 = vst.msk [vmem:[#allocation2 + $0x80] sm:$0xff] %vm1048_vm4, %v1021_v7 }
 0x156   : > { %1188 = vst.msk [vmem:[#allocation2 + $0x80] sm:$0xff] %vm1170_vm5, %v1143_v57 }
 0x158   : > { %v1372_v59 = vpop.f32.mrf.mxu2 }
 0x159   : > { %v897_v12 = vpop.permute.xlu2 %896  ;;  %v3040_v58 = vpop.f32.mrf.mxu3 }
 0x15b   : > { %v1137_v10 = vpop.permute.xlu1 %1136 }
 0x15c   : > { %v1015_v14 = vpop.permute.xlu0 %1014 }
 0x15d   : > { %1063 = vst.msk [vmem:[#allocation2 + $0x68] sm:$0x3] %vm1050_vm11, %v1015_v14  ;;  %v1204_v42 = vld [vmem:[#allocation2 + $0x80] sm:$0xff] }
 0x15e   : > { %1185 = vst.msk [vmem:[#allocation2 + $0x68] sm:$0x3] %vm1172_vm12, %v1137_v10  ;;  %2071 = vmatmul.msk.f32.gmra.mxu1 %vm1212_vm6, %v1204_v42  ;;  %2084 = vmatmul.msk.f32.gmra.mxu2 %vm1212_vm6, %v1204_v42 }
 0x161   : > { %v1141_v19 = vpop.permute.xlu2 %1140  ;;  %v1254_v61 = vpop.f32.mrf.mxu0 }
 0x163   : > { %v653_v16 = vpop.permute.xlu1 %652 }
 0x164   : > { %699 = vst.msk [vmem:[#allocation2 + $0x78] sm:$0x3] %vm684_vm8, %v653_v16  ;;  %v781_v20 = vpop.permute.xlu0 %780 }
 0x165   : > { %824 = vst.msk [vmem:[#allocation2 + $0x90] sm:$0xff] %vm804_vm2, %v781_v20  ;;  %v1410_v22 = vld [vmem:[#allocation2 + $0x61] sm:$0xff] }
 0x166   : > { %946 = vst.msk [vmem:[#allocation2 + $0x90] sm:$0xff] %vm926_vm3, %v903_v6  ;;  %2098 = vmatmul.msk.f32.gmra.mxu3 %vm1212_vm6, %v1410_v22  ;;  %2111 = vmatmul.msk.f32.gmra.mxu0 %vm1212_vm6, %v1410_v22  ;;  %v1618_v49 = vld [vmem:[#allocation2 + $0x62] sm:$0xff] }
 0x167   : > { %2120 = vmatmul.msk.f32.vlgmr.msra.gmra.mxu1 %vm1212_vm6, %v2834_v30 }
 0x169   : > { %v901_v25 = vpop.permute.xlu2 %900 }
 0x16b   : > { %v1025_v23 = vpop.permute.xlu1 %1024 }
 0x16c   : > { %1068 = vst.msk [vmem:[#allocation2 + $0x90] sm:$0xff] %vm1048_vm4, %v1025_v23  ;;  %v775_v26 = vpop.permute.xlu0 %774 }
 0x16d   : > { %821 = vst.msk [vmem:[#allocation2 + $0x78] sm:$0x3] %vm806_vm9, %v775_v26  ;;  %v3080_v26 = vld [vmem:[%s3162_s7] ss:$0 sm:$0xff] }
 0x16e   : > { %943 = vst.msk [vmem:[#allocation2 + $0x78] sm:$0x3] %vm928_vm10, %v897_v12  ;;  %v1278_v27 = vadd.f32 %v3080_v26, %v1254_v61 }
 0x16f   : > { %2121 = vmatmul.msk.f32.gmra.mxu1 %vm1212_vm6, %v2851_v34  ;;  %v1613_v34 = vld [vmem:[#allocation2 + $0x12] sm:$0xff] }
 0x171   : > { %v661_v29 = vpop.permute.xlu2 %660  ;;  %v1375_v0 = vpop.f32.mrf.mxu2 }
 0x172   : > { %703 = vst.msk [vmem:[#allocation2 + $0x98] sm:$0x3] %vm684_vm8, %v661_v29 }
 0x173   : > { %v1019_v28 = vpop.permute.xlu1 %1018 }
 0x174   : > { %1065 = vst.msk [vmem:[#allocation2 + $0x78] sm:$0x3] %vm1050_vm11, %v1019_v28  ;;  %v1147_v30 = vpop.permute.xlu0 %1146 }
 0x175   : > { %1187 = vst.msk [vmem:[#allocation2 + $0x78] sm:$0x3] %vm1172_vm12, %v1141_v19 }
 0x176   : > { %1190 = vst.msk [vmem:[#allocation2 + $0x90] sm:$0xff] %vm1170_vm5, %v1147_v30 }
 0x177   : > { %2122 = vmatmul.msk.f32.gmra.mxu1 %vm1212_vm6, %v2887_v48  ;;  %v3022_v48 = vpop.f32.mrf.mxu1 }
 0x179   : > { %v1027_v40 = vpop.permute.xlu2 %1026  ;;  %v1378_v5 = vpop.f32.mrf.mxu2 }
 0x17b   : > { %v779_v13 = vpop.permute.xlu1 %778 }
 0x17c   : > { %v1411_v31 = vld [vmem:[#allocation2 + $0x71] sm:$0xff]  ;;  %v657_v32 = vpop.permute.xlu0 %656 }
 0x17d   : > { %2099 = vmatmul.msk.f32.gmra.mxu3 %vm1212_vm6, %v1411_v31  ;;  %2112 = vmatmul.msk.f32.gmra.mxu0 %vm1212_vm6, %v1411_v31  ;;  %v1205_v33 = vld [vmem:[#allocation2 + $0x90] sm:$0xff]  ;;  %701 = vst.msk [vmem:[#allocation2 + $0x88] sm:$0x3] %vm684_vm8, %v657_v32 }
 0x17e   : > { %2085 = vmatmul.msk.f32.gmra.mxu2 %vm1212_vm6, %v1205_v33  ;;  %823 = vst.msk [vmem:[#allocation2 + $0x88] sm:$0x3] %vm806_vm9, %v779_v13  ;;  %v1619_v52 = vld [vmem:[#allocation2 + $0x72] sm:$0xff] }
 0x17f   : > { %2123 = vmatmul.msk.f32.gmra.mxu1 %vm1212_vm6, %v2922_v1  ;;  %945 = vst.msk [vmem:[#allocation2 + $0x88] sm:$0x3] %vm928_vm10, %v901_v25 }
 0x181   : > { %v3049_v10 = vpop.f32.mrf.mxu2 }
 0x183   : > { %v1145_v36 = vpop.permute.xlu1 %1144  ;;  %v1313_v50 = vpop.f32.mrf.mxu1 }
 0x184   : > { %v1023_v54 = vpop.permute.xlu0 %1022  ;;  %v1257_v1 = vpop.f32.mrf.mxu0  ;;  %v1337_v29 = vadd.f32 %v1313_v50, %v1278_v27 }
 0x185   : > { %2148 = vmatmul.msk.f32.vlgmr.msra.gmra.mxu3 %vm1212_vm6, %v1613_v34  ;;  %1067 = vst.msk [vmem:[#allocation2 + $0x88] sm:$0x3] %vm1050_vm11, %v1023_v54  ;;  %v1279_v33 = vadd.f32 %v3080_v26, %v1257_v1 }
 0x186   : > { %2134 = vmatmul.msk.f32.vlgmr.msra.gmra.mxu2 %vm1212_vm6, %v1612_v35  ;;  %1189 = vst.msk [vmem:[#allocation2 + $0x88] sm:$0x3] %vm1172_vm12, %v1145_v36 }
 0x187   : > { %2124 = vmatmul.msk.f32.gmra.mxu1 %vm1212_vm6, %v1410_v22  ;;  %v1462_v62 = vpop.f32.mrf.mxu3 }
 0x189   : > { %v3055_v15 = vpop.f32.mrf.mxu2 }
 0x18b   : > { %v905_v38 = vpop.permute.xlu1 %904  ;;  %v1316_v56 = vpop.f32.mrf.mxu1 }
 0x18c   : > { %v783_v39 = vpop.permute.xlu0 %782  ;;  %v1338_v35 = vadd.f32 %v1316_v56, %v1279_v33 }
 0x18d   : > { %2149 = vmatmul.msk.f32.gmra.mxu3 %vm1212_vm6, %v1614_v37  ;;  %825 = vst.msk [vmem:[#allocation2 + $0x98] sm:$0x3] %vm806_vm9, %v783_v39  ;;  %v1412_v41 = vld [vmem:[#allocation2 + $0x81] sm:$0xff] }
 0x18e   : > { %2135 = vmatmul.msk.f32.gmra.mxu2 %vm1212_vm6, %v1613_v34  ;;  %2113 = vmatmul.msk.f32.gmra.mxu0 %vm1212_vm6, %v1412_v41  ;;  %947 = vst.msk [vmem:[#allocation2 + $0x98] sm:$0x3] %vm928_vm10, %v905_v38  ;;  %v1620_v57 = vld [vmem:[#allocation2 + $0x82] sm:$0xff] }
 0x18f   : > { %2125 = vmatmul.msk.f32.gmra.mxu1 %vm1212_vm6, %v1411_v31  ;;  %1069 = vst.msk [vmem:[#allocation2 + $0x98] sm:$0x3] %vm1050_vm11, %v1027_v40  ;;  %v1396_v31 = vadd.f32 %v1372_v59, %v1337_v29  ;;  %v1397_v40 = vadd.f32 %v1375_v0, %v1338_v35 }
 0x191   : > { %v3065_v19 = vpop.f32.mrf.mxu2  ;;  %v1486_v36 = vadd.f32 %v1462_v62, %v1396_v31 }
 0x193   : > { %v1319_v60 = vpop.f32.mrf.mxu1 }
 0x194   : > { %v1149_v44 = vpop.permute.xlu0 %1148  ;;  %v1521_v6 = vpop.f32.mrf.mxu0 }
 0x195   : > { %2150 = vmatmul.msk.f32.gmra.mxu3 %vm1212_vm6, %v1615_v43  ;;  %1191 = vst.msk [vmem:[#allocation2 + $0x98] sm:$0x3] %vm1172_vm12, %v1149_v44 }
 0x196   : > { %2136 = vmatmul.msk.f32.gmra.mxu2 %vm1212_vm6, %v1614_v37  ;;  %2162 = vmatmul.msk.f32.vlgmr.msra.gmra.mxu0 %vm1212_vm6, %v1614_v37  ;;  %v1545_v37 = vadd.f32 %v1521_v6, %v1486_v36 }
 0x197   : > { %2126 = vmatmul.msk.f32.gmra.mxu1 %vm1212_vm6, %v1412_v41 }
 0x199   : > { %v1465_v4 = vpop.f32.mrf.mxu3 }
 0x19b   : > { %v3044_v2 = vpop.f32.mrf.mxu1 }
 0x19c   : > { %v1413_v45 = vld [vmem:[#allocation2 + $0x91] sm:$0xff] }
 0x19d   : > { %2151 = vmatmul.msk.f32.gmra.mxu3 %vm1212_vm6, %v1616_v63  ;;  %v1621_v3 = vld [vmem:[#allocation2 + $0x92] sm:$0xff] }
 0x19e   : > { %2137 = vmatmul.msk.f32.gmra.mxu2 %vm1212_vm6, %v1615_v43  ;;  %2163 = vmatmul.msk.f32.gmra.mxu0 %vm1212_vm6, %v1615_v43 }
 0x19f   : > { %2127 = vmatmul.msk.f32.gmra.mxu1 %vm1212_vm6, %v1413_v45  ;;  %v1487_v45 = vadd.f32 %v1465_v4, %v1397_v40 }
 0x1a3   : > { %v1524_v9 = vpop.f32.mrf.mxu0 }
 0x1a4   : > { %v3047_v7 = vpop.f32.mrf.mxu1  ;;  %v1546_v50 = vadd.f32 %v1524_v9, %v1487_v45 }
 0x1a5   : > { %2152 = vmatmul.msk.f32.gmra.mxu3 %vm1212_vm6, %v1617_v47 }
 0x1a6   : > { %2138 = vmatmul.msk.f32.gmra.mxu2 %vm1212_vm6, %v1616_v63  ;;  %2164 = vmatmul.msk.f32.gmra.mxu0 %vm1212_vm6, %v1616_v63  ;;  %v1280_v63 = vadd.f32 %v3080_v26, %v3016_v46  ;;  %v1281_v46 = vadd.f32 %v3080_v26, %v3022_v48 }
 0x1a8   : > { %v1340_v6 = vadd.f32 %v3044_v2, %v1281_v46 }
 0x1a9   : > { %v1468_v8 = vpop.f32.mrf.mxu3 }
 0x1ac   : > { %v3053_v12 = vpop.f32.mrf.mxu1 }
 0x1ad   : > { %2153 = vmatmul.msk.f32.gmra.mxu3 %vm1212_vm6, %v1618_v49  ;;  %v1527_v14 = vpop.f32.mrf.mxu0 }
 0x1ae   : > { %2139 = vmatmul.msk.f32.gmra.mxu2 %vm1212_vm6, %v1617_v47  ;;  %2165 = vmatmul.msk.f32.gmra.mxu0 %vm1212_vm6, %v1617_v47 }
 0x1b2   : > { %v3051_v11 = vpop.f32.mrf.mxu3 }
 0x1b4   : > { %v3059_v16 = vpop.f32.mrf.mxu1 }
 0x1b5   : > { %2154 = vmatmul.msk.f32.gmra.mxu3 %vm1212_vm6, %v1619_v52 }
 0x1b6   : > { %2140 = vmatmul.msk.f32.gmra.mxu2 %vm1212_vm6, %v1618_v49  ;;  %2166 = vmatmul.msk.f32.gmra.mxu0 %vm1212_vm6, %v1618_v49  ;;  %v1339_v49 = vadd.f32 %v1319_v60, %v1280_v63 }
 0x1b8   : > { %v1398_v61 = vadd.f32 %v1378_v5, %v1339_v49  ;;  %v1399_v5 = vadd.f32 %v3049_v10, %v1340_v6 }
 0x1ba   : > { %v1488_v60 = vadd.f32 %v1468_v8, %v1398_v61  ;;  %v1489_v48 = vadd.f32 %v3051_v11, %v1399_v5 }
 0x1bb   : > { %v3061_v17 = vpop.f32.mrf.mxu0 }
 0x1bc   : > { %v1547_v9 = vadd.f32 %v1527_v14, %v1488_v60  ;;  %v1548_v14 = vadd.f32 %v3061_v17, %v1489_v48 }
 0x1bd   : > { %2155 = vmatmul.msk.f32.gmra.mxu3 %vm1212_vm6, %v1620_v57 }
 0x1be   : > { %2141 = vmatmul.msk.f32.gmra.mxu2 %vm1212_vm6, %v1619_v52  ;;  %2167 = vmatmul.msk.f32.gmra.mxu0 %vm1212_vm6, %v1619_v52 }
 0x1c1   : > { %v3057_v42 = vpop.f32.mrf.mxu3 }
 0x1c6   : > { %2168 = vmatmul.msk.f32.gmra.mxu0 %vm1212_vm6, %v1620_v57 }
 0x1cb   : > { %v3069_v21 = vpop.f32.mrf.mxu0 }
 0x1ce   : > { %2169 = vmatmul.msk.f32.gmra.mxu0 %vm1212_vm6, %v1621_v3 }
 0x1d1   : > { %v3063_v18 = vpop.f32.mrf.mxu3 }
 0x1db   : > { %v3067_v20 = vpop.f32.mrf.mxu1 }
 0x1e1   : > { %v3073_v23 = vpop.f32.mrf.mxu2 }
 0x1e3   : > { %v3075_v24 = vpop.f32.mrf.mxu0 }
 0x1e4   : > { %v1580_v25 = vpop.f32.mrf.mxu1 }
 0x1e5   : > { %v1604_v39 = vadd.f32 %v1580_v25, %v1545_v37 }
 0x1e9   : > { %v3071_v22 = vpop.f32.mrf.mxu3 }
 0x1ec   : > { %v1583_v32 = vpop.f32.mrf.mxu1 }
 0x1ed   : > { %v1605_v57 = vadd.f32 %v1583_v32, %v1546_v50 }
 0x1f4   : > { %v1586_v44 = vpop.f32.mrf.mxu1 }
 0x1f5   : > { %v1606_v29 = vadd.f32 %v1586_v44, %v1547_v9 }
 0x1fa   : > { %v3087_v13 = vpop.f32.mrf.mxu0 }
 0x1fc   : > { %v1589_v4 = vpop.f32.mrf.mxu1 }
 0x200   : > { %v3083_v28 = vpop.f32.mrf.mxu3 }
 0x201   : > { %v3085_v30 = vpop.f32.mrf.mxu2 }
 0x204   : > { %v1592_v35 = vpop.f32.mrf.mxu1 }
 0x208   : > { %v1729_v34 = vpop.f32.mrf.mxu3 }
 0x209   : > { %v1670_v54 = vpop.f32.mrf.mxu2 }
 0x20a   : > { %v1694_v41 = vadd.f32 %v1670_v54, %v1604_v39  ;;  %v1607_v39 = vadd.f32 %v1589_v4, %v1548_v14  ;;  %v1285_v4 = vadd.f32 %v3080_v26, %v3040_v58 }
 0x20b   : > { %v3092_v38 = vpop.f32.mrf.mxu0 }
 0x20c   : > { %v1753_v52 = vadd.f32 %v1729_v34, %v1694_v41  ;;  %v1282_v34 = vadd.f32 %v3080_v26, %v3028_v51  ;;  %v1283_v51 = vadd.f32 %v3080_v26, %v3035_v55  ;;  %v1344_v6 = vadd.f32 %v3067_v20, %v1285_v4 }
 0x20e   : > { %v1341_v2 = vadd.f32 %v3047_v7, %v1282_v34  ;;  %v1342_v7 = vadd.f32 %v3053_v12, %v1283_v51  ;;  %v1284_v12 = vadd.f32 %v3080_v26, %v3033_v53 }
 0x210   : > { %v1732_v43 = vpop.f32.mrf.mxu3  ;;  %v1400_v40 = vadd.f32 %v3055_v15, %v1341_v2  ;;  %v1595_v15 = vpop.f32.mrf.mxu1 }
 0x211   : > { %v1673_v47 = vpop.f32.mrf.mxu2 }
 0x212   : > { %v1695_v62 = vadd.f32 %v1673_v47, %v1605_v57  ;;  %v1490_v11 = vadd.f32 %v3057_v42, %v1400_v40 }
 0x213   : > { %v1788_v56 = vpop.f32.mrf.mxu0 }
 0x214   : > { %v1812_v59 = vadd.f32 %v1788_v56, %v1753_v52  ;;  %v1754_v25 = vadd.f32 %v1732_v43, %v1695_v62  ;;  %v1549_v17 = vadd.f32 %v3069_v21, %v1490_v11  ;;  %v1401_v52 = vadd.f32 %v3065_v19, %v1342_v7 }
 0x215   : > { %v1343_v62 = vadd.f32 %v3059_v16, %v1284_v12 }
 0x216   : > { %v1820_v0 = vmax.f32 %v1812_v59, 0.0  ;;  %v1608_v49 = vadd.f32 %v1592_v35, %v1549_v17  ;;  %v1491_v55 = vadd.f32 %v3063_v18, %v1401_v52 }
 0x217   : > { %v1402_v19 = vadd.f32 %v3073_v23, %v1343_v62 }
 0x218   : > { %v1735_v1 = vpop.f32.mrf.mxu3  ;;  %1828 = vst [vmem:[%s3100_s28] sm:$0xff] %v1820_v0  ;;  %v1550_v21 = vadd.f32 %v3075_v24, %v1491_v55  ;;  %v1598_v18 = vpop.f32.mrf.mxu1 }
 0x219   : > { %v1676_v3 = vpop.f32.mrf.mxu2  ;;  %v1492_v53 = vadd.f32 %v3071_v22, %v1402_v19 }
 0x21a   : > { %v1696_v32 = vadd.f32 %v1676_v3, %v1606_v29  ;;  %v1609_v0 = vadd.f32 %v1595_v15, %v1550_v21 }
 0x21b   : > { %v1791_v27 = vpop.f32.mrf.mxu0  ;;  %v1551_v16 = vadd.f32 %v3087_v13, %v1492_v53 }
 0x21c   : > { %v1813_v31 = vadd.f32 %v1791_v27, %v1754_v25  ;;  %v1755_v54 = vadd.f32 %v1735_v1, %v1696_v32  ;;  %v1403_v27 = vadd.f32 %v3085_v30, %v1344_v6 }
 0x21d   : > { %v1610_v23 = vadd.f32 %v1598_v18, %v1551_v16 }
 0x21e   : > { %v1821_v33 = vmax.f32 %v1813_v31, 0.0  ;;  %v1493_v58 = vadd.f32 %v3083_v28, %v1403_v27 }
 0x220   : > { %1829 = vst [vmem:[%s3100_s28 + $0x8] sm:$0xff] %v1821_v33  ;;  %v1738_v36 = vpop.f32.mrf.mxu3  ;;  %v1601_v22 = vpop.f32.mrf.mxu1  ;;  %v1552_v26 = vadd.f32 %v3092_v38, %v1493_v58 }
 0x221   : > { %v1679_v8 = vpop.f32.mrf.mxu2 }
 0x222   : > { %v1697_v41 = vadd.f32 %v1679_v8, %v1607_v39  ;;  %v1611_v34 = vadd.f32 %v1601_v22, %v1552_v26 }
 0x223   : > { %v1794_v37 = vpop.f32.mrf.mxu0 }
 0x224   : > { %v1814_v10 = vadd.f32 %v1794_v37, %v1755_v54  ;;  %v1756_v63 = vadd.f32 %v1738_v36, %v1697_v41 }
 0x226   : > { %v1822_v43 = vmax.f32 %v1814_v10, 0.0 }
 0x228   : > { %1830 = vst [vmem:[%s3100_s28 + $0x10] sm:$0xff] %v1822_v43  ;;  %v1741_v45 = vpop.f32.mrf.mxu3 }
 0x229   : > { %v1682_v44 = vpop.f32.mrf.mxu2 }
 0x22a   : > { %v1698_v56 = vadd.f32 %v1682_v44, %v1608_v49 }
 0x22b   : > { %v1797_v47 = vpop.f32.mrf.mxu0 }
 0x22c   : > { %v1815_v50 = vadd.f32 %v1797_v47, %v1756_v63  ;;  %v1757_v59 = vadd.f32 %v1741_v45, %v1698_v56 }
 0x22e   : > { %v1823_v57 = vmax.f32 %v1815_v50, 0.0 }
 0x230   : > { %1831 = vst [vmem:[%s3100_s28 + $0x18] sm:$0xff] %v1823_v57  ;;  %v1744_v46 = vpop.f32.mrf.mxu3 }
 0x231   : > { %v1685_v42 = vpop.f32.mrf.mxu2 }
 0x232   : > { %v1699_v60 = vadd.f32 %v1685_v42, %v1609_v0 }
 0x233   : > { %v1800_v61 = vpop.f32.mrf.mxu0 }
 0x234   : > { %v1816_v1 = vadd.f32 %v1800_v61, %v1757_v59  ;;  %v1758_v9 = vadd.f32 %v1744_v46, %v1699_v60 }
 0x236   : > { %v1824_v3 = vmax.f32 %v1816_v1, 0.0 }
 0x238   : > { %1832 = vst [vmem:[%s3100_s28 + $0x20] sm:$0xff] %v1824_v3  ;;  %v1747_v32 = vpop.f32.mrf.mxu3 }
 0x239   : > { %v1688_v24 = vpop.f32.mrf.mxu2 }
 0x23a   : > { %v1700_v31 = vadd.f32 %v1688_v24, %v1610_v23 }
 0x23b   : > { %v1803_v25 = vpop.f32.mrf.mxu0 }
 0x23c   : > { %v1817_v29 = vadd.f32 %v1803_v25, %v1758_v9  ;;  %v1759_v20 = vadd.f32 %v1747_v32, %v1700_v31 }
 0x23e   : > { %v1825_v5 = vmax.f32 %v1817_v29, 0.0 }
 0x240   : > { %1833 = vst [vmem:[%s3100_s28 + $0x28] sm:$0xff] %v1825_v5  ;;  %v1750_v36 = vpop.f32.mrf.mxu3 }
 0x241   : > { %v1691_v33 = vpop.f32.mrf.mxu2 }
 0x242   : > { %v1701_v8 = vadd.f32 %v1691_v33, %v1611_v34 }
 0x243   : > { %v1806_v13 = vpop.f32.mrf.mxu0 }
 0x244   : > { %v1818_v48 = vadd.f32 %v1806_v13, %v1759_v20  ;;  %v1760_v2 = vadd.f32 %v1750_v36, %v1701_v8 }
 0x246   : > { %v1826_v30 = vmax.f32 %v1818_v48, 0.0 }
 0x248   : > { %1834 = vst [vmem:[%s3100_s28 + $0x30] sm:$0xff] %v1826_v30 }
 0x24b   : > { %v1809_v14 = vpop.f32.mrf.mxu0 }
 0x24c   : > { %v1819_v54 = vadd.f32 %v1809_v14, %v1760_v2 }
 0x24e   : > { %v1827_v35 = vmax.f32 %v1819_v54, 0.0 }
 0x250   : > { %1835 = vst [vmem:[%s3100_s28 + $0x38] sm:$0xff] %v1827_v35 }
 0x251 PF: > { %s18_s9 = sadd.s32 1, %s2278_s9   ;;  %s3189_s27 = smov %s2270_s29 }
 0x252   : > { %p15_p10 = scmp.ge.s32.totalorder %s18_s9, 18   ;;  %s3190_s28 = smov %s2274_s30 }
 0x253   : > { %s3191_s29 = smov %s3194_s10  ;;  %s3192_s30 = smov %s3198_s11 }
 0x254   :  { %17 = sbr.rel (!%p15_p10) target bundleno = 5 (0x5), region = 105 }

// kernel: unet_up_forward.5
= control target key start
LH: loop header
LB: loop body
LE: loop exit
PB: predicated region body
PF: predicated region fallthrough
CT: control target
= control target key end

     0   :  { %s3311_s18 = smov 0   ;;  %s3313_s19 = smov 0   ;;  %s5630_s0 = inlined_call_operand.vmem [shape: f32[2,10,10,10,128], index: 0, kind: input, shape index: {}, may-alias: {0,1,2}]   ;;  %s5631_s1 = inlined_call_operand.vmem [shape: f32[2,10,10,10,128], index: 1, kind: input, shape index: {}, may-alias: {0,1,2}]   ;;  %s5632_s2 = inlined_call_operand.vmem [shape: f32[2,10,10,10,128], index: 2, kind: input, shape index: {}, may-alias: {0,1,2}]   ;;  %s5633_s3 = inlined_call_operand.vmem [shape: f32[3,3,384,128], index: 3, kind: input, shape index: {}]   ;;  %s5634_s4 = inlined_call_operand.vmem [shape: f32[1,128], index: 4, kind: input, shape index: {}]   ;;  %s5635_s5 = inlined_call_operand.vmem [shape: f32[2,8,8,8,128], index: 5, kind: output, shape index: {}]  }
   0x1   :  { %s3315_s20 = smov 0   ;;  %s3317_s21 = smov 0  }
   0x2   :  { %s3319_s22 = smov 0  }
   0x3 LB: > { %s24_s23 = sadd.s32 1, %s3271_s20  ;;  %s27_s24 = sadd.s32 1, %s3275_s21  ;;  %s3279_s22 = sphi %s3319_s22, %s15_s22   ;;  %s3275_s21 = sphi %s3317_s21, %s5640_s21   ;;  %s3271_s20 = sphi %s3315_s20, %s5639_s20   ;;  %s3267_s19 = sphi %s3313_s19, %s5638_s19   ;;  %s3263_s18 = sphi %s3311_s18, %s5637_s18  }
   0x4   : > { %p25_p0 = scmp.ge.s32.totalorder %s24_s23, 8  ;;  %p2755_p1 = scmp.ge.s32.totalorder %s3279_s22, 1 }
   0x5   : > { %p247_p2 = scmp.lt.s32.totalorder %s3279_s22, 17 }
   0x6   : > { %s5642_s23 = smov (%p25_p0, %s24_s23), 0  ;;  %s5644_s24 = smov (!%p25_p0, %s27_s24), %s3275_s21 }
   0x7   : > { %p248_p3 = pnand %p2755_p1, %p247_p2  ;;  %p29_p4 = scmp.ge.s32.totalorder %s5644_s24, 2 }
   0x8   : > { %p303_p5 = scmp.lt.s32.totalorder (!%p248_p3), %s3267_s19, 1  ;;  %p305_p6 = scmp.lt.s32.totalorder (!%p248_p3), %s3263_s18, 9 }
   0x9   : > { %s5646_s24 = smov (%p29_p4, %s5644_s24), 0  ;;  %251 = sbr.rel (%p248_p3) target bundleno = 616 (0x268), region = 40 }
   0xa   : > { %s312_s12 = sadd.s32 (!%p248_p3), 1, %s3263_s18  ;;  %s323_s10 = sadd.s32 (!%p248_p3), 2, %s3263_s18 }
   0xb   : > { %p315_p7 = scmp.lt.s32.totalorder (!%p248_p3), %s312_s12, 9  ;;  %p3411_p8 = scmp.lt.s32.totalorder (!%p248_p3), %s323_s10, 9 }
   0xc   : > { %p336_p9 = scmp.lt.s32.totalorder (!%p248_p3), %s3263_s18, 7 }
   0xe   : > { %v512_v0 = vld [vmem:[%s5633_s3 + $0x78] sm:$0xff]  ;;  %v511_v3 = vld [vmem:[%s5633_s3 + $0x70] sm:$0xff]  ;;  %v510_v6 = vld [vmem:[%s5633_s3 + $0x68] sm:$0xff]  ;;  %s5648_s19 = smov (!%p303_p5, %s3267_s19), 1  ;;  %s5650_s12 = smov (!%p315_p7, %s312_s12), 9  ;;  %vm1144_vm0 = vcmask 1046528  }
   0xf   : > { %v528_v1 = vld [vmem:[%s5633_s3 + $0xf8] sm:$0xff]  ;;  %545 = vmatpush.msra.mxu0 %v512_v0  ;;  %3148 = vmatpush.msra.mxu3 %v512_v0  ;;  %v527_v4 = vld [vmem:[%s5633_s3 + $0xf0] sm:$0xff]  ;;  %v526_v7 = vld [vmem:[%s5633_s3 + $0xe8] sm:$0xff]  ;;  %s306_s26 = scalar_select %p305_p6, %s3263_s18, 9  ;;  %vm1925_vm1 = vcmask 1045504  }
  0x10   : > { %v544_v2 = vld [vmem:[%s5633_s3 + $0x178] sm:$0xff]  ;;  %v543_v5 = vld [vmem:[%s5633_s3 + $0x170] sm:$0xff]  ;;  %586 = vmatpush.msra.mxu1 %v528_v1  ;;  %v542_v8 = vld [vmem:[%s5633_s3 + $0x168] sm:$0xff]  ;;  %s3381_s29 = smul.u32 200, %s5648_s19  ;;  %s5652_s10 = smov (!%p3411_p8, %s323_s10), 9 }
  0x11   : > { %627 = vmatpush.msra.mxu2 %v544_v2  ;;  %546 = vmatpush.msra.mxu0 %v511_v3  ;;  %v509_v9 = vld [vmem:[%s5633_s3 + $0x60] sm:$0xff]  ;;  %s3196_s9 = smul.u32 20, %s306_s26  ;;  %v508_v12 = vld [vmem:[%s5633_s3 + $0x58] sm:$0xff]  ;;  %v507_v15 = vld [vmem:[%s5633_s3 + $0x50] sm:$0xff]  ;;  %s5654_s18 = smov (!%p336_p9, %s3263_s18), 7 }
  0x12   : > { %3149 = vmatpush.msra.mxu3 %v511_v3  ;;  %587 = vmatpush.msra.mxu1 %v527_v4  ;;  %v525_v10 = vld [vmem:[%s5633_s3 + $0xe0] sm:$0xff]  ;;  %v524_v13 = vld [vmem:[%s5633_s3 + $0xd8] sm:$0xff]  ;;  %s3198_s28 = smul.u32 20, %s5650_s12  ;;  %v523_v16 = vld [vmem:[%s5633_s3 + $0xd0] sm:$0xff] }
  0x13   : > { %628 = vmatpush.msra.mxu2 %v543_v5  ;;  %547 = vmatpush.msra.mxu0 %v510_v6  ;;  %v541_v11 = vld [vmem:[%s5633_s3 + $0x160] sm:$0xff]  ;;  %v540_v14 = vld [vmem:[%s5633_s3 + $0x158] sm:$0xff]  ;;  %s309_s25 = sadd.s32 %s3381_s29, %s3196_s9  ;;  %v539_v17 = vld [vmem:[%s5633_s3 + $0x150] sm:$0xff]  ;;  %s3199_s6 = smul.u32 20, %s5652_s10 }
  0x14   : > { %3150 = vmatpush.msra.mxu3 %v510_v6  ;;  %588 = vmatpush.msra.mxu1 %v526_v7  ;;  %s2756_s11 = sshll.u32 %s309_s25, 3  ;;  %v506_v18 = vld [vmem:[%s5633_s3 + $0x48] sm:$0xff]  ;;  %s319_s14 = sadd.s32 %s3198_s28, %s3381_s29  ;;  %v505_v21 = vld [vmem:[%s5633_s3 + $0x40] sm:$0xff]  ;;  %v504_v24 = vld [vmem:[%s5633_s3 + $0x38] sm:$0xff] }
  0x15   : > { %629 = vmatpush.msra.mxu2 %v542_v8  ;;  %548 = vmatpush.msra.mxu0 %v509_v9  ;;  %v522_v19 = vld [vmem:[%s5633_s3 + $0xc8] sm:$0xff]  ;;  %s3431_s28 = scalar_lea.vmem %s5630_s0, %s2756_s11  ;;  %s2757_s7 = sshll.u32 %s319_s14, 3  ;;  %v521_v22 = vld [vmem:[%s5633_s3 + $0xc0] sm:$0xff]  ;;  %v520_v25 = vld [vmem:[%s5633_s3 + $0xb8] sm:$0xff] }
  0x16   : > { %3151 = vmatpush.msra.mxu3 %v509_v9  ;;  %589 = vmatpush.msra.mxu1 %v525_v10  ;;  %v538_v20 = vld [vmem:[%s5633_s3 + $0x148] sm:$0xff]  ;;  %v537_v23 = vld [vmem:[%s5633_s3 + $0x140] sm:$0xff]  ;;  %v536_v26 = vld [vmem:[%s5633_s3 + $0x138] sm:$0xff]  ;;  %s3455_s30 = scalar_lea.vmem %s5631_s1, %s2757_s7  ;;  %s330_s10 = sadd.s32 %s3199_s6, %s3381_s29 }
  0x17   : > { %630 = vmatpush.msra.mxu2 %v541_v11  ;;  %549 = vmatpush.msra.mxu0 %v508_v12  ;;  %v503_v27 = vld [vmem:[%s5633_s3 + $0x30] sm:$0xff]  ;;  %v3461_v28 = vld [vmem:[%s3431_s28] sm:$0xff]  ;;  %v502_v32 = vld [vmem:[%s5633_s3 + $0x28] sm:$0xff]  ;;  %s2758_s17 = sshll.u32 %s330_s10, 3  ;;  %s2759_s11 = sshll.u32 %s5654_s18, 3 }
  0x18   : > { %3152 = vmatpush.msra.mxu3 %v508_v12  ;;  %590 = vmatpush.msra.mxu1 %v524_v13  ;;  %v519_v29 = vld [vmem:[%s5633_s3 + $0xb0] sm:$0xff]  ;;  %363 = vst [vmem:[#allocation2 + $0x38] sm:$0xff] %v3461_v28  ;;  %v3471_v31 = vld [vmem:[%s3431_s28 + $0x40] sm:$0xff]  ;;  %v518_v34 = vld [vmem:[%s5633_s3 + $0xa8] sm:$0xff]  ;;  %s3491_s8 = scalar_lea.vmem %s5632_s2, %s2758_s17  ;;  %s2760_s10 = sshll.u32 %s5648_s19, 6 }
  0x19   : > { %631 = vmatpush.msra.mxu2 %v540_v14  ;;  %550 = vmatpush.msra.mxu0 %v507_v15  ;;  %v535_v30 = vld [vmem:[%s5633_s3 + $0x130] sm:$0xff]  ;;  %371 = vst [vmem:[#allocation2 + $0xd0] sm:$0xff] %v3471_v31  ;;  %v3479_v33 = vld [vmem:[%s3455_s30] sm:$0xff]  ;;  %v534_v35 = vld [vmem:[%s5633_s3 + $0x128] sm:$0xff] }
  0x1a   : > { %3153 = vmatpush.msra.mxu3 %v507_v15  ;;  %591 = vmatpush.msra.mxu1 %v523_v16  ;;  %403 = vst [vmem:[#allocation2 + $0x180] sm:$0xff] %v3479_v33  ;;  %v501_v36 = vld [vmem:[%s5633_s3 + $0x20] sm:$0xff]  ;;  %v3507_v40 = vld [vmem:[%s3431_s28 + $0x10] sm:$0xff]  ;;  %v500_v41 = vld [vmem:[%s5633_s3 + $0x18] sm:$0xff] }
  0x1b   : > { %632 = vmatpush.msra.mxu2 %v539_v17  ;;  %551 = vmatpush.msra.mxu0 %v506_v18  ;;  %v3497_v37 = vld [vmem:[%s3491_s8] sm:$0xff]  ;;  %365 = vst [vmem:[#allocation2 + $0xb0] sm:$0xff] %v3507_v40  ;;  %v3514_v42 = vld [vmem:[%s3431_s28 + $0x50] sm:$0xff]  ;;  %v516_v43 = vld [vmem:[%s5633_s3 + $0x98] sm:$0xff] }
  0x1c   : > { %3154 = vmatpush.msra.mxu3 %v506_v18  ;;  %592 = vmatpush.msra.mxu1 %v522_v19  ;;  %v517_v38 = vld [vmem:[%s5633_s3 + $0xa0] sm:$0xff]  ;;  %443 = vst [vmem:[#allocation2 + $0x50] sm:$0xff] %v3497_v37  ;;  %v532_v44 = vld [vmem:[%s5633_s3 + $0x118] sm:$0xff]  ;;  %v3524_v45 = vld [vmem:[%s3455_s30 + $0x10] sm:$0xff] }
  0x1d   : > { %633 = vmatpush.msra.mxu2 %v538_v20  ;;  %552 = vmatpush.msra.mxu0 %v505_v21  ;;  %v533_v39 = vld [vmem:[%s5633_s3 + $0x120] sm:$0xff]  ;;  %373 = vst [vmem:[#allocation2 + $0x170] sm:$0xff] %v3514_v42  ;;  %v499_v46 = vld [vmem:[%s5633_s3 + $0x10] sm:$0xff]  ;;  %v498_v50 = vld [vmem:[%s5633_s3 + $0x8] sm:$0xff] }
  0x1e   : > { %3155 = vmatpush.msra.mxu3 %v505_v21  ;;  %593 = vmatpush.msra.mxu1 %v521_v22  ;;  %405 = vst [vmem:[#allocation2 + $0x178] sm:$0xff] %v3524_v45  ;;  %v3531_v47 = vld [vmem:[%s3491_s8 + $0x10] sm:$0xff]  ;;  %v3544_v51 = vld [vmem:[%s3431_s28 + $0x20] sm:$0xff]  ;;  %v514_v52 = vld [vmem:[%s5633_s3 + $0x88] sm:$0xff] }
  0x1f   : > { %634 = vmatpush.msra.mxu2 %v537_v23  ;;  %553 = vmatpush.msra.mxu0 %v504_v24  ;;  %v515_v48 = vld [vmem:[%s5633_s3 + $0x90] sm:$0xff]  ;;  %445 = vst [vmem:[#allocation2 + $0xa8] sm:$0xff] %v3531_v47  ;;  %v530_v53 = vld [vmem:[%s5633_s3 + $0x108] sm:$0xff]  ;;  %v3554_v54 = vld [vmem:[%s3431_s28 + $0x60] sm:$0xff] }
  0x20   : > { %3156 = vmatpush.msra.mxu3 %v504_v24  ;;  %594 = vmatpush.msra.mxu1 %v520_v25  ;;  %v531_v49 = vld [vmem:[%s5633_s3 + $0x110] sm:$0xff]  ;;  %367 = vst [vmem:[#allocation2 + $0xf0] sm:$0xff] %v3544_v51  ;;  %v497_v55 = vld [vmem:[%s5633_s3] sm:$0xff]  ;;  %v2777_v61 = vld [vmem:[%s5633_s3 + $0x4f8] sm:$0xff] }
  0x21   : > { %635 = vmatpush.msra.mxu2 %v536_v26  ;;  %554 = vmatpush.msra.mxu0 %v503_v27  ;;  %375 = vst [vmem:[#allocation2 + $0x188] sm:$0xff] %v3554_v54  ;;  %v3561_v56 = vld [vmem:[%s3455_s30 + $0x20] sm:$0xff]  ;;  %v3575_v60 = vld [vmem:[%s3431_s28 + $0x30] sm:$0xff]  ;;  %v2825_v62 = vld [vmem:[%s5633_s3 + $0x978] sm:$0xff] }
  0x22   : > { %3157 = vmatpush.msra.mxu3 %v503_v27  ;;  %595 = vmatpush.msra.mxu1 %v519_v29  ;;  %v513_v57 = vld [vmem:[%s5633_s3 + $0x80] sm:$0xff]  ;;  %407 = vst [vmem:[#allocation2 + $0xf8] sm:$0xff] %v3561_v56  ;;  %v3585_v63 = vld [vmem:[%s3431_s28 + $0x70] sm:$0xff]  ;;  %v2793_v0 = vld [vmem:[%s5633_s3 + $0x578] sm:$0xff] }
  0x23   : > { %636 = vmatpush.msra.mxu2 %v535_v30  ;;  %555 = vmatpush.msra.mxu0 %v502_v32  ;;  %v529_v58 = vld [vmem:[%s5633_s3 + $0x100] sm:$0xff]  ;;  %369 = vst [vmem:[#allocation2 + $0x1b8] sm:$0xff] %v3575_v60  ;;  %v2809_v1 = vld [vmem:[%s5633_s3 + $0x5f8] sm:$0xff]  ;;  %v3597_v2 = vld [vmem:[%s3455_s30 + $0x30] sm:$0xff] }
  0x24   : > { %3158 = vmatpush.msra.mxu3 %v502_v32  ;;  %596 = vmatpush.msra.mxu1 %v518_v34  ;;  %v3571_v59 = vld [vmem:[%s3491_s8 + $0x20] sm:$0xff]  ;;  %377 = vst [vmem:[#allocation2 + $0x140] sm:$0xff] %v3585_v63  ;;  %v2776_v3 = vld [vmem:[%s5633_s3 + $0x4f0] sm:$0xff]  ;;  %v2775_v8 = vld [vmem:[%s5633_s3 + $0x4e8] sm:$0xff] }
  0x25   : > { %637 = vmatpush.msra.mxu2 %v534_v35  ;;  %556 = vmatpush.msra.mxu0 %v501_v36  ;;  %447 = vst [vmem:[#allocation2 + $0x30] sm:$0xff] %v3571_v59  ;;  %v2824_v4 = vld [vmem:[%s5633_s3 + $0x970] sm:$0xff]  ;;  %v2823_v9 = vld [vmem:[%s5633_s3 + $0x968] sm:$0xff]  ;;  %v3631_v12 = vld [vmem:[%s3455_s30 + $0x40] sm:$0xff] }
  0x26   : > { %3159 = vmatpush.msra.mxu3 %v501_v36  ;;  %597 = vmatpush.msra.mxu1 %v517_v38  ;;  %409 = vst [vmem:[#allocation2 + $0x1a0] sm:$0xff] %v3597_v2  ;;  %v3609_v5 = vld [vmem:[%s3491_s8 + $0x30] sm:$0xff]  ;;  %v2791_v10 = vld [vmem:[%s5633_s3 + $0x568] sm:$0xff]  ;;  %v2774_v13 = vld [vmem:[%s5633_s3 + $0x4e0] sm:$0xff] }
  0x27   : > { %638 = vmatpush.msra.mxu2 %v533_v39  ;;  %557 = vmatpush.msra.mxu0 %v500_v41  ;;  %v2792_v6 = vld [vmem:[%s5633_s3 + $0x570] sm:$0xff]  ;;  %449 = vst [vmem:[#allocation2 + $0x198] sm:$0xff] %v3609_v5  ;;  %v2807_v11 = vld [vmem:[%s5633_s3 + $0x5e8] sm:$0xff]  ;;  %v3638_v14 = vld [vmem:[%s3491_s8 + $0x40] sm:$0xff] }
  0x28   : > { %3160 = vmatpush.msra.mxu3 %v500_v41  ;;  %598 = vmatpush.msra.mxu1 %v516_v43  ;;  %v2808_v7 = vld [vmem:[%s5633_s3 + $0x5f0] sm:$0xff]  ;;  %411 = vst [vmem:[#allocation2 + $0x18] sm:$0xff] %v3631_v12  ;;  %v2790_v15 = vld [vmem:[%s5633_s3 + $0x560] sm:$0xff]  ;;  %v2773_v17 = vld [vmem:[%s5633_s3 + $0x4d8] sm:$0xff] }
  0x29   : > { %639 = vmatpush.msra.mxu2 %v532_v44  ;;  %558 = vmatpush.msra.mxu0 %v499_v46  ;;  %451 = vst [vmem:[#allocation2 + $0x138] sm:$0xff] %v3638_v14  ;;  %v3645_v16 = vld [vmem:[%s3455_s30 + $0x50] sm:$0xff]  ;;  %v2789_v18 = vld [vmem:[%s5633_s3 + $0x558] sm:$0xff]  ;;  %v2822_v19 = vld [vmem:[%s5633_s3 + $0x960] sm:$0xff] }
  0x2a   : > { %3161 = vmatpush.msra.mxu3 %v499_v46  ;;  %599 = vmatpush.msra.mxu1 %v515_v48  ;;  %413 = vst [vmem:[#allocation2 + $0x68] sm:$0xff] %v3645_v16  ;;  %v2806_v20 = vld [vmem:[%s5633_s3 + $0x5e0] sm:$0xff]  ;;  %v2772_v21 = vld [vmem:[%s5633_s3 + $0x4d0] sm:$0xff]  ;;  %v2821_v23 = vld [vmem:[%s5633_s3 + $0x958] sm:$0xff] }
  0x2b   : > { %640 = vmatpush.msra.mxu2 %v531_v49  ;;  %559 = vmatpush.msra.mxu0 %v498_v50  ;;  %v2788_v22 = vld [vmem:[%s5633_s3 + $0x550] sm:$0xff]  ;;  %v2805_v24 = vld [vmem:[%s5633_s3 + $0x5d8] sm:$0xff]  ;;  %v2771_v26 = vld [vmem:[%s5633_s3 + $0x4c8] sm:$0xff] }
  0x2c   : > { %3162 = vmatpush.msra.mxu3 %v498_v50  ;;  %600 = vmatpush.msra.mxu1 %v514_v52  ;;  %v3677_v25 = vld [vmem:[%s3491_s8 + $0x50] sm:$0xff]  ;;  %v2787_v27 = vld [vmem:[%s5633_s3 + $0x548] sm:$0xff]  ;;  %v2770_v29 = vld [vmem:[%s5633_s3 + $0x4c0] sm:$0xff] }
  0x2d   : > { %641 = vmatpush.msra.mxu2 %v530_v53  ;;  %560 = vmatpush.msra.mxu0 %v497_v55  ;;  %453 = vst [vmem:[#allocation2 + $0x118] sm:$0xff] %v3677_v25  ;;  %v2786_v30 = vld [vmem:[%s5633_s3 + $0x540] sm:$0xff]  ;;  %v2785_v34 = vld [vmem:[%s5633_s3 + $0x538] sm:$0xff]  ;;  %v2804_v35 = vld [vmem:[%s5633_s3 + $0x5d0] sm:$0xff] }
  0x2e   : > { %3163 = vmatpush.msra.mxu3 %v497_v55  ;;  %601 = vmatpush.msra.mxu1 %v513_v57  ;;  %v3696_v32 = vld [vmem:[%s3455_s30 + $0x60] sm:$0xff]  ;;  %v2768_v36 = vld [vmem:[%s5633_s3 + $0x4b0] sm:$0xff]  ;;  %v2803_v39 = vld [vmem:[%s5633_s3 + $0x5c8] sm:$0xff] }
  0x2f   : > { %642 = vmatpush.msra.mxu2 %v529_v58  ;;  %561 = vmatmul.f32.vlgmr.msra.gmra.mxu0 %v3461_v28  ;;  %v2820_v28 = vld [vmem:[%s5633_s3 + $0x950] sm:$0xff]  ;;  %415 = vst [vmem:[#allocation2 + $0x28] sm:$0xff] %v3696_v32  ;;  %v3725_v41 = vld [vmem:[%s3491_s8 + $0x60] sm:$0xff]  ;;  %v2767_v43 = vld [vmem:[%s5633_s3 + $0x4a8] sm:$0xff] }
  0x30   : > { %573 = vmatmul.f32.vlgmr.msra.gmra.mxu3 %v3471_v31  ;;  %602 = vmatmul.f32.vlgmr.msra.gmra.mxu1 %v3479_v33  ;;  %v2769_v33 = vld [vmem:[%s5633_s3 + $0x4b8] sm:$0xff]  ;;  %v2784_v38 = vld [vmem:[%s5633_s3 + $0x530] sm:$0xff]  ;;  %v2818_v44 = vld [vmem:[%s5633_s3 + $0x940] sm:$0xff]  ;;  %455 = vst [vmem:[#allocation2 + $0xb8] sm:$0xff] %v3725_v41 }
  0x31   : > { %643 = vmatmul.f32.vlgmr.msra.gmra.mxu2 %v3497_v37  ;;  %725 = vmatpush.msrb.mxu3 %v2777_v61  ;;  %v2819_v37 = vld [vmem:[%s5633_s3 + $0x948] sm:$0xff]  ;;  %v2802_v48 = vld [vmem:[%s5633_s3 + $0x5c0] sm:$0xff]  ;;  %v3744_v50 = vld [vmem:[%s3455_s30 + $0x70] sm:$0xff] }
  0x32   : > { %905 = vmatpush.msrb.mxu2 %v2825_v62  ;;  %766 = vmatpush.msrb.mxu0 %v2793_v0  ;;  %v2783_v46 = vld [vmem:[%s5633_s3 + $0x528] sm:$0xff]  ;;  %v2766_v49 = vld [vmem:[%s5633_s3 + $0x4a0] sm:$0xff]  ;;  %417 = vst [vmem:[#allocation2 + $0x128] sm:$0xff] %v3744_v50  ;;  %v2765_v53 = vld [vmem:[%s5633_s3 + $0x498] sm:$0xff] }
  0x33   : > { %807 = vmatpush.msrb.mxu1 %v2809_v1  ;;  %726 = vmatpush.msrb.mxu3 %v2776_v3  ;;  %v2782_v52 = vld [vmem:[%s5633_s3 + $0x520] sm:$0xff]  ;;  %v2781_v55 = vld [vmem:[%s5633_s3 + $0x518] sm:$0xff]  ;;  %v2764_v61 = vld [vmem:[%s5633_s3 + $0x490] sm:$0xff] }
  0x34   : > { %906 = vmatpush.msrb.mxu2 %v2824_v4  ;;  %767 = vmatpush.msrb.mxu0 %v2792_v6  ;;  %v2817_v57 = vld [vmem:[%s5633_s3 + $0x938] sm:$0xff]  ;;  %v2780_v62 = vld [vmem:[%s5633_s3 + $0x510] sm:$0xff]  ;;  %v2763_v4 = vld [vmem:[%s5633_s3 + $0x488] sm:$0xff] }
  0x35   : > { %808 = vmatpush.msrb.mxu1 %v2808_v7  ;;  %727 = vmatpush.msrb.mxu3 %v2775_v8  ;;  %v2801_v58 = vld [vmem:[%s5633_s3 + $0x5b8] sm:$0xff]  ;;  %v3773_v0 = vld [vmem:[%s3491_s8 + $0x70] sm:$0xff]  ;;  %v2779_v6 = vld [vmem:[%s5633_s3 + $0x508] sm:$0xff] }
  0x36   : > { %907 = vmatpush.msrb.mxu2 %v2823_v9  ;;  %768 = vmatpush.msrb.mxu0 %v2791_v10  ;;  %v2816_v1 = vld [vmem:[%s5633_s3 + $0x930] sm:$0xff]  ;;  %457 = vst [vmem:[#allocation2 + $0x1a8] sm:$0xff] %v3773_v0  ;;  %v2815_v7 = vld [vmem:[%s5633_s3 + $0x928] sm:$0xff]  ;;  %v2762_v9 = vld [vmem:[%s5633_s3 + $0x480] sm:$0xff] }
  0x37   : > { %809 = vmatpush.msrb.mxu1 %v2807_v11  ;;  %728 = vmatpush.msrb.mxu3 %v2774_v13  ;;  %v2800_v3 = vld [vmem:[%s5633_s3 + $0x5b0] sm:$0xff]  ;;  %v2799_v8 = vld [vmem:[%s5633_s3 + $0x5a8] sm:$0xff]  ;;  %v2778_v10 = vld [vmem:[%s5633_s3 + $0x500] sm:$0xff] }
  0x38   : > { %564 = vmatmul.f32.gmra.mxu0 %v3507_v40  ;;  %576 = vmatmul.f32.gmra.mxu3 %v3514_v42  ;;  %v2841_v11 = vld [vmem:[%s5633_s3 + $0x9f8] sm:$0xff] }
  0x39   : > { %769 = vmatpush.msrb.mxu0 %v2790_v15  ;;  %605 = vmatmul.f32.gmra.mxu1 %v3524_v45  ;;  %v2857_v13 = vld [vmem:[%s5633_s3 + $0xa78] sm:$0xff]  ;;  %v2814_v15 = vld [vmem:[%s5633_s3 + $0x920] sm:$0xff] }
  0x3a   : > { %646 = vmatmul.f32.gmra.mxu2 %v3531_v47  ;;  %729 = vmatpush.msrb.mxu3 %v2773_v17  ;;  %v2798_v17 = vld [vmem:[%s5633_s3 + $0x5a0] sm:$0xff] }
  0x3b   : > { %770 = vmatpush.msrb.mxu0 %v2789_v18  ;;  %908 = vmatpush.msrb.mxu2 %v2822_v19  ;;  %v2840_v18 = vld [vmem:[%s5633_s3 + $0x9f0] sm:$0xff] }
  0x3c   : > { %810 = vmatpush.msrb.mxu1 %v2806_v20  ;;  %730 = vmatpush.msrb.mxu3 %v2772_v21  ;;  %v2856_v19 = vld [vmem:[%s5633_s3 + $0xa70] sm:$0xff]  ;;  %v2813_v20 = vld [vmem:[%s5633_s3 + $0x918] sm:$0xff]  ;;  %v2855_v21 = vld [vmem:[%s5633_s3 + $0xa68] sm:$0xff] }
  0x3d   : > { %771 = vmatpush.msrb.mxu0 %v2788_v22  ;;  %909 = vmatpush.msrb.mxu2 %v2821_v23  ;;  %v2812_v22 = vld [vmem:[%s5633_s3 + $0x910] sm:$0xff] }
  0x3e   : > { %811 = vmatpush.msrb.mxu1 %v2805_v24  ;;  %731 = vmatpush.msrb.mxu3 %v2771_v26  ;;  %v2796_v23 = vld [vmem:[%s5633_s3 + $0x590] sm:$0xff]  ;;  %v2838_v24 = vld [vmem:[%s5633_s3 + $0x9e0] sm:$0xff] }
  0x3f   : > { %772 = vmatpush.msrb.mxu0 %v2787_v27  ;;  %910 = vmatpush.msrb.mxu2 %v2820_v28  ;;  %v2854_v26 = vld [vmem:[%s5633_s3 + $0xa60] sm:$0xff]  ;;  %v2811_v27 = vld [vmem:[%s5633_s3 + $0x908] sm:$0xff] }
  0x40   : > { %567 = vmatmul.f32.gmra.mxu0 %v3544_v51  ;;  %732 = vmatpush.msrb.mxu3 %v2770_v29  ;;  %v2795_v28 = vld [vmem:[%s5633_s3 + $0x588] sm:$0xff]  ;;  %v2837_v29 = vld [vmem:[%s5633_s3 + $0x9d8] sm:$0xff] }
  0x41   : > { %773 = vmatpush.msrb.mxu0 %v2786_v30  ;;  %579 = vmatmul.f32.gmra.mxu3 %v3554_v54  ;;  %v2853_v30 = vld [vmem:[%s5633_s3 + $0xa58] sm:$0xff] }
  0x42   : > { %608 = vmatmul.f32.gmra.mxu1 %v3561_v56  ;;  %649 = vmatmul.f32.gmra.mxu2 %v3571_v59 }
  0x43   : > { %733 = vmatpush.msrb.mxu3 %v2769_v33  ;;  %774 = vmatpush.msrb.mxu0 %v2785_v34  ;;  %v2810_v33 = vld [vmem:[%s5633_s3 + $0x900] sm:$0xff] }
  0x44   : > { %812 = vmatpush.msrb.mxu1 %v2804_v35  ;;  %911 = vmatpush.msrb.mxu2 %v2819_v37  ;;  %v2794_v34 = vld [vmem:[%s5633_s3 + $0x580] sm:$0xff]  ;;  %v2836_v35 = vld [vmem:[%s5633_s3 + $0x9d0] sm:$0xff]  ;;  %v2889_v37 = vld [vmem:[%s5633_s3 + $0x278] sm:$0xff] }
  0x45   : > { %734 = vmatpush.msrb.mxu3 %v2768_v36  ;;  %775 = vmatpush.msrb.mxu0 %v2784_v38  ;;  %v2852_v36 = vld [vmem:[%s5633_s3 + $0xa50] sm:$0xff]  ;;  %v2873_v38 = vld [vmem:[%s5633_s3 + $0x1f8] sm:$0xff] }
  0x46   : > { %813 = vmatpush.msrb.mxu1 %v2803_v39  ;;  %912 = vmatpush.msrb.mxu2 %v2818_v44  ;;  %v2835_v39 = vld [vmem:[%s5633_s3 + $0x9c8] sm:$0xff]  ;;  %v2888_v44 = vld [vmem:[%s5633_s3 + $0x270] sm:$0xff] }
  0x47   : > { %735 = vmatpush.msrb.mxu3 %v2767_v43  ;;  %776 = vmatpush.msrb.mxu0 %v2783_v46  ;;  %v2851_v43 = vld [vmem:[%s5633_s3 + $0xa48] sm:$0xff]  ;;  %v2872_v46 = vld [vmem:[%s5633_s3 + $0x1f0] sm:$0xff] }
  0x48   : > { %814 = vmatpush.msrb.mxu1 %v2802_v48  ;;  %570 = vmatmul.f32.gmra.mxu0 %v3575_v60  ;;  %v2834_v48 = vld [vmem:[%s5633_s3 + $0x9c0] sm:$0xff] }
  0x49   : > { %736 = vmatpush.msrb.mxu3 %v2766_v49  ;;  %777 = vmatpush.msrb.mxu0 %v2782_v52  ;;  %v2850_v49 = vld [vmem:[%s5633_s3 + $0xa40] sm:$0xff]  ;;  %v2887_v52 = vld [vmem:[%s5633_s3 + $0x268] sm:$0xff] }
  0x4a   : > { %582 = vmatmul.f32.gmra.mxu3 %v3585_v63  ;;  %611 = vmatmul.f32.gmra.mxu1 %v3597_v2 }
  0x4b   : > { %652 = vmatmul.f32.gmra.mxu2 %v3609_v5  ;;  %737 = vmatpush.msrb.mxu3 %v2765_v53  ;;  %v2871_v53 = vld [vmem:[%s5633_s3 + $0x1e8] sm:$0xff] }
  0x4c   : > { %778 = vmatpush.msrb.mxu0 %v2781_v55  ;;  %913 = vmatpush.msrb.mxu2 %v2817_v57  ;;  %v2833_v55 = vld [vmem:[%s5633_s3 + $0x9b8] sm:$0xff] }
  0x4d   : > { %815 = vmatpush.msrb.mxu1 %v2801_v58  ;;  %738 = vmatpush.msrb.mxu3 %v2764_v61  ;;  %v2849_v57 = vld [vmem:[%s5633_s3 + $0xa38] sm:$0xff]  ;;  %v3915_v58 = vld [vmem:[%s3431_s28 + $0x80] sm:$0xff] }
  0x4e   : > { %779 = vmatpush.msrb.mxu0 %v2780_v62  ;;  %914 = vmatpush.msrb.mxu2 %v2816_v1  ;;  %v2886_v61 = vld [vmem:[%s5633_s3 + $0x260] sm:$0xff]  ;;  %379 = vst [vmem:[#allocation2 + $0xc8] sm:$0xff] %v3915_v58  ;;  %v2832_v1 = vld [vmem:[%s5633_s3 + $0x9b0] sm:$0xff] }
  0x4f   : > { %816 = vmatpush.msrb.mxu1 %v2800_v3  ;;  %739 = vmatpush.msrb.mxu3 %v2763_v4  ;;  %v2870_v62 = vld [vmem:[%s5633_s3 + $0x1e0] sm:$0xff]  ;;  %v2848_v3 = vld [vmem:[%s5633_s3 + $0xa30] sm:$0xff]  ;;  %v2885_v4 = vld [vmem:[%s5633_s3 + $0x258] sm:$0xff] }
  0x50   : > { %780 = vmatpush.msrb.mxu0 %v2779_v6  ;;  %915 = vmatpush.msrb.mxu2 %v2815_v7  ;;  %v2869_v6 = vld [vmem:[%s5633_s3 + $0x1d8] sm:$0xff]  ;;  %v3939_v7 = vld [vmem:[%s3455_s30 + $0x80] sm:$0xff] }
  0x51   : > { %817 = vmatpush.msrb.mxu1 %v2799_v8  ;;  %740 = vmatpush.msrb.mxu3 %v2762_v9  ;;  %v2831_v8 = vld [vmem:[%s5633_s3 + $0x9a8] sm:$0xff]  ;;  %419 = vst [vmem:[#allocation2 + $0xc0] sm:$0xff] %v3939_v7 }
  0x52   : > { %781 = vmatpush.msrb.mxu0 %v2778_v10  ;;  %614 = vmatmul.f32.gmra.mxu1 %v3631_v12  ;;  %v2847_v9 = vld [vmem:[%s5633_s3 + $0xa28] sm:$0xff]  ;;  %v2884_v10 = vld [vmem:[%s5633_s3 + $0x250] sm:$0xff] }
  0x53   : > { %655 = vmatmul.f32.gmra.mxu2 %v3638_v14  ;;  %741 = vmatmul.f32.vlgmr.msrb.gmra.mxu3 %v3507_v40  ;;  %v2797_v40 = vld [vmem:[%s5633_s3 + $0x598] sm:$0xff] }
  0x54   : > { %782 = vmatmul.f32.vlgmr.msrb.gmra.mxu0 %v3524_v45  ;;  %946 = vmatpush.msra.mxu3 %v2841_v11  ;;  %v2839_v45 = vld [vmem:[%s5633_s3 + $0x9e8] sm:$0xff]  ;;  %v2868_v11 = vld [vmem:[%s5633_s3 + $0x1d0] sm:$0xff] }
  0x55   : > { %987 = vmatpush.msra.mxu0 %v2857_v13  ;;  %916 = vmatpush.msrb.mxu2 %v2814_v15  ;;  %v2830_v13 = vld [vmem:[%s5633_s3 + $0x9a0] sm:$0xff] }
  0x56   : > { %818 = vmatpush.msrb.mxu1 %v2798_v17  ;;  %947 = vmatpush.msra.mxu3 %v2840_v18  ;;  %v2846_v15 = vld [vmem:[%s5633_s3 + $0xa20] sm:$0xff]  ;;  %v2883_v17 = vld [vmem:[%s5633_s3 + $0x248] sm:$0xff] }
  0x57   : > { %988 = vmatpush.msra.mxu0 %v2856_v19  ;;  %917 = vmatpush.msrb.mxu2 %v2813_v20  ;;  %v2867_v18 = vld [vmem:[%s5633_s3 + $0x1c8] sm:$0xff]  ;;  %v2829_v19 = vld [vmem:[%s5633_s3 + $0x998] sm:$0xff] }
  0x58   : > { %819 = vmatpush.msrb.mxu1 %v2797_v40  ;;  %948 = vmatpush.msra.mxu3 %v2839_v45  ;;  %v2845_v20 = vld [vmem:[%s5633_s3 + $0xa18] sm:$0xff]  ;;  %v2882_v40 = vld [vmem:[%s5633_s3 + $0x240] sm:$0xff]  ;;  %v2828_v45 = vld [vmem:[%s5633_s3 + $0x990] sm:$0xff] }
  0x59   : > { %989 = vmatpush.msra.mxu0 %v2855_v21  ;;  %918 = vmatpush.msrb.mxu2 %v2812_v22  ;;  %v2844_v21 = vld [vmem:[%s5633_s3 + $0xa10] sm:$0xff]  ;;  %v2865_v22 = vld [vmem:[%s5633_s3 + $0x1b8] sm:$0xff] }
  0x5a   : > { %820 = vmatpush.msrb.mxu1 %v2796_v23  ;;  %949 = vmatpush.msra.mxu3 %v2838_v24  ;;  %v2827_v23 = vld [vmem:[%s5633_s3 + $0x988] sm:$0xff] }
  0x5b   : > { %617 = vmatmul.f32.gmra.mxu1 %v3645_v16  ;;  %658 = vmatmul.f32.gmra.mxu2 %v3677_v25  ;;  %v2843_v24 = vld [vmem:[%s5633_s3 + $0xa08] sm:$0xff] }
  0x5c   : > { %744 = vmatmul.f32.gmra.mxu3 %v3544_v51  ;;  %785 = vmatmul.f32.gmra.mxu0 %v3561_v56 }
  0x5d   : > { %990 = vmatpush.msra.mxu0 %v2854_v26  ;;  %919 = vmatpush.msrb.mxu2 %v2811_v27  ;;  %v2880_v26 = vld [vmem:[%s5633_s3 + $0x230] sm:$0xff]  ;;  %v2826_v27 = vld [vmem:[%s5633_s3 + $0x980] sm:$0xff] }
  0x5e   : > { %821 = vmatpush.msrb.mxu1 %v2795_v28  ;;  %950 = vmatpush.msra.mxu3 %v2837_v29  ;;  %v2842_v28 = vld [vmem:[%s5633_s3 + $0xa00] sm:$0xff]  ;;  %v2905_v29 = vld [vmem:[%s5633_s3 + $0x2f8] sm:$0xff] }
  0x5f   : > { %991 = vmatpush.msra.mxu0 %v2853_v30  ;;  %920 = vmatpush.msrb.mxu2 %v2810_v33  ;;  %v2921_v30 = vld [vmem:[%s5633_s3 + $0x678] sm:$0xff]  ;;  %v2864_v33 = vld [vmem:[%s5633_s3 + $0x1b0] sm:$0xff] }
  0x60   : > { %822 = vmatpush.msrb.mxu1 %v2794_v34  ;;  %951 = vmatpush.msra.mxu3 %v2836_v35  ;;  %v2904_v34 = vld [vmem:[%s5633_s3 + $0x2f0] sm:$0xff] }
  0x61   : > { %992 = vmatpush.msra.mxu0 %v2852_v36  ;;  %1331 = vmatpush.msra.mxu2 %v2889_v37  ;;  %v2920_v35 = vld [vmem:[%s5633_s3 + $0x670] sm:$0xff]  ;;  %v2863_v36 = vld [vmem:[%s5633_s3 + $0x1a8] sm:$0xff]  ;;  %v2878_v37 = vld [vmem:[%s5633_s3 + $0x220] sm:$0xff] }
  0x62   : > { %1290 = vmatpush.msra.mxu1 %v2873_v38  ;;  %952 = vmatpush.msra.mxu3 %v2835_v39  ;;  %v2903_v38 = vld [vmem:[%s5633_s3 + $0x2e8] sm:$0xff] }
  0x63   : > { %620 = vmatmul.f32.gmra.mxu1 %v3696_v32  ;;  %661 = vmatmul.f32.gmra.mxu2 %v3725_v41  ;;  %v2919_v39 = vld [vmem:[%s5633_s3 + $0x668] sm:$0xff] }
  0x64   : > { %747 = vmatmul.f32.gmra.mxu3 %v3575_v60  ;;  %788 = vmatmul.f32.gmra.mxu0 %v3597_v2 }
  0x65   : > { %993 = vmatpush.msra.mxu0 %v2851_v43  ;;  %1332 = vmatpush.msra.mxu2 %v2888_v44  ;;  %v2902_v43 = vld [vmem:[%s5633_s3 + $0x2e0] sm:$0xff] }
  0x66   : > { %1291 = vmatpush.msra.mxu1 %v2872_v46  ;;  %953 = vmatpush.msra.mxu3 %v2834_v48  ;;  %v2862_v44 = vld [vmem:[%s5633_s3 + $0x1a0] sm:$0xff]  ;;  %v2877_v46 = vld [vmem:[%s5633_s3 + $0x218] sm:$0xff] }
  0x67   : > { %994 = vmatpush.msra.mxu0 %v2850_v49  ;;  %1333 = vmatpush.msra.mxu2 %v2887_v52  ;;  %v2901_v48 = vld [vmem:[%s5633_s3 + $0x2d8] sm:$0xff]  ;;  %v2876_v52 = vld [vmem:[%s5633_s3 + $0x210] sm:$0xff] }
  0x68   : > { %1292 = vmatpush.msra.mxu1 %v2871_v53  ;;  %954 = vmatpush.msra.mxu3 %v2833_v55  ;;  %v2861_v49 = vld [vmem:[%s5633_s3 + $0x198] sm:$0xff]  ;;  %v2900_v53 = vld [vmem:[%s5633_s3 + $0x2d0] sm:$0xff] }
  0x69   : > { %995 = vmatpush.msra.mxu0 %v2849_v57  ;;  %1334 = vmatpush.msra.mxu2 %v2886_v61  ;;  %v2917_v55 = vld [vmem:[%s5633_s3 + $0x658] sm:$0xff]  ;;  %v4077_v57 = vld [vmem:[%s3491_s8 + $0x80] sm:$0xff]  ;;  %v344_v61 = vld [vmem:[%s3431_s28 + $0x8] sm:$0x3] }
  0x6a   : > { %1293 = vmatpush.msra.mxu1 %v2870_v62  ;;  %955 = vmatpush.msra.mxu3 %v2832_v1  ;;  %459 = vst [vmem:[#allocation2 + $0x70] sm:$0xff] %v4077_v57  ;;  %v384_v62 = vld [vmem:[%s3455_s30 + $0x8] sm:$0x3]  ;;  %v4085_v1 = vld [vmem:[%s3431_s28 + $0x90] sm:$0xff] }
  0x6b   : > { %623 = vmatmul.f32.gmra.mxu1 %v3744_v50  ;;  %664 = vmatmul.f32.gmra.mxu2 %v3773_v0  ;;  %364 = vst [vmem:[#allocation2 + $0x160] sm:$0x3] %v344_v61 }
  0x6c   : > { %750 = vmatmul.f32.gmra.mxu3 %v3471_v31  ;;  %791 = vmatmul.f32.gmra.mxu0 %v3631_v12  ;;  %404 = vst [vmem:[#allocation2 + $0x148] sm:$0x3] %v384_v62 }
  0x6d   : > { %996 = vmatpush.msra.mxu0 %v2848_v3  ;;  %1335 = vmatpush.msra.mxu2 %v2885_v4  ;;  %381 = vst [vmem:[#allocation2 + $0x1d0] sm:$0xff] %v4085_v1  ;;  %v2860_v3 = vld [vmem:[%s5633_s3 + $0x190] sm:$0xff]  ;;  %v2875_v4 = vld [vmem:[%s5633_s3 + $0x208] sm:$0xff] }
  0x6e   : > { %1294 = vmatpush.msra.mxu1 %v2869_v6  ;;  %956 = vmatpush.msra.mxu3 %v2831_v8  ;;  %v2916_v6 = vld [vmem:[%s5633_s3 + $0x650] sm:$0xff]  ;;  %v2859_v8 = vld [vmem:[%s5633_s3 + $0x188] sm:$0xff] }
  0x6f   : > { %997 = vmatpush.msra.mxu0 %v2847_v9  ;;  %1336 = vmatpush.msra.mxu2 %v2884_v10  ;;  %v2874_v9 = vld [vmem:[%s5633_s3 + $0x200] sm:$0xff] }
  0x70   : > { %1295 = vmatpush.msra.mxu1 %v2868_v11  ;;  %957 = vmatpush.msra.mxu3 %v2830_v13  ;;  %v2898_v10 = vld [vmem:[%s5633_s3 + $0x2c0] sm:$0xff]  ;;  %v2915_v11 = vld [vmem:[%s5633_s3 + $0x648] sm:$0xff] }
  0x71   : > { %998 = vmatpush.msra.mxu0 %v2846_v15  ;;  %1337 = vmatpush.msra.mxu2 %v2883_v17  ;;  %v2858_v13 = vld [vmem:[%s5633_s3 + $0x180] sm:$0xff]  ;;  %v346_v15 = vld [vmem:[%s3431_s28 + $0x18] sm:$0x3] }
  0x72   : > { %1296 = vmatpush.msra.mxu1 %v2867_v18  ;;  %958 = vmatpush.msra.mxu3 %v2829_v19  ;;  %v386_v17 = vld [vmem:[%s3455_s30 + $0x18] sm:$0x3]  ;;  %366 = vst [vmem:[#allocation2 + $0x48] sm:$0x3] %v346_v15  ;;  %v2914_v19 = vld [vmem:[%s5633_s3 + $0x640] sm:$0xff] }
  0x73   : > { %823 = vmatmul.f32.vlgmr.msrb.gmra.mxu1 %v3531_v47  ;;  %921 = vmatmul.f32.vlgmr.msrb.gmra.mxu2 %v3544_v51  ;;  %v2866_v47 = vld [vmem:[%s5633_s3 + $0x1c0] sm:$0xff]  ;;  %v2881_v51 = vld [vmem:[%s5633_s3 + $0x238] sm:$0xff]  ;;  %406 = vst [vmem:[#allocation2 + $0x78] sm:$0x3] %v386_v17 }
  0x74   : > { %753 = vmatmul.f32.gmra.mxu3 %v3514_v42  ;;  %794 = vmatmul.f32.gmra.mxu0 %v3645_v16  ;;  %v2897_v18 = vld [vmem:[%s5633_s3 + $0x2b8] sm:$0xff]  ;;  %v2906_v15 = vld [vmem:[%s5633_s3 + $0x600] sm:$0xff] }
  0x75   : > { %999 = vmatpush.msra.mxu0 %v2845_v20  ;;  %1338 = vmatpush.msra.mxu2 %v2882_v40  ;;  %v2953_v20 = vld [vmem:[%s5633_s3 + $0x778] sm:$0xff]  ;;  %v2952_v40 = vld [vmem:[%s5633_s3 + $0x770] sm:$0xff] }
  0x76   : > { %1297 = vmatpush.msra.mxu1 %v2866_v47  ;;  %959 = vmatpush.msra.mxu3 %v2828_v45  ;;  %v348_v45 = vld [vmem:[%s3431_s28 + $0x28] sm:$0x3] }
  0x77   : > { %1000 = vmatpush.msra.mxu0 %v2844_v21  ;;  %1339 = vmatpush.msra.mxu2 %v2881_v51  ;;  %v388_v21 = vld [vmem:[%s3455_s30 + $0x28] sm:$0x3]  ;;  %368 = vst [vmem:[#allocation2 + $0x88] sm:$0x3] %v348_v45  ;;  %v2912_v51 = vld [vmem:[%s5633_s3 + $0x630] sm:$0xff]  ;;  %v2930_v45 = vld [vmem:[%s5633_s3 + $0x6c0] sm:$0xff] }
  0x78   : > { %1298 = vmatpush.msra.mxu1 %v2865_v22  ;;  %960 = vmatpush.msra.mxu3 %v2827_v23  ;;  %408 = vst [vmem:[#allocation2 + $0x58] sm:$0x3] %v388_v21  ;;  %v2895_v47 = vld [vmem:[%s5633_s3 + $0x2a8] sm:$0xff]  ;;  %v2936_v22 = vld [vmem:[%s5633_s3 + $0x6f0] sm:$0xff]  ;;  %v2945_v21 = vld [vmem:[%s5633_s3 + $0x738] sm:$0xff] }
  0x79   : > { %1001 = vmatpush.msra.mxu0 %v2843_v24  ;;  %1340 = vmatpush.msra.mxu2 %v2880_v26  ;;  %v2935_v23 = vld [vmem:[%s5633_s3 + $0x6e8] sm:$0xff]  ;;  %v2950_v24 = vld [vmem:[%s5633_s3 + $0x760] sm:$0xff]  ;;  %v350_v26 = vld [vmem:[%s3431_s28 + $0x38] sm:$0x3] }
  0x7a   : > { %961 = vmatpush.msra.mxu3 %v2826_v27  ;;  %1299 = vmatpush.msra.mxu1 %v2864_v33  ;;  %v390_v27 = vld [vmem:[%s3455_s30 + $0x38] sm:$0x3]  ;;  %370 = vst [vmem:[#allocation2 + $0xd8] sm:$0x3] %v350_v26  ;;  %v1037_v33 = vld [vmem:[#allocation2 + $0x180] sm:$0xfe] }
  0x7b   : > { %826 = vmatmul.f32.gmra.mxu1 %v3571_v59  ;;  %924 = vmatmul.f32.gmra.mxu2 %v3575_v60  ;;  %v2879_v60 = vld [vmem:[%s5633_s3 + $0x228] sm:$0xff]  ;;  %410 = vst [vmem:[#allocation2 + $0x1d8] sm:$0x3] %v390_v27  ;;  %v2929_v26 = vld [vmem:[%s5633_s3 + $0x6b8] sm:$0xff]  ;;  %v2944_v27 = vld [vmem:[%s5633_s3 + $0x730] sm:$0xff] }
  0x7c   : > { %756 = vmatmul.f32.gmra.mxu3 %v3554_v54  ;;  %797 = vmatmul.f32.gmra.mxu0 %v3696_v32 }
  0x7d   : > { %1002 = vmatpush.msra.mxu0 %v2842_v28  ;;  %1372 = vmatpush.msrb.mxu3 %v2905_v29  ;;  %v2893_v28 = vld [vmem:[%s5633_s3 + $0x298] sm:$0xff]  ;;  %v2910_v29 = vld [vmem:[%s5633_s3 + $0x620] sm:$0xff] }
  0x7e   : > { %1341 = vmatpush.msra.mxu2 %v2879_v60  ;;  %1300 = vmatpush.msra.mxu1 %v2863_v36  ;;  %v1040_v60 = vld [vmem:[#allocation2 + $0x148] sm:$0x1]  ;;  %v2909_v36 = vld [vmem:[%s5633_s3 + $0x618] sm:$0xff] }
  0x7f   : > { %1488 = vmatpush.msrb.mxu0 %v2921_v30  ;;  %1373 = vmatpush.msrb.mxu3 %v2904_v34  ;;  %v2934_v30 = vld [vmem:[%s5633_s3 + $0x6e0] sm:$0xff]  ;;  %v352_v34 = vld [vmem:[%s3431_s28 + $0x48] sm:$0x3] }
  0x80   : > { %1342 = vmatpush.msra.mxu2 %v2878_v37  ;;  %1301 = vmatpush.msra.mxu1 %v2862_v44  ;;  %v2933_v37 = vld [vmem:[%s5633_s3 + $0x6d8] sm:$0xff]  ;;  %372 = vst [vmem:[#allocation2 + $0x158] sm:$0x3] %v352_v34 }
  0x81   : > { %1489 = vmatpush.msrb.mxu0 %v2920_v35  ;;  %1374 = vmatpush.msrb.mxu3 %v2903_v38  ;;  %v2892_v35 = vld [vmem:[%s5633_s3 + $0x290] sm:$0xff] }
  0x82   : > { %1343 = vmatpush.msra.mxu2 %v2877_v46  ;;  %1302 = vmatpush.msra.mxu1 %v2861_v49  ;;  %v2948_v38 = vld [vmem:[%s5633_s3 + $0x750] sm:$0xff]  ;;  %v1148_v49 = vrot.slane %v1037_v33, 1 }
  0x83   : > { %1490 = vmatpush.msrb.mxu0 %v2919_v39  ;;  %829 = vmatmul.f32.gmra.mxu1 %v3609_v5  ;;  %v4206_v39 = vld [vmem:[%s3455_s30 + $0x90] sm:$0xff] }
  0x84   : > { %927 = vmatmul.f32.gmra.mxu2 %v3471_v31  ;;  %759 = vmatmul.f32.gmra.mxu3 %v3585_v63  ;;  %v2918_v31 = vld [vmem:[%s5633_s3 + $0x660] sm:$0xff]  ;;  %421 = vst [vmem:[#allocation2 + $0x100] sm:$0xff] %v4206_v39  ;;  %v4213_v46 = vld [vmem:[%s3491_s8 + $0x90] sm:$0xff] }
  0x85   : > { %800 = vmatmul.f32.gmra.mxu0 %v3744_v50  ;;  %1375 = vmatpush.msrb.mxu3 %v2902_v43  ;;  %v392_v43 = vld [vmem:[%s3455_s30 + $0x48] sm:$0x3]  ;;  %461 = vst [vmem:[#allocation2 + $0x168] sm:$0xff] %v4213_v46 }
  0x86   : > { %1491 = vmatpush.msrb.mxu0 %v2918_v31  ;;  %1344 = vmatpush.msra.mxu2 %v2876_v52  ;;  %v1149_v52 = vrot.slane %v1040_v60, 1  ;;  %412 = vst [vmem:[#allocation2 + $0xa0] sm:$0x3] %v392_v43 }
  0x87   : > { %1376 = vmatpush.msrb.mxu3 %v2901_v48  ;;  %1303 = vmatpush.msra.mxu1 %v2860_v3  ;;  %v424_v48 = vld [vmem:[%s3491_s8 + $0x8] sm:$0x3] }
  0x88   : > { %1492 = vmatpush.msrb.mxu0 %v2917_v55  ;;  %1345 = vmatpush.msra.mxu2 %v2875_v4  ;;  %v2908_v55 = vld [vmem:[%s5633_s3 + $0x610] sm:$0xff]  ;;  %444 = vst [vmem:[#allocation2] sm:$0x3] %v424_v48  ;;  %v1150_v4 = vsel %vm1144_vm0, %v1148_v49, %v1149_v52  ;;  %v1054_v49 = vld [vmem:[#allocation2 + $0x1b8] sm:$0xfe] }
  0x89   : > { %1377 = vmatpush.msrb.mxu3 %v2900_v53  ;;  %1304 = vmatpush.msra.mxu1 %v2859_v8  ;;  %v2891_v53 = vld [vmem:[%s5633_s3 + $0x288] sm:$0xff]  ;;  %v1057_v52 = vld [vmem:[#allocation2 + $0xd8] sm:$0x1] }
  0x8a   : > { %1493 = vmatpush.msrb.mxu0 %v2916_v6  ;;  %1346 = vmatpush.msra.mxu2 %v2874_v9  ;;  %v1043_v6 = vld [vmem:[#allocation2 + $0x178] sm:$0xfe]  ;;  %v2907_v8 = vld [vmem:[%s5633_s3 + $0x608] sm:$0xff]  ;;  %v1046_v9 = vld [vmem:[#allocation2 + $0x78] sm:$0x1] }
  0x8b   : > { %832 = vmatmul.f32.gmra.mxu1 %v3638_v14 }
  0x8c   : > { %930 = vmatmul.f32.gmra.mxu2 %v3514_v42  ;;  %762 = vmatmul.f32.gmra.mxu3 %v3915_v58  ;;  %v2899_v42 = vld [vmem:[%s5633_s3 + $0x2c8] sm:$0xff] }
  0x8d   : > { %803 = vmatmul.f32.gmra.mxu0 %v3939_v7  ;;  %1378 = vmatpush.msrb.mxu3 %v2899_v42  ;;  %v1045_v42 = vld [vmem:[#allocation2 + $0x48] sm:$0x1] }
  0x8e   : > { %1494 = vmatpush.msrb.mxu0 %v2915_v11  ;;  %1305 = vmatpush.msra.mxu1 %v2858_v13  ;;  %v2931_v11 = vld [vmem:[%s5633_s3 + $0x6c8] sm:$0xff]  ;;  %v2946_v13 = vld [vmem:[%s5633_s3 + $0x740] sm:$0xff] }
  0x8f   : > { %1379 = vmatpush.msrb.mxu3 %v2898_v10  ;;  %1570 = vmatpush.msrb.mxu2 %v2953_v20  ;;  %v2890_v10 = vld [vmem:[%s5633_s3 + $0x280] sm:$0xff]  ;;  %v354_v20 = vld [vmem:[%s3431_s28 + $0x58] sm:$0x3] }
  0x90   : > { %1495 = vmatpush.msrb.mxu0 %v2914_v19  ;;  %v1157_v19 = vrot.slane %v1043_v6, 1  ;;  %374 = vst [vmem:[#allocation2 + $0x1c8] sm:$0x3] %v354_v20 }
  0x91   : > { %1380 = vmatpush.msrb.mxu3 %v2897_v18  ;;  %1571 = vmatpush.msrb.mxu2 %v2952_v40  ;;  %v1158_v40 = vrot.slane %v1046_v9, 1  ;;  %v1173_v9 = vrot.slane %v1057_v52, 1 }
  0x93   : > { %835 = vmatmul.f32.gmra.mxu1 %v3677_v25 }
  0x94   : > { %933 = vmatmul.f32.gmra.mxu2 %v3554_v54  ;;  %962 = vmatmul.f32.vlgmr.msra.gmra.mxu3 %v3561_v56  ;;  %v2896_v54 = vld [vmem:[%s5633_s3 + $0x2b0] sm:$0xff]  ;;  %v2913_v56 = vld [vmem:[%s5633_s3 + $0x638] sm:$0xff] }
  0x95   : > { %1003 = vmatmul.f32.vlgmr.msra.gmra.mxu0 %v3571_v59  ;;  %v2937_v59 = vld [vmem:[%s5633_s3 + $0x6f8] sm:$0xff]  ;;  %1381 = vmatpush.msrb.mxu3 %v2896_v54 }
  0x96   : > { %1496 = vmatpush.msrb.mxu0 %v2913_v56  ;;  %1529 = vmatpush.msrb.mxu1 %v2937_v59  ;;  %v394_v54 = vld [vmem:[%s3455_s30 + $0x58] sm:$0x3]  ;;  %v1155_v59 = vrot.slane %v1045_v42, 1  ;;  %v1172_v42 = vrot.slane %v1054_v49, 1 }
  0x97   : > { %1382 = vmatpush.msrb.mxu3 %v2895_v47  ;;  %414 = vst [vmem:[#allocation2 + $0x8] sm:$0x3] %v394_v54  ;;  %v1060_v54 = vld [vmem:[#allocation2 + $0xd0] sm:$0xfe] }
  0x98   : > { %1497 = vmatpush.msrb.mxu0 %v2912_v51  ;;  %1530 = vmatpush.msrb.mxu1 %v2936_v22  ;;  %v1048_v22 = vld [vmem:[#allocation2 + $0xf0] sm:$0xfe] }
  0x99   : > { %v1163_v33 = vrot.slane %v1048_v22, 1  ;;  %v1038_v22 = vld [vmem:[#allocation2 + $0x50] sm:$0xfe] }
  0x9a   : > { %1531 = vmatpush.msrb.mxu1 %v2935_v23  ;;  %v1049_v23 = vld [vmem:[#allocation2 + $0xf8] sm:$0xfe] }
  0x9b   : > { %838 = vmatmul.f32.gmra.mxu1 %v3725_v41  ;;  %v1166_v34 = vrot.slane %v1049_v23, 1  ;;  %v2925_v23 = vld [vmem:[%s5633_s3 + $0x698] sm:$0xff] }
  0x9c   : > { %936 = vmatmul.f32.gmra.mxu2 %v3585_v63  ;;  %965 = vmatmul.f32.gmra.mxu3 %v3597_v2  ;;  %v2951_v63 = vld [vmem:[%s5633_s3 + $0x768] sm:$0xff]  ;;  %v2894_v2 = vld [vmem:[%s5633_s3 + $0x2a0] sm:$0xff] }
  0x9d   : > { %1006 = vmatmul.f32.gmra.mxu0 %v3609_v5  ;;  %1572 = vmatpush.msrb.mxu2 %v2951_v63  ;;  %v2911_v5 = vld [vmem:[%s5633_s3 + $0x628] sm:$0xff] }
  0x9e   : > { %1383 = vmatpush.msrb.mxu3 %v2894_v2  ;;  %1498 = vmatpush.msrb.mxu0 %v2911_v5  ;;  %v4278_v2 = vsel %vm1144_vm0, %v1157_v19, %v1158_v40  ;;  %v1051_v5 = vld [vmem:[#allocation2 + $0x88] sm:$0x1]  ;;  %v430_v19 = vld [vmem:[%s3491_s8 + $0x38] sm:$0x3] }
  0x9f   : > { %1573 = vmatpush.msrb.mxu2 %v2950_v24  ;;  %1532 = vmatpush.msrb.mxu1 %v2934_v30  ;;  %v1052_v24 = vld [vmem:[#allocation2 + $0x58] sm:$0x1]  ;;  %v356_v30 = vld [vmem:[%s3431_s28 + $0x68] sm:$0x3]  ;;  %v1164_v60 = vrot.slane %v1051_v5, 1 }
  0xa0   : > { %1384 = vmatpush.msrb.mxu3 %v2893_v28  ;;  %1499 = vmatpush.msrb.mxu0 %v2910_v29  ;;  %v2968_v28 = vld [vmem:[%s5633_s3 + $0xaf0] sm:$0xff]  ;;  %v2985_v29 = vld [vmem:[%s5633_s3 + $0xb78] sm:$0xff]  ;;  %376 = vst [vmem:[#allocation2 + $0x40] sm:$0x3] %v356_v30  ;;  %v1041_v5 = vld [vmem:[#allocation2] sm:$0x1] }
  0xa1   : > { %1533 = vmatpush.msrb.mxu1 %v2933_v37  ;;  %v2943_v37 = vld [vmem:[%s5633_s3 + $0x728] sm:$0xff]  ;;  %v4320_v48 = vsel %vm1144_vm0, %v1163_v33, %v1164_v60  ;;  %450 = vst [vmem:[#allocation2 + $0x98] sm:$0x3] %v430_v19  ;;  %v2924_v33 = vld [vmem:[%s5633_s3 + $0x690] sm:$0xff] }
  0xa2   : > { %1385 = vmatpush.msrb.mxu3 %v2892_v35  ;;  %1500 = vmatpush.msrb.mxu0 %v2909_v36  ;;  %v1167_v35 = vrot.slane %v1052_v24, 1  ;;  %v2928_v36 = vld [vmem:[%s5633_s3 + $0x6b0] sm:$0xff]  ;;  %v2939_v60 = vld [vmem:[%s5633_s3 + $0x708] sm:$0xff] }
  0xa3   : > { %841 = vmatmul.f32.gmra.mxu1 %v3773_v0  ;;  %v2940_v24 = vld [vmem:[%s5633_s3 + $0x710] sm:$0xff] }
  0xa4   : > { %939 = vmatmul.f32.gmra.mxu2 %v3915_v58  ;;  %968 = vmatmul.f32.gmra.mxu3 %v3631_v12  ;;  %v2949_v12 = vld [vmem:[%s5633_s3 + $0x758] sm:$0xff]  ;;  %v1039_v58 = vld [vmem:[#allocation2 + $0x160] sm:$0x1] }
  0xa5   : > { %1009 = vmatmul.f32.gmra.mxu0 %v3638_v14  ;;  %1574 = vmatpush.msrb.mxu2 %v2949_v12  ;;  %v1036_v14 = vld [vmem:[#allocation2 + $0x38] sm:$0xfe]  ;;  %v1146_v31 = vrot.slane %v1039_v58, 1  ;;  %v396_v12 = vld [vmem:[%s3455_s30 + $0x68] sm:$0x3] }
  0xa6   : > { %v1145_v44 = vrot.slane %v1036_v14, 1  ;;  %1386 = vmatpush.msrb.mxu3 %v2891_v53  ;;  %1501 = vmatpush.msrb.mxu0 %v2908_v55  ;;  %v428_v14 = vld [vmem:[%s3491_s8 + $0x28] sm:$0x3]  ;;  %416 = vst [vmem:[#allocation2 + $0x1c0] sm:$0x3] %v396_v12 }
  0xa7   : > { %1575 = vmatpush.msrb.mxu2 %v2948_v38  ;;  %448 = vst [vmem:[#allocation2 + $0x108] sm:$0x3] %v428_v14  ;;  %v1055_v53 = vld [vmem:[#allocation2 + $0x1a0] sm:$0xfe]  ;;  %v1058_v55 = vld [vmem:[#allocation2 + $0x1d8] sm:$0x1] }
  0xa8   : > { %v1147_v3 = vsel %vm1144_vm0, %v1145_v44, %v1146_v31  ;;  %1502 = vmatpush.msrb.mxu0 %v2907_v8  ;;  %1387 = vmatpush.msrb.mxu3 %v2890_v10  ;;  %v4323_v31 = vsel %vm1144_vm0, %v1166_v34, %v1167_v35  ;;  %v1175_v6 = vrot.slane %v1055_v53, 1  ;;  %v398_v8 = vld [vmem:[%s3455_s30 + $0x78] sm:$0x3]  ;;  %v1176_v10 = vrot.slane %v1058_v55, 1  ;;  %v2963_v34 = vld [vmem:[%s5633_s3 + $0xac8] sm:$0xff] }
  0xa9   : > { %418 = vst [vmem:[#allocation2 + $0x110] sm:$0x3] %v398_v8  ;;  %v1069_v55 = vld [vmem:[#allocation2 + $0x1c8] sm:$0x1]  ;;  %v2962_v8 = vld [vmem:[%s5633_s3 + $0xac0] sm:$0xff] }
  0xaa   : > { %1503 = vmatpush.msrb.mxu0 %v2906_v15 }
  0xab   : > { %844 = vmatmul.f32.gmra.mxu1 %v4077_v57 }
  0xac   : > { %942 = vmatmul.f32.gmra.mxu2 %v4085_v1  ;;  %971 = vmatmul.f32.gmra.mxu3 %v3645_v16  ;;  %v4225_v61 = vpop.f32.mrf.mxu0  ;;  %v2932_v16 = vld [vmem:[%s5633_s3 + $0x6d0] sm:$0xff] }
  0xad   : > { %1012 = vmatmul.f32.gmra.mxu0 %v3677_v25  ;;  %v2947_v25 = vld [vmem:[%s5633_s3 + $0x748] sm:$0xff]  ;;  %v4233_v62 = vpop.f32.mrf.mxu1  ;;  %v1042_v1 = vld [vmem:[#allocation2 + $0xb0] sm:$0xfe]  ;;  %1534 = vmatpush.msrb.mxu1 %v2932_v16 }
  0xae   : > { %1576 = vmatpush.msrb.mxu2 %v2947_v25  ;;  %v1154_v18 = vrot.slane %v1042_v1, 1  ;;  %1727 = vmatpush.msra.mxu0 %v2985_v29  ;;  %v2927_v16 = vld [vmem:[%s5633_s3 + $0x6a8] sm:$0xff]  ;;  %v2942_v25 = vld [vmem:[%s5633_s3 + $0x720] sm:$0xff]  ;;  %v1181_v29 = vrot.slane %v1060_v54, 1  ;;  %v2961_v54 = vld [vmem:[%s5633_s3 + $0xab8] sm:$0xff] }
  0xaf   : > { %1535 = vmatpush.msrb.mxu1 %v2931_v11  ;;  %v2966_v1 = vld [vmem:[%s5633_s3 + $0xae0] sm:$0xff] }
  0xb0   : > { %1577 = vmatpush.msrb.mxu2 %v2946_v13  ;;  %v4275_v63 = vsel %vm1144_vm0, %v1154_v18, %v1155_v59  ;;  %v2926_v11 = vld [vmem:[%s5633_s3 + $0x6a0] sm:$0xff]  ;;  %v2941_v13 = vld [vmem:[%s5633_s3 + $0x718] sm:$0xff] }
  0xb1   : > { %1536 = vmatpush.msrb.mxu1 %v2930_v45  ;;  %v1061_v59 = vld [vmem:[#allocation2 + $0x18] sm:$0xfe]  ;;  %v4365_v45 = vsel %vm1144_vm0, %v1172_v42, %v1173_v9  ;;  %v1070_v42 = vld [vmem:[#allocation2 + $0x8] sm:$0x1] }
  0xb2   : > { %1578 = vmatpush.msrb.mxu2 %v2945_v21  ;;  %v4368_v21 = vsel %vm1144_vm0, %v1175_v6, %v1176_v10  ;;  %v1184_v12 = vrot.slane %v1061_v59, 1  ;;  %v2938_v6 = vld [vmem:[%s5633_s3 + $0x700] sm:$0xff]  ;;  %v2979_v10 = vld [vmem:[%s5633_s3 + $0xb48] sm:$0xff]  ;;  %v1194_v19 = vrot.slane %v1070_v42, 1  ;;  %v3000_v42 = vld [vmem:[%s5633_s3 + $0xbf0] sm:$0xff] }
  0xb3   : > { %1306 = vmatmul.f32.vlgmr.msra.gmra.mxu1 %v1147_v3  ;;  %v4252_v17 = vpop.f32.mrf.mxu3  ;;  %v2983_v3 = vld [vmem:[%s5633_s3 + $0xb68] sm:$0xff]  ;;  %v2978_v59 = vld [vmem:[%s5633_s3 + $0xb40] sm:$0xff] }
  0xb4   : > { %1347 = vmatmul.f32.vlgmr.msra.gmra.mxu2 %v1150_v4  ;;  %974 = vmatmul.f32.gmra.mxu3 %v3696_v32  ;;  %v4258_v56 = vpop.f32.mrf.mxu2  ;;  %v2969_v32 = vld [vmem:[%s5633_s3 + $0xaf8] sm:$0xff] }
  0xb5   : > { %1015 = vmatmul.f32.gmra.mxu0 %v3725_v41  ;;  %v4266_v47 = vpop.f32.mrf.mxu0  ;;  %1686 = vmatpush.msra.mxu3 %v2969_v32  ;;  %v426_v41 = vld [vmem:[%s3491_s8 + $0x18] sm:$0x3] }
  0xb6   : > { %v4272_v51 = vpop.f32.mrf.mxu1  ;;  %446 = vst [vmem:[#allocation2 + $0x60] sm:$0x3] %v426_v41  ;;  %1537 = vmatpush.msrb.mxu1 %v2929_v26  ;;  %1579 = vmatpush.msrb.mxu2 %v2944_v27  ;;  %v358_v4 = vld [vmem:[%s3431_s28 + $0x78] sm:$0x3]  ;;  %v1064_v41 = vld [vmem:[#allocation2 + $0xa0] sm:$0x1] }
  0xb7   : > { %1687 = vmatpush.msra.mxu3 %v2968_v28  ;;  %378 = vst [vmem:[#allocation2 + $0x120] sm:$0x3] %v358_v4  ;;  %v1063_v32 = vld [vmem:[#allocation2 + $0x158] sm:$0x1]  ;;  %v2964_v26 = vld [vmem:[%s5633_s3 + $0xad0] sm:$0xff]  ;;  %v1185_v14 = vrot.slane %v1064_v41, 1 }
  0xb8   : > { %1538 = vmatpush.msrb.mxu1 %v2928_v36  ;;  %1580 = vmatpush.msrb.mxu2 %v2943_v37  ;;  %v2981_v27 = vld [vmem:[%s5633_s3 + $0xb58] sm:$0xff]  ;;  %v432_v28 = vld [vmem:[%s3491_s8 + $0x48] sm:$0x3]  ;;  %v1182_v30 = vrot.slane %v1063_v32, 1  ;;  %v1152_v36 = vrot.slane %v1041_v5, 1 }
  0xb9   : > { %452 = vst [vmem:[#allocation2 + $0x80] sm:$0x3] %v432_v28  ;;  %v4407_v53 = vsel %vm1144_vm0, %v1184_v12, %v1185_v14  ;;  %v3017_v32 = vld [vmem:[%s5633_s3 + $0x378] sm:$0xff]  ;;  %v2960_v12 = vld [vmem:[%s5633_s3 + $0xab0] sm:$0xff] }
  0xba   : > { %1539 = vmatpush.msrb.mxu1 %v2927_v16  ;;  %1581 = vmatpush.msrb.mxu2 %v2942_v25  ;;  %v4404_v52 = vsel %vm1144_vm0, %v1181_v29, %v1182_v30  ;;  %v1044_v16 = vld [vmem:[#allocation2 + $0xa8] sm:$0xfe]  ;;  %v2977_v14 = vld [vmem:[%s5633_s3 + $0xb38] sm:$0xff] }
  0xbb   : > { %1309 = vmatmul.f32.gmra.mxu1 %v4275_v63  ;;  %v4299_v58 = vpop.f32.mrf.mxu3  ;;  %v2923_v25 = vld [vmem:[%s5633_s3 + $0x688] sm:$0xff] }
  0xbc   : > { %1350 = vmatmul.f32.gmra.mxu2 %v4278_v2  ;;  %977 = vmatmul.f32.gmra.mxu3 %v3744_v50  ;;  %v2967_v50 = vld [vmem:[%s5633_s3 + $0xae8] sm:$0xff] }
  0xbd   : > { %1018 = vmatmul.f32.gmra.mxu0 %v3773_v0  ;;  %v4307_v38 = vpop.f32.mrf.mxu2  ;;  %v4309_v43 = vpop.f32.mrf.mxu0  ;;  %v2984_v0 = vld [vmem:[%s5633_s3 + $0xb70] sm:$0xff]  ;;  %1688 = vmatpush.msra.mxu3 %v2967_v50  ;;  %v1047_v9 = vld [vmem:[#allocation2 + $0x60] sm:$0x1] }
  0xbe   : > { %1728 = vmatpush.msra.mxu0 %v2984_v0  ;;  %1540 = vmatpush.msrb.mxu1 %v2926_v11  ;;  %v1066_v50 = vld [vmem:[#allocation2 + $0x170] sm:$0xfe]  ;;  %v1067_v0 = vld [vmem:[#allocation2 + $0x68] sm:$0xfe]  ;;  %v2922_v11 = vld [vmem:[%s5633_s3 + $0x680] sm:$0xff]  ;;  %v1161_v5 = vrot.slane %v1047_v9, 1 }
  0xbf   : > { %v4317_v44 = vpop.f32.mrf.mxu1  ;;  %1689 = vmatpush.msra.mxu3 %v2966_v1  ;;  %1582 = vmatpush.msrb.mxu2 %v2941_v13  ;;  %v434_v1 = vld [vmem:[%s3491_s8 + $0x58] sm:$0x3]  ;;  %v1190_v13 = vrot.slane %v1066_v50, 1  ;;  %v1050_v50 = vld [vmem:[#allocation2 + $0x30] sm:$0xfe] }
  0xc0   : > { %1729 = vmatpush.msra.mxu0 %v2983_v3  ;;  %1541 = vmatpush.msrb.mxu1 %v2925_v23  ;;  %454 = vst [vmem:[#allocation2 + $0xe0] sm:$0x3] %v434_v1 }
  0xc1   : > { %1583 = vmatpush.msrb.mxu2 %v2940_v24 }
  0xc2   : > { %1542 = vmatpush.msrb.mxu1 %v2924_v33  ;;  %v3001_v33 = vld [vmem:[%s5633_s3 + $0xbf8] sm:$0xff] }
  0xc3   : > { %1312 = vmatmul.f32.gmra.mxu1 %v4320_v48  ;;  %1584 = vmatpush.msrb.mxu2 %v2939_v60 }
  0xc4   : > { %1353 = vmatmul.f32.gmra.mxu2 %v4323_v31  ;;  %980 = vmatmul.f32.gmra.mxu3 %v3939_v7  ;;  %v4349_v15 = vpop.f32.mrf.mxu3  ;;  %v2965_v7 = vld [vmem:[%s5633_s3 + $0xad8] sm:$0xff] }
  0xc5   : > { %1021 = vmatmul.f32.gmra.mxu0 %v4077_v57  ;;  %v2982_v57 = vld [vmem:[%s5633_s3 + $0xb60] sm:$0xff]  ;;  %v4357_v18 = vpop.f32.mrf.mxu2  ;;  %v4360_v20 = vpop.f32.mrf.mxu0  ;;  %1690 = vmatpush.msra.mxu3 %v2965_v7  ;;  %v1191_v7 = vrot.slane %v1069_v55, 1 }
  0xc6   : > { %1730 = vmatpush.msra.mxu0 %v2982_v57  ;;  %1543 = vmatpush.msrb.mxu1 %v2923_v25  ;;  %v1193_v57 = vrot.slane %v1067_v0, 1  ;;  %v1053_v0 = vld [vmem:[#allocation2 + $0x108] sm:$0x1] }
  0xc7   : > { %v4362_v40 = vpop.f32.mrf.mxu1  ;;  %1691 = vmatpush.msra.mxu3 %v2964_v26  ;;  %1585 = vmatpush.msrb.mxu2 %v2938_v6  ;;  %v1072_v26 = vld [vmem:[#allocation2 + $0x188] sm:$0xfe]  ;;  %v4444_v30 = vsel %vm1144_vm0, %v1190_v13, %v1191_v7  ;;  %v1170_v9 = vrot.slane %v1053_v0, 1  ;;  %v2957_v0 = vld [vmem:[%s5633_s3 + $0xa98] sm:$0xff] }
  0xc8   : > { %1731 = vmatpush.msra.mxu0 %v2981_v27  ;;  %1544 = vmatpush.msrb.mxu1 %v2922_v11  ;;  %v1073_v27 = vld [vmem:[#allocation2 + $0x28] sm:$0xfe]  ;;  %v1199_v55 = vrot.slane %v1072_v26, 1 }
  0xc9   : > { %1692 = vmatpush.msra.mxu3 %v2963_v34  ;;  %2071 = vmatpush.msra.mxu2 %v3017_v32  ;;  %v1202_v25 = vrot.slane %v1073_v27, 1  ;;  %v1082_v27 = vld [vmem:[#allocation2 + $0x110] sm:$0x1] }
  0xca   : > { %1768 = vmatpush.msra.mxu1 %v3001_v33  ;;  %v1059_v33 = vld [vmem:[#allocation2 + $0x98] sm:$0x1] }
  0xcb   : > { %1315 = vmatmul.f32.gmra.mxu1 %v4365_v45  ;;  %1693 = vmatpush.msra.mxu3 %v2962_v8  ;;  %v1169_v8 = vrot.slane %v1050_v50, 1  ;;  %v1212_v50 = vrot.slane %v1082_v27, 1  ;;  %v2972_v27 = vld [vmem:[%s5633_s3 + $0xb10] sm:$0xff] }
  0xcc   : > { %1356 = vmatmul.f32.gmra.mxu2 %v4368_v21  ;;  %983 = vmatmul.f32.gmra.mxu3 %v4206_v39  ;;  %v1151_v39 = vrot.slane %v1038_v22, 1  ;;  %v1160_v22 = vrot.slane %v1044_v16, 1 }
  0xcd   : > { %1024 = vmatmul.f32.gmra.mxu0 %v4213_v46  ;;  %v4396_v35 = vpop.f32.mrf.mxu3  ;;  %v2980_v46 = vld [vmem:[%s5633_s3 + $0xb50] sm:$0xff]  ;;  %1694 = vmatpush.msra.mxu3 %v2961_v54  ;;  %v1079_v54 = vld [vmem:[#allocation2 + $0x128] sm:$0xfe]  ;;  %v4502_v26 = vsel %vm1144_vm0, %v1169_v8, %v1170_v9  ;;  %v604_v8 = vadd.f32 %v4233_v62, %v4225_v61  ;;  %v2997_v61 = vld [vmem:[%s5633_s3 + $0xbd8] sm:$0xff] }
  0xce   : > { %v4401_v37 = vpop.f32.mrf.mxu2  ;;  %1732 = vmatpush.msra.mxu0 %v2980_v46  ;;  %v1153_v4 = vsel %vm1144_vm0, %v1151_v39, %v1152_v36  ;;  %v4459_v34 = vsel %vm1144_vm0, %v1160_v22, %v1161_v5  ;;  %v1075_v39 = vld [vmem:[#allocation2 + $0x40] sm:$0x1]  ;;  %v3016_v46 = vld [vmem:[%s5633_s3 + $0x370] sm:$0xff]  ;;  %1769 = vmatpush.msra.mxu1 %v3000_v42  ;;  %v2975_v5 = vld [vmem:[%s5633_s3 + $0xb28] sm:$0xff] }
  0xcf   : > { %v615_v49 = vpop.f32.mrf.mxu1  ;;  %v1076_v36 = vld [vmem:[#allocation2 + $0x1c0] sm:$0x1]  ;;  %1695 = vmatpush.msra.mxu3 %v2960_v12  ;;  %2072 = vmatpush.msra.mxu2 %v3016_v46  ;;  %v1200_v16 = vrot.slane %v1075_v39, 1  ;;  %v438_v12 = vld [vmem:[%s3491_s8 + $0x78] sm:$0x3] }
  0xd0   : > { %v616_v41 = vadd.f32 %v615_v49, %v4252_v17  ;;  %1733 = vmatpush.msra.mxu0 %v2979_v10  ;;  %v4447_v17 = vsel %vm1144_vm0, %v1193_v57, %v1194_v19  ;;  %v436_v49 = vld [vmem:[%s3491_s8 + $0x68] sm:$0x3]  ;;  %v1203_v1 = vrot.slane %v1076_v36, 1  ;;  %v1078_v57 = vld [vmem:[#allocation2 + $0x140] sm:$0xfe]  ;;  %v1211_v36 = vrot.slane %v1079_v54, 1 }
  0xd1   : > { %v783_v3 = vpop.f32.mrf.mxu0  ;;  %456 = vst [vmem:[#allocation2 + $0x150] sm:$0x3] %v436_v49  ;;  %v3015_v10 = vld [vmem:[%s5633_s3 + $0x368] sm:$0xff]  ;;  %v1081_v19 = vld [vmem:[#allocation2 + $0x120] sm:$0x1]  ;;  %v4487_v32 = vsel %vm1144_vm0, %v1199_v55, %v1200_v16  ;;  %v3012_v54 = vld [vmem:[%s5633_s3 + $0x350] sm:$0xff] }
  0xd2   : > { %1734 = vmatpush.msra.mxu0 %v2978_v59  ;;  %2073 = vmatpush.msra.mxu2 %v3015_v10  ;;  %v2958_v22 = vld [vmem:[%s5633_s3 + $0xaa0] sm:$0xff]  ;;  %458 = vst [vmem:[#allocation2 + $0x1b0] sm:$0x3] %v438_v12  ;;  %v1209_v39 = vrot.slane %v1081_v19, 1  ;;  %v360_v46 = vld [vmem:[%s3431_s28 + $0x88] sm:$0x3] }
  0xd3   : > { %1318 = vmatmul.f32.gmra.mxu1 %v4404_v52  ;;  %v2974_v49 = vld [vmem:[%s5633_s3 + $0xb20] sm:$0xff]  ;;  %380 = vst [vmem:[#allocation2 + $0xe8] sm:$0x3] %v360_v46 }
  0xd4   : > { %1359 = vmatmul.f32.gmra.mxu2 %v4407_v53  ;;  %1388 = vmatmul.f32.vlgmr.msrb.gmra.mxu3 %v1153_v4  ;;  %v2976_v4 = vld [vmem:[%s5633_s3 + $0xb30] sm:$0xff]  ;;  %v2998_v55 = vld [vmem:[%s5633_s3 + $0xbe0] sm:$0xff] }
  0xd5   : > { %1504 = vmatmul.f32.vlgmr.msrb.gmra.mxu0 %v4275_v63 }
  0xd6   : > { %v656_v63 = vpop.f32.mrf.mxu2  ;;  %v742_v24 = vpop.f32.mrf.mxu3  ;;  %1735 = vmatpush.msra.mxu0 %v2977_v14  ;;  %v1056_v14 = vld [vmem:[#allocation2 + $0x198] sm:$0xfe] }
  0xd7   : > { %v4439_v23 = vadd.f32 %v656_v63, %v616_v41  ;;  %v4441_v28 = vadd.f32 %v783_v3, %v742_v24  ;;  %v2959_v3 = vld [vmem:[%s5633_s3 + $0xaa8] sm:$0xff]  ;;  %v4490_v41 = vsel %vm1144_vm0, %v1202_v25, %v1203_v1  ;;  %v1178_v25 = vrot.slane %v1056_v14, 1 }
  0xd8   : > { %v618_v29 = vpop.f32.mrf.mxu1  ;;  %1696 = vmatpush.msra.mxu3 %v2959_v3  ;;  %1736 = vmatpush.msra.mxu0 %v2976_v4  ;;  %v2999_v63 = vld [vmem:[%s5633_s3 + $0xbe8] sm:$0xff]  ;;  %v1179_v1 = vrot.slane %v1059_v33, 1  ;;  %v3013_v3 = vld [vmem:[%s5633_s3 + $0x358] sm:$0xff] }
  0xd9   : > { %v786_v60 = vpop.f32.mrf.mxu0  ;;  %v619_v6 = vadd.f32 %v618_v29, %v4299_v58  ;;  %v3014_v29 = vld [vmem:[%s5633_s3 + $0x360] sm:$0xff]  ;;  %1770 = vmatpush.msra.mxu1 %v2999_v63  ;;  %v645_v63 = vadd.f32 %v4258_v56, %v604_v8  ;;  %v3011_v33 = vld [vmem:[%s5633_s3 + $0x348] sm:$0xff] }
  0xda   : > { %1697 = vmatpush.msra.mxu3 %v2958_v22  ;;  %1737 = vmatpush.msra.mxu0 %v2975_v5  ;;  %v4548_v19 = vsel %vm1144_vm0, %v1178_v25, %v1179_v1  ;;  %v1065_v22 = vld [vmem:[#allocation2 + $0x80] sm:$0x1] }
  0xdb   : > { %1321 = vmatmul.f32.gmra.mxu1 %v4444_v30  ;;  %2074 = vmatpush.msra.mxu2 %v3014_v29  ;;  %v4556_v5 = vld [vmem:[%s5634_s4] ss:$0 sm:$0xff]  ;;  %v2996_v29 = vld [vmem:[%s5633_s3 + $0xbd0] sm:$0xff]  ;;  %v1188_v56 = vrot.slane %v1065_v22, 1 }
  0xdc   : > { %1362 = vmatmul.f32.gmra.mxu2 %v4447_v17  ;;  %1391 = vmatmul.f32.gmra.mxu3 %v4459_v34  ;;  %v668_v46 = vadd.f32 %v4556_v5, %v645_v63  ;;  %v1071_v8 = vld [vmem:[#allocation2 + $0xe0] sm:$0x1]  ;;  %v610_v63 = vadd.f32 %v4317_v44, %v4309_v43  ;;  %v3032_v43 = vld [vmem:[%s5633_s3 + $0x3f0] sm:$0xff]  ;;  %v3049_v44 = vld [vmem:[%s5633_s3 + $0x478] sm:$0xff] }
  0xdd   : > { %1507 = vmatmul.f32.gmra.mxu0 %v4320_v48  ;;  %1698 = vmatpush.msra.mxu3 %v2957_v0 }
  0xde   : > { %v659_v11 = vpop.f32.mrf.mxu2  ;;  %1738 = vmatpush.msra.mxu0 %v2974_v49  ;;  %1771 = vmatpush.msra.mxu1 %v2998_v55  ;;  %v2971_v49 = vld [vmem:[%s5633_s3 + $0xb08] sm:$0xff] }
  0xdf   : > { %v4482_v13 = vadd.f32 %v659_v11, %v619_v6  ;;  %v745_v7 = vpop.f32.mrf.mxu3  ;;  %2075 = vmatpush.msra.mxu2 %v3013_v3  ;;  %v4536_v11 = vsel %vm1144_vm0, %v1211_v36, %v1212_v50  ;;  %v2995_v55 = vld [vmem:[%s5633_s3 + $0xbc8] sm:$0xff] }
  0xe0   : > { %v4484_v59 = vadd.f32 %v786_v60, %v745_v7  ;;  %v621_v58 = vpop.f32.mrf.mxu1  ;;  %v1208_v60 = vrot.slane %v1078_v57, 1  ;;  %v2956_v7 = vld [vmem:[%s5633_s3 + $0xa90] sm:$0xff]  ;;  %v2973_v57 = vld [vmem:[%s5633_s3 + $0xb18] sm:$0xff]  ;;  %1772 = vmatpush.msra.mxu1 %v2997_v61 }
  0xe1   : > { %v789_v24 = vpop.f32.mrf.mxu0  ;;  %v622_v16 = vadd.f32 %v621_v58, %v4349_v15  ;;  %1699 = vmatpush.msra.mxu3 %v2956_v7  ;;  %1739 = vmatpush.msra.mxu0 %v2973_v57  ;;  %v1062_v58 = vld [vmem:[#allocation2 + $0x138] sm:$0xfe] }
  0xe2   : > { %v4533_v10 = vsel %vm1144_vm0, %v1208_v60, %v1209_v39  ;;  %2076 = vmatpush.msra.mxu2 %v3012_v54  ;;  %v1187_v14 = vrot.slane %v1062_v58, 1  ;;  %1773 = vmatpush.msra.mxu1 %v2996_v29  ;;  %v3033_v7 = vld [vmem:[%s5633_s3 + $0x3f8] sm:$0xff] }
  0xe3   : > { %1324 = vmatmul.f32.gmra.mxu1 %v4487_v32  ;;  %1740 = vmatpush.msra.mxu0 %v2972_v27  ;;  %v1074_v29 = vld [vmem:[#allocation2 + $0xb8] sm:$0xfe] }
  0xe4   : > { %1365 = vmatmul.f32.gmra.mxu2 %v4490_v41  ;;  %1394 = vmatmul.f32.gmra.mxu3 %v4502_v26  ;;  %v4594_v3 = vsel %vm1144_vm0, %v1187_v14, %v1188_v56  ;;  %v2993_v14 = vld [vmem:[%s5633_s3 + $0xbb8] sm:$0xff]  ;;  %v3008_v56 = vld [vmem:[%s5633_s3 + $0x330] sm:$0xff] }
  0xe5   : > { %1510 = vmatmul.f32.gmra.mxu0 %v4365_v45  ;;  %2077 = vmatpush.msra.mxu2 %v3011_v33 }
  0xe6   : > { %v662_v4 = vpop.f32.mrf.mxu2  ;;  %1741 = vmatpush.msra.mxu0 %v2971_v49  ;;  %1774 = vmatpush.msra.mxu1 %v2995_v55  ;;  %v3048_v49 = vld [vmem:[%s5633_s3 + $0x470] sm:$0xff] }
  0xe7   : > { %v4526_v42 = vadd.f32 %v662_v4, %v622_v16  ;;  %v748_v6 = vpop.f32.mrf.mxu3  ;;  %v607_v16 = vadd.f32 %v4272_v51, %v4266_v47  ;;  %v3010_v4 = vld [vmem:[%s5633_s3 + $0x340] sm:$0xff] }
  0xe8   : > { %v4530_v9 = vadd.f32 %v789_v24, %v748_v6  ;;  %v624_v15 = vpop.f32.mrf.mxu1  ;;  %v2955_v24 = vld [vmem:[%s5633_s3 + $0xa88] sm:$0xff]  ;;  %v1068_v6 = vld [vmem:[#allocation2 + $0x118] sm:$0xfe]  ;;  %2078 = vmatpush.msra.mxu2 %v3010_v4  ;;  %v2970_v47 = vld [vmem:[%s5633_s3 + $0xb00] sm:$0xff] }
  0xe9   : > { %v792_v62 = vpop.f32.mrf.mxu0  ;;  %v625_v12 = vadd.f32 %v624_v15, %v4396_v35  ;;  %1700 = vmatpush.msra.mxu3 %v2955_v24  ;;  %v2954_v35 = vld [vmem:[%s5633_s3 + $0xa80] sm:$0xff]  ;;  %v3009_v15 = vld [vmem:[%s5633_s3 + $0x338] sm:$0xff]  ;;  %v1196_v57 = vrot.slane %v1068_v6, 1  ;;  %1742 = vmatpush.msra.mxu0 %v2970_v47  ;;  %v1080_v4 = vld [vmem:[#allocation2 + $0x1a8] sm:$0xfe] }
  0xea   : > { %2079 = vmatpush.msra.mxu2 %v3009_v15  ;;  %v400_v6 = vld [vmem:[%s3455_s30 + $0x88] sm:$0x3] }
  0xeb   : > { %1327 = vmatmul.f32.gmra.mxu1 %v4533_v10  ;;  %1701 = vmatpush.msra.mxu3 %v2954_v35  ;;  %v3031_v35 = vld [vmem:[%s5633_s3 + $0x3e8] sm:$0xff]  ;;  %420 = vst [vmem:[#allocation2 + $0x20] sm:$0x3] %v400_v6  ;;  %v2988_v6 = vld [vmem:[%s5633_s3 + $0xb90] sm:$0xff] }
  0xec   : > { %1368 = vmatmul.f32.gmra.mxu2 %v4536_v11  ;;  %1397 = vmatmul.f32.gmra.mxu3 %v4548_v19 }
  0xed   : > { %1513 = vmatmul.f32.gmra.mxu0 %v4404_v52  ;;  %2112 = vmatpush.msrb.mxu3 %v3033_v7 }
  0xee   : > { %v665_v60 = vpop.f32.mrf.mxu2  ;;  %2080 = vmatpush.msra.mxu2 %v3008_v56  ;;  %2153 = vmatpush.msrb.mxu0 %v3049_v44  ;;  %v3046_v56 = vld [vmem:[%s5633_s3 + $0x460] sm:$0xff] }
  0xef   : > { %v4576_v39 = vadd.f32 %v665_v60, %v625_v12  ;;  %v751_v36 = vpop.f32.mrf.mxu3  ;;  %v1077_v12 = vld [vmem:[#allocation2 + $0x150] sm:$0x1]  ;;  %v3007_v60 = vld [vmem:[%s5633_s3 + $0x328] sm:$0xff]  ;;  %2113 = vmatpush.msrb.mxu3 %v3032_v43 }
  0xf0   : > { %v4579_v50 = vadd.f32 %v792_v62, %v751_v36  ;;  %v824_v0 = vpop.f32.mrf.mxu1  ;;  %v651_v36 = vadd.f32 %v4357_v18, %v610_v63  ;;  %2081 = vmatpush.msra.mxu2 %v3007_v60  ;;  %v613_v18 = vadd.f32 %v4362_v40, %v4360_v20  ;;  %2154 = vmatpush.msrb.mxu0 %v3048_v49  ;;  %v1087_v20 = vld [vmem:[#allocation2 + $0xe8] sm:$0x1]  ;;  %v2990_v63 = vld [vmem:[%s5633_s3 + $0xba0] sm:$0xff] }
  0xf1   : > { %v795_v25 = vpop.f32.mrf.mxu0  ;;  %v825_v1 = vadd.f32 %v824_v0, %v4441_v28  ;;  %v2994_v28 = vld [vmem:[%s5633_s3 + $0xbc0] sm:$0xff]  ;;  %v1206_v0 = vrot.slane %v1077_v12, 1  ;;  %2114 = vmatpush.msrb.mxu3 %v3031_v35  ;;  %v2991_v40 = vld [vmem:[%s5633_s3 + $0xba8] sm:$0xff] }
  0xf2   : > { %1775 = vmatpush.msra.mxu1 %v2994_v28  ;;  %v670_v47 = vadd.f32 %v4556_v5, %v651_v36 }
  0xf3   : > { %v4602_v51 = vadd.f32 %v825_v1, %v668_v46  ;;  %1545 = vmatmul.f32.vlgmr.msrb.gmra.mxu1 %v4278_v2  ;;  %v648_v2 = vadd.f32 %v4307_v38, %v607_v16  ;;  %v1205_v46 = vrot.slane %v1074_v29, 1 }
  0xf4   : > { %1586 = vmatmul.f32.vlgmr.msrb.gmra.mxu2 %v4459_v34  ;;  %1400 = vmatmul.f32.gmra.mxu3 %v4594_v3  ;;  %v1197_v34 = vrot.slane %v1071_v8, 1  ;;  %v440_v8 = vld [vmem:[%s3491_s8 + $0x88] sm:$0x3] }
  0xf5   : > { %1516 = vmatmul.f32.gmra.mxu0 %v4444_v30  ;;  %v669_v22 = vadd.f32 %v4556_v5, %v648_v2  ;;  %1776 = vmatpush.msra.mxu1 %v2993_v14  ;;  %v4671_v7 = vsel %vm1144_vm0, %v1205_v46, %v1206_v0  ;;  %v1083_v2 = vld [vmem:[#allocation2 + $0x1b0] sm:$0x1]  ;;  %460 = vst [vmem:[#allocation2 + $0x90] sm:$0x3] %v440_v8  ;;  %v1428_v14 = vrot.slane %v1087_v20, 1  ;;  %v3003_v8 = vld [vmem:[%s5633_s3 + $0x308] sm:$0xff] }
  0xf6   : > { %v4618_v61 = vpop.f32.mrf.mxu2  ;;  %v4627_v27 = vsel %vm1144_vm0, %v1196_v57, %v1197_v34  ;;  %v1084_v57 = vld [vmem:[#allocation2 + $0xc8] sm:$0xfe]  ;;  %v3006_v34 = vld [vmem:[%s5633_s3 + $0x320] sm:$0xff]  ;;  %v1215_v29 = vrot.slane %v1083_v2, 1 }
  0xf7   : > { %v754_v62 = vpop.f32.mrf.mxu3  ;;  %v1427_v12 = vrot.slane %v1084_v57, 1  ;;  %2082 = vmatpush.msra.mxu2 %v3006_v34  ;;  %v672_v34 = vadd.f32 %v4556_v5, %v4439_v23  ;;  %v3043_v23 = vld [vmem:[%s5633_s3 + $0x448] sm:$0xff] }
  0xf8   : > { %v4620_v54 = vadd.f32 %v795_v25, %v754_v62  ;;  %v827_v58 = vpop.f32.mrf.mxu1 }
  0xf9   : > { %v798_v24 = vpop.f32.mrf.mxu0  ;;  %v828_v38 = vadd.f32 %v827_v58, %v4484_v59  ;;  %v2992_v59 = vld [vmem:[%s5633_s3 + $0xbb0] sm:$0xff]  ;;  %v3047_v58 = vld [vmem:[%s5633_s3 + $0x468] sm:$0xff]  ;;  %v4714_v49 = vsel %vm1144_vm0, %v1427_v12, %v1428_v14  ;;  %v3042_v12 = vld [vmem:[%s5633_s3 + $0x440] sm:$0xff] }
  0xfa   : > { %1777 = vmatpush.msra.mxu1 %v2992_v59  ;;  %2155 = vmatpush.msrb.mxu0 %v3047_v58 }
  0xfb   : > { %v4635_v33 = vadd.f32 %v828_v38, %v669_v22  ;;  %1548 = vmatmul.f32.gmra.mxu1 %v4323_v31  ;;  %v654_v22 = vadd.f32 %v4401_v37, %v613_v18  ;;  %v1214_v38 = vrot.slane %v1080_v4, 1  ;;  %v3029_v37 = vld [vmem:[%s5633_s3 + $0x3d8] sm:$0xff]  ;;  %v3004_v18 = vld [vmem:[%s5633_s3 + $0x310] sm:$0xff] }
  0xfc   : > { %1589 = vmatmul.f32.gmra.mxu2 %v4502_v26  ;;  %1403 = vmatmul.f32.gmra.mxu3 %v4627_v27  ;;  %v3045_v4 = vld [vmem:[%s5633_s3 + $0x458] sm:$0xff] }
  0xfd   : > { %1519 = vmatmul.f32.gmra.mxu0 %v4487_v32  ;;  %1778 = vmatpush.msra.mxu1 %v2991_v40  ;;  %v671_v36 = vadd.f32 %v4556_v5, %v654_v22  ;;  %v4711_v35 = vsel %vm1144_vm0, %v1214_v38, %v1215_v29  ;;  %v2987_v40 = vld [vmem:[%s5633_s3 + $0xb88] sm:$0xff]  ;;  %v3002_v22 = vld [vmem:[%s5633_s3 + $0x300] sm:$0xff]  ;;  %v3025_v38 = vld [vmem:[%s5633_s3 + $0x3b8] sm:$0xff] }
  0xfe   : > { %v4660_v55 = vpop.f32.mrf.mxu2  ;;  %2156 = vmatpush.msrb.mxu0 %v3046_v56  ;;  %v3081_v29 = vld [vmem:[%s5633_s3 + $0x878] sm:$0xff]  ;;  %v673_v56 = vadd.f32 %v4556_v5, %v4482_v13 }
  0xff   : > { %v757_v16 = vpop.f32.mrf.mxu3  ;;  %1779 = vmatpush.msra.mxu1 %v2990_v63  ;;  %v3026_v63 = vld [vmem:[%s5633_s3 + $0x3c0] sm:$0xff]  ;;  %v3065_v13 = vld [vmem:[%s5633_s3 + $0x7f8] sm:$0xff] }
 0x100   : > { %v4664_v25 = vadd.f32 %v798_v24, %v757_v16  ;;  %v830_v1 = vpop.f32.mrf.mxu1  ;;  %v3005_v24 = vld [vmem:[%s5633_s3 + $0x318] sm:$0xff]  ;;  %2157 = vmatpush.msrb.mxu0 %v3045_v4 }
 0x101   : > { %v831_v15 = vadd.f32 %v830_v1, %v4530_v9  ;;  %v3030_v9 = vld [vmem:[%s5633_s3 + $0x3e0] sm:$0xff]  ;;  %2083 = vmatpush.msra.mxu2 %v3005_v24  ;;  %v2989_v16 = vld [vmem:[%s5633_s3 + $0xb98] sm:$0xff] }
 0x102   : > { %v801_v28 = vpop.f32.mrf.mxu0  ;;  %2115 = vmatpush.msrb.mxu3 %v3030_v9  ;;  %1780 = vmatpush.msra.mxu1 %v2989_v16 }
 0x103   : > { %v4679_v62 = vadd.f32 %v831_v15, %v670_v47  ;;  %1551 = vmatmul.f32.gmra.mxu1 %v4368_v21  ;;  %2084 = vmatpush.msra.mxu2 %v3004_v18  ;;  %v3027_v47 = vld [vmem:[%s5633_s3 + $0x3c8] sm:$0xff]  ;;  %v3040_v18 = vld [vmem:[%s5633_s3 + $0x430] sm:$0xff] }
 0x104   : > { %1592 = vmatmul.f32.gmra.mxu2 %v4548_v19  ;;  %1406 = vmatmul.f32.gmra.mxu3 %v4671_v7 }
 0x105   : > { %1522 = vmatmul.f32.gmra.mxu0 %v4533_v10  ;;  %2116 = vmatpush.msrb.mxu3 %v3029_v37 }
 0x106   : > { %1781 = vmatpush.msra.mxu1 %v2988_v6  ;;  %2085 = vmatpush.msra.mxu2 %v3003_v8  ;;  %v1085_v8 = vld [vmem:[#allocation2 + $0xc0] sm:$0xfe] }
 0x107   : > { %v4704_v43 = vpop.f32.mrf.mxu2  ;;  %v760_v44 = vpop.f32.mrf.mxu3 }
 0x108   : > { %v4706_v59 = vadd.f32 %v801_v28, %v760_v44  ;;  %v833_v60 = vpop.f32.mrf.mxu1  ;;  %v3044_v28 = vld [vmem:[%s5633_s3 + $0x450] sm:$0xff]  ;;  %1782 = vmatpush.msra.mxu1 %v2987_v40  ;;  %2086 = vmatpush.msra.mxu2 %v3002_v22  ;;  %v674_v40 = vadd.f32 %v4556_v5, %v4526_v42  ;;  %v402_v22 = vld [vmem:[%s3455_s30 + $0x98] sm:$0x3]  ;;  %v1430_v42 = vrot.slane %v1085_v8, 1 }
 0x109   : > { %v834_v0 = vadd.f32 %v833_v60, %v4579_v50  ;;  %v3028_v50 = vld [vmem:[%s5633_s3 + $0x3d0] sm:$0xff]  ;;  %2158 = vmatpush.msrb.mxu0 %v3044_v28  ;;  %v1088_v28 = vld [vmem:[#allocation2 + $0x20] sm:$0x1]  ;;  %422 = vst [vmem:[#allocation2 + $0x130] sm:$0x3] %v402_v22 }
 0x10a   : > { %v804_v46 = vpop.f32.mrf.mxu0  ;;  %2117 = vmatpush.msrb.mxu3 %v3028_v50  ;;  %2310 = vmatpush.msrb.mxu2 %v3081_v29  ;;  %v1431_v29 = vrot.slane %v1088_v28, 1  ;;  %v3036_v28 = vld [vmem:[%s5633_s3 + $0x410] sm:$0xff] }
 0x10b   : > { %v4722_v1 = vadd.f32 %v834_v0, %v671_v36  ;;  %1554 = vmatmul.f32.gmra.mxu1 %v4407_v53  ;;  %2159 = vmatpush.msrb.mxu0 %v3043_v23  ;;  %v3041_v0 = vld [vmem:[%s5633_s3 + $0x438] sm:$0xff]  ;;  %v3039_v23 = vld [vmem:[%s5633_s3 + $0x428] sm:$0xff] }
 0x10c   : > { %1595 = vmatmul.f32.gmra.mxu2 %v4594_v3  ;;  %1409 = vmatmul.f32.gmra.mxu3 %v4711_v35 }
 0x10d   : > { %1525 = vmatmul.f32.gmra.mxu0 %v4714_v49  ;;  %2118 = vmatpush.msrb.mxu3 %v3027_v47 }
 0x10e   : > { %2160 = vmatpush.msrb.mxu0 %v3042_v12 }
 0x10f   : > { %v4746_v15 = vpop.f32.mrf.mxu2  ;;  %v763_v2 = vpop.f32.mrf.mxu3  ;;  %2119 = vmatpush.msrb.mxu3 %v3026_v63 }
 0x110   : > { %v4748_v57 = vadd.f32 %v804_v46, %v763_v2  ;;  %v836_v20 = vpop.f32.mrf.mxu1  ;;  %v3024_v46 = vld [vmem:[%s5633_s3 + $0x3b0] sm:$0xff]  ;;  %2161 = vmatpush.msrb.mxu0 %v3041_v0 }
 0x111   : > { %v837_v9 = vadd.f32 %v836_v20, %v4620_v54  ;;  %v2986_v54 = vld [vmem:[%s5633_s3 + $0xb80] sm:$0xff]  ;;  %2120 = vmatpush.msrb.mxu3 %v3025_v38  ;;  %v1086_v2 = vld [vmem:[#allocation2 + $0x70] sm:$0xfe]  ;;  %v362_v20 = vld [vmem:[%s3431_s28 + $0x98] sm:$0x3] }
 0x112   : > { %v1004_v58 = vpop.f32.mrf.mxu0  ;;  %1783 = vmatpush.msra.mxu1 %v2986_v54  ;;  %2162 = vmatpush.msrb.mxu0 %v3040_v18  ;;  %382 = vst [vmem:[#allocation2 + $0x10] sm:$0x3] %v362_v20  ;;  %v3078_v38 = vld [vmem:[%s5633_s3 + $0x860] sm:$0xff]  ;;  %v1433_v12 = vrot.slane %v1086_v2, 1  ;;  %v1817_v18 = vld [vmem:[#allocation2 + $0x38] sm:$0xfc] }
 0x113   : > { %v4762_v24 = vadd.f32 %v837_v9, %v672_v34  ;;  %1557 = vmatmul.f32.gmra.mxu1 %v4447_v17  ;;  %2121 = vmatpush.msrb.mxu3 %v3024_v46  ;;  %v4867_v46 = vsel %vm1144_vm0, %v1430_v42, %v1431_v29  ;;  %v3018_v42 = vld [vmem:[%s5633_s3 + $0x380] sm:$0xff] }
 0x114   : > { %1598 = vmatmul.f32.gmra.mxu2 %v4627_v27  ;;  %1702 = vmatmul.f32.vlgmr.msra.gmra.mxu3 %v4320_v48 }
 0x115   : > { %1743 = vmatmul.f32.vlgmr.msra.gmra.mxu0 %v4323_v31  ;;  %2269 = vmatpush.msrb.mxu1 %v3065_v13  ;;  %v675_v13 = vadd.f32 %v4556_v5, %v4576_v39  ;;  %v3061_v5 = vld [vmem:[%s5633_s3 + $0x7d8] sm:$0xff]  ;;  %v3076_v39 = vld [vmem:[%s5633_s3 + $0x850] sm:$0xff] }
 0x116   : > { %2163 = vmatpush.msrb.mxu0 %v3039_v23 }
 0x117   : > { %v4783_v14 = vpop.f32.mrf.mxu2  ;;  %v963_v48 = vpop.f32.mrf.mxu3 }
 0x118   : > { %v964_v31 = vadd.f32 %v963_v48, %v4618_v61  ;;  %v839_v37 = vpop.f32.mrf.mxu1  ;;  %v3080_v61 = vld [vmem:[%s5633_s3 + $0x870] sm:$0xff] }
 0x119   : > { %v840_v44 = vadd.f32 %v839_v37, %v4664_v25  ;;  %v3023_v25 = vld [vmem:[%s5633_s3 + $0x3a8] sm:$0xff]  ;;  %2311 = vmatpush.msrb.mxu2 %v3080_v61  ;;  %v3038_v37 = vld [vmem:[%s5633_s3 + $0x420] sm:$0xff] }
 0x11a   : > { %v1007_v60 = vpop.f32.mrf.mxu0  ;;  %v1005_v36 = vadd.f32 %v1004_v58, %v964_v31  ;;  %2122 = vmatpush.msrb.mxu3 %v3023_v25  ;;  %v1089_v58 = vld [vmem:[#allocation2 + $0x90] sm:$0x1]  ;;  %v3021_v31 = vld [vmem:[%s5633_s3 + $0x398] sm:$0xff]  ;;  %2164 = vmatpush.msrb.mxu0 %v3038_v37 }
 0x11b   : > { %v4795_v16 = vadd.f32 %v840_v44, %v673_v56  ;;  %1560 = vmatmul.f32.gmra.mxu1 %v4490_v41  ;;  %v1434_v48 = vrot.slane %v1089_v58, 1  ;;  %v3035_v58 = vld [vmem:[%s5633_s3 + $0x408] sm:$0xff] }
 0x11c   : > { %1601 = vmatmul.f32.gmra.mxu2 %v4671_v7  ;;  %1705 = vmatmul.f32.gmra.mxu3 %v4365_v45  ;;  %v4814_v50 = vadd.f32 %v1005_v36, %v4602_v51  ;;  %v3064_v45 = vld [vmem:[%s5633_s3 + $0x7f0] sm:$0xff] }
 0x11d   : > { %1746 = vmatmul.f32.gmra.mxu0 %v4368_v21  ;;  %v3079_v21 = vld [vmem:[%s5633_s3 + $0x868] sm:$0xff]  ;;  %2270 = vmatpush.msrb.mxu1 %v3064_v45  ;;  %v4870_v0 = vsel %vm1144_vm0, %v1433_v12, %v1434_v48  ;;  %v1820_v45 = vld [vmem:[#allocation2 + $0x160] sm:$0x3] }
 0x11e   : > { %2312 = vmatpush.msrb.mxu2 %v3079_v21  ;;  %v3058_v48 = vld [vmem:[%s5633_s3 + $0x7c0] sm:$0xff] }
 0x11f   : > { %v4822_v4 = vpop.f32.mrf.mxu2  ;;  %v966_v6 = vpop.f32.mrf.mxu3 }
 0x120   : > { %v967_v51 = vadd.f32 %v966_v6, %v4660_v55  ;;  %v842_v47 = vpop.f32.mrf.mxu1  ;;  %v3022_v55 = vld [vmem:[%s5633_s3 + $0x3a0] sm:$0xff]  ;;  %2313 = vmatpush.msrb.mxu2 %v3078_v38  ;;  %v3037_v6 = vld [vmem:[%s5633_s3 + $0x418] sm:$0xff] }
 0x121   : > { %v843_v34 = vadd.f32 %v842_v47, %v4706_v59  ;;  %v3063_v59 = vld [vmem:[%s5633_s3 + $0x7e8] sm:$0xff]  ;;  %2123 = vmatpush.msrb.mxu3 %v3022_v55  ;;  %2165 = vmatpush.msrb.mxu0 %v3037_v6  ;;  %v3034_v38 = vld [vmem:[%s5633_s3 + $0x400] sm:$0xff] }
 0x122   : > { %v1010_v9 = vpop.f32.mrf.mxu0  ;;  %v1008_v63 = vadd.f32 %v1007_v60, %v967_v51  ;;  %2271 = vmatpush.msrb.mxu1 %v3063_v59  ;;  %v1927_v51 = vrot.slane %v1820_v45, 2  ;;  %v3019_v47 = vld [vmem:[%s5633_s3 + $0x388] sm:$0xff]  ;;  %v3074_v59 = vld [vmem:[%s5633_s3 + $0x840] sm:$0xff]  ;;  %v3113_v45 = vld [vmem:[%s5633_s3 + $0xc78] sm:$0xff] }
 0x123   : > { %v4836_v54 = vadd.f32 %v843_v34, %v674_v40  ;;  %1563 = vmatmul.f32.gmra.mxu1 %v4536_v11  ;;  %2124 = vmatpush.msrb.mxu3 %v3021_v31  ;;  %v1826_v55 = vld [vmem:[#allocation2 + $0x48] sm:$0x3] }
 0x124   : > { %1604 = vmatmul.f32.gmra.mxu2 %v4711_v35  ;;  %1708 = vmatmul.f32.gmra.mxu3 %v4404_v52  ;;  %v4855_v56 = vadd.f32 %v1008_v63, %v4635_v33  ;;  %v3062_v52 = vld [vmem:[%s5633_s3 + $0x7e0] sm:$0xff]  ;;  %v1823_v63 = vld [vmem:[#allocation2 + $0xb0] sm:$0xfc]  ;;  %v1936_v12 = vrot.slane %v1826_v55, 2  ;;  %v3071_v6 = vld [vmem:[%s5633_s3 + $0x828] sm:$0xff] }
 0x125   : > { %1749 = vmatmul.f32.gmra.mxu0 %v4407_v53  ;;  %v3077_v53 = vld [vmem:[%s5633_s3 + $0x858] sm:$0xff]  ;;  %2272 = vmatpush.msrb.mxu1 %v3062_v52  ;;  %v1935_v29 = vrot.slane %v1823_v63, 2  ;;  %v3055_v63 = vld [vmem:[%s5633_s3 + $0x7a8] sm:$0xff] }
 0x126   : > { %2314 = vmatpush.msrb.mxu2 %v3077_v53  ;;  %2166 = vmatpush.msrb.mxu0 %v3036_v28 }
 0x127   : > { %v4863_v44 = vpop.f32.mrf.mxu2  ;;  %v969_v60 = vpop.f32.mrf.mxu3  ;;  %2273 = vmatpush.msrb.mxu1 %v3061_v5 }
 0x128   : > { %v970_v33 = vadd.f32 %v969_v60, %v4704_v43  ;;  %v845_v36 = vpop.f32.mrf.mxu1  ;;  %v3020_v43 = vld [vmem:[%s5633_s3 + $0x390] sm:$0xff]  ;;  %2315 = vmatpush.msrb.mxu2 %v3076_v39  ;;  %2167 = vmatpush.msrb.mxu0 %v3035_v58 }
 0x129   : > { %v846_v61 = vadd.f32 %v845_v36, %v4748_v57  ;;  %v1926_v57 = vrot.slane %v1817_v18, 2  ;;  %2125 = vmatpush.msrb.mxu3 %v3020_v43  ;;  %v1829_v36 = vld [vmem:[#allocation2 + $0xf0] sm:$0xfc] }
 0x12a   : > { %v1013_v25 = vpop.f32.mrf.mxu0  ;;  %v1011_v21 = vadd.f32 %v1010_v9, %v970_v33  ;;  %2168 = vmatpush.msrb.mxu0 %v3034_v38  ;;  %v3072_v18 = vld [vmem:[%s5633_s3 + $0x830] sm:$0xff] }
 0x12b   : > { %v4881_v8 = vadd.f32 %v846_v61, %v675_v13  ;;  %1566 = vmatmul.f32.gmra.mxu1 %v4867_v46  ;;  %2126 = vmatpush.msrb.mxu3 %v3019_v47  ;;  %v1928_v9 = vsel %vm1925_vm1, %v1926_v57, %v1927_v51  ;;  %v1832_v13 = vld [vmem:[#allocation2 + $0x88] sm:$0x3] }
 0x12c   : > { %1607 = vmatmul.f32.gmra.mxu2 %v4870_v0  ;;  %1711 = vmatmul.f32.gmra.mxu3 %v4444_v30  ;;  %v4900_v2 = vadd.f32 %v1011_v21, %v4679_v62  ;;  %v3060_v30 = vld [vmem:[%s5633_s3 + $0x7d0] sm:$0xff]  ;;  %v1944_v21 = vrot.slane %v1829_v36, 2  ;;  %v1945_v43 = vrot.slane %v1832_v13, 2  ;;  %v1844_v13 = vld [vmem:[#allocation2 + $0x158] sm:$0x3] }
 0x12d   : > { %1752 = vmatmul.f32.gmra.mxu0 %v4447_v17  ;;  %v3075_v17 = vld [vmem:[%s5633_s3 + $0x848] sm:$0xff]  ;;  %2274 = vmatpush.msrb.mxu1 %v3060_v30  ;;  %v1090_v30 = vld [vmem:[#allocation2 + $0x1d0] sm:$0xfe] }
 0x12e   : > { %2316 = vmatpush.msrb.mxu2 %v3075_v17  ;;  %2127 = vmatpush.msrb.mxu3 %v3018_v42  ;;  %v4983_v28 = vsel %vm1925_vm1, %v1944_v21, %v1945_v43  ;;  %v1093_v17 = vld [vmem:[#allocation2 + $0x10] sm:$0x1]  ;;  %v1625_v55 = vrot.slane %v1090_v30, 1  ;;  %v3111_v42 = vld [vmem:[%s5633_s3 + $0xc68] sm:$0xff]  ;;  %v1841_v36 = vld [vmem:[#allocation2 + $0xd0] sm:$0xfc] }
 0x12f   : > { %v4908_v20 = vpop.f32.mrf.mxu2  ;;  %v972_v40 = vpop.f32.mrf.mxu3  ;;  %2467 = vmatpush.msra.mxu0 %v3113_v45  ;;  %v1821_v45 = vld [vmem:[#allocation2 + $0x148] sm:$0x3]  ;;  %v1819_v21 = vld [vmem:[#allocation2 + $0x50] sm:$0xfc] }
 0x130   : > { %v973_v62 = vadd.f32 %v972_v40, %v4746_v15  ;;  %v1307_v34 = vpop.f32.mrf.mxu1  ;;  %v3059_v15 = vld [vmem:[%s5633_s3 + $0x7c8] sm:$0xff]  ;;  %2317 = vmatpush.msrb.mxu2 %v3074_v59 }
 0x131   : > { %2275 = vmatpush.msrb.mxu1 %v3059_v15  ;;  %v1626_v15 = vrot.slane %v1093_v17, 1  ;;  %v1930_v17 = vrot.slane %v1821_v45, 2  ;;  %v3106_v45 = vld [vmem:[%s5633_s3 + $0xc40] sm:$0xff] }
 0x132   : > { %v1016_v22 = vpop.f32.mrf.mxu0  ;;  %v1014_v23 = vadd.f32 %v1013_v25, %v973_v62  ;;  %v3057_v25 = vld [vmem:[%s5633_s3 + $0x7b8] sm:$0xff]  ;;  %v1091_v62 = vld [vmem:[#allocation2 + $0x100] sm:$0xfe] }
 0x133   : > { %1784 = vmatmul.f32.vlgmr.msra.gmra.mxu1 %v4502_v26  ;;  %v3097_v26 = vld [vmem:[%s5633_s3 + $0x8f8] sm:$0xff] }
 0x134   : > { %2087 = vmatmul.f32.vlgmr.msra.gmra.mxu2 %v1928_v9  ;;  %1714 = vmatmul.f32.gmra.mxu3 %v4487_v32  ;;  %v4937_v31 = vadd.f32 %v1014_v23, %v4722_v1  ;;  %v3073_v32 = vld [vmem:[%s5633_s3 + $0x838] sm:$0xff]  ;;  %v4946_v1 = vsel %vm1925_vm1, %v1935_v29, %v1936_v12  ;;  %v3094_v23 = vld [vmem:[%s5633_s3 + $0x8e0] sm:$0xff] }
 0x135   : > { %1755 = vmatmul.f32.gmra.mxu0 %v4490_v41  ;;  %2276 = vmatpush.msrb.mxu1 %v3058_v48  ;;  %v1838_v9 = vld [vmem:[#allocation2 + $0xd8] sm:$0x3]  ;;  %v1628_v48 = vrot.slane %v1091_v62, 1 }
 0x136   : > { %2351 = vmatpush.msra.mxu3 %v3097_v26  ;;  %2318 = vmatpush.msrb.mxu2 %v3073_v32  ;;  %v1954_v38 = vrot.slane %v1838_v9, 2  ;;  %v3069_v29 = vld [vmem:[%s5633_s3 + $0x818] sm:$0xff]  ;;  %v3108_v9 = vld [vmem:[%s5633_s3 + $0xc50] sm:$0xff] }
 0x137   : > { %v1348_v41 = vpop.f32.mrf.mxu2  ;;  %v975_v37 = vpop.f32.mrf.mxu3  ;;  %2277 = vmatpush.msrb.mxu1 %v3057_v25  ;;  %v442_v32 = vld [vmem:[%s3491_s8 + $0x98] sm:$0x3]  ;;  %v1627_v25 = vsel %vm1144_vm0, %v1625_v55, %v1626_v15  ;;  %v3051_v15 = vld [vmem:[%s5633_s3 + $0x788] sm:$0xff]  ;;  %s340_s8 = sadd.s32 %s2760_s10, %s2759_s11 }
 0x138   : > { %v4942_v52 = vadd.f32 %v1348_v41, %v1307_v34  ;;  %v976_v53 = vadd.f32 %v975_v37, %v4783_v14  ;;  %v1310_v60 = vpop.f32.mrf.mxu1  ;;  %v3096_v14 = vld [vmem:[%s5633_s3 + $0x8f0] sm:$0xff]  ;;  %2319 = vmatpush.msrb.mxu2 %v3072_v18  ;;  %v1835_v34 = vld [vmem:[#allocation2 + $0x1b8] sm:$0xfc]  ;;  %462 = vst [vmem:[#allocation2 + $0x190] sm:$0x3] %v442_v32  ;;  %v3090_v32 = vld [vmem:[%s5633_s3 + $0x8c0] sm:$0xff] }
 0x139   : > { %2352 = vmatpush.msra.mxu3 %v3096_v14  ;;  %v1953_v59 = vrot.slane %v1835_v34, 2  ;;  %v1818_v14 = vld [vmem:[#allocation2 + $0x180] sm:$0xfc]  ;;  %v3091_v34 = vld [vmem:[%s5633_s3 + $0x8c8] sm:$0xff]  ;;  %s2761_s7 = sshll.u32 %s340_s8, 3 }
 0x13a   : > { %v1019_v33 = vpop.f32.mrf.mxu0  ;;  %v1017_v61 = vadd.f32 %v1016_v22, %v976_v53  ;;  %2320 = vmatpush.msrb.mxu2 %v3071_v6  ;;  %v1094_v22 = vld [vmem:[#allocation2 + $0x130] sm:$0x1]  ;;  %v1929_v30 = vrot.slane %v1818_v14, 2  ;;  %s5594_s25 = scalar_lea.vmem %s5635_s5, %s2761_s7 }
 0x13b   : > { %1787 = vmatmul.f32.gmra.mxu1 %v4548_v19  ;;  %v3056_v19 = vld [vmem:[%s5633_s3 + $0x7b0] sm:$0xff]  ;;  %v1629_v26 = vrot.slane %v1094_v22, 1 }
 0x13c   : > { %2090 = vmatmul.f32.gmra.mxu2 %v4946_v1  ;;  %1717 = vmatmul.f32.gmra.mxu3 %v4533_v10  ;;  %v4971_v5 = vadd.f32 %v1017_v61, %v4762_v24  ;;  %v3095_v10 = vld [vmem:[%s5633_s3 + $0x8e8] sm:$0xff]  ;;  %v3068_v6 = vld [vmem:[%s5633_s3 + $0x810] sm:$0xff] }
 0x13d   : > { %1758 = vmatmul.f32.gmra.mxu0 %v4536_v11  ;;  %v3112_v11 = vld [vmem:[%s5633_s3 + $0xc70] sm:$0xff]  ;;  %2278 = vmatpush.msrb.mxu1 %v3056_v19  ;;  %v1630_v18 = vsel %vm1144_vm0, %v1628_v48, %v1629_v26  ;;  %v1822_v19 = vld [vmem:[#allocation2] sm:$0x3]  ;;  %v1825_v48 = vld [vmem:[#allocation2 + $0xa8] sm:$0xfc] }
 0x13e   : > { %2353 = vmatpush.msra.mxu3 %v3095_v10  ;;  %2468 = vmatpush.msra.mxu0 %v3112_v11  ;;  %v3092_v10 = vld [vmem:[%s5633_s3 + $0x8d0] sm:$0xff]  ;;  %v3109_v11 = vld [vmem:[%s5633_s3 + $0xc58] sm:$0xff]  ;;  %v1933_v62 = vrot.slane %v1822_v19, 2 }
 0x13f   : > { %v1351_v39 = vpop.f32.mrf.mxu2  ;;  %v978_v57 = vpop.f32.mrf.mxu3  ;;  %2279 = vmatpush.msrb.mxu1 %v3055_v63 }
 0x140   : > { %v4979_v51 = vadd.f32 %v1351_v39, %v1310_v60  ;;  %v979_v24 = vadd.f32 %v978_v57, %v4822_v4  ;;  %v1313_v47 = vpop.f32.mrf.mxu1  ;;  %v3070_v4 = vld [vmem:[%s5633_s3 + $0x820] sm:$0xff]  ;;  %2354 = vmatpush.msra.mxu3 %v3094_v23  ;;  %2469 = vmatpush.msra.mxu0 %v3111_v42  ;;  %v1962_v39 = vrot.slane %v1841_v36, 2  ;;  %v1963_v57 = vrot.slane %v1844_v13, 2  ;;  %v1847_v23 = vld [vmem:[#allocation2 + $0x170] sm:$0xfc]  ;;  %v3089_v36 = vld [vmem:[%s5633_s3 + $0x8b8] sm:$0xff] }
 0x141   : > { %2321 = vmatpush.msrb.mxu2 %v3070_v4  ;;  %v1850_v42 = vld [vmem:[#allocation2 + $0x1c8] sm:$0x3] }
 0x142   : > { %v1022_v40 = vpop.f32.mrf.mxu0  ;;  %v1020_v58 = vadd.f32 %v1019_v33, %v979_v24  ;;  %v5021_v33 = vsel %vm1925_vm1, %v1953_v59, %v1954_v38  ;;  %v3052_v24 = vld [vmem:[%s5633_s3 + $0x790] sm:$0xff]  ;;  %v5058_v55 = vsel %vm1925_vm1, %v1962_v39, %v1963_v57  ;;  %v1931_v38 = vsel %vm1925_vm1, %v1929_v30, %v1930_v17  ;;  %v1833_v30 = vld [vmem:[#allocation2 + $0x58] sm:$0x3] }
 0x143   : > { %1790 = vmatmul.f32.gmra.mxu1 %v4594_v3  ;;  %v3054_v3 = vld [vmem:[%s5633_s3 + $0x7a0] sm:$0xff]  ;;  %2322 = vmatpush.msrb.mxu2 %v3069_v29  ;;  %v1824_v29 = vld [vmem:[#allocation2 + $0x178] sm:$0xfc]  ;;  %v1831_v17 = vld [vmem:[#allocation2 + $0x30] sm:$0xfc] }
 0x144   : > { %2093 = vmatmul.f32.gmra.mxu2 %v4983_v28  ;;  %1720 = vmatmul.f32.gmra.mxu3 %v4714_v49  ;;  %v5008_v12 = vadd.f32 %v1020_v58, %v4795_v16  ;;  %v3093_v49 = vld [vmem:[%s5633_s3 + $0x8d8] sm:$0xff] }
 0x145   : > { %1761 = vmatmul.f32.gmra.mxu0 %v4867_v46  ;;  %v3110_v46 = vld [vmem:[%s5633_s3 + $0xc60] sm:$0xff]  ;;  %2280 = vmatpush.msrb.mxu1 %v3054_v3 }
 0x146   : > { %2355 = vmatpush.msra.mxu3 %v3093_v49  ;;  %2470 = vmatpush.msra.mxu0 %v3110_v46  ;;  %v1828_v49 = vld [vmem:[#allocation2 + $0x60] sm:$0x3] }
 0x147   : > { %v1354_v41 = vpop.f32.mrf.mxu2  ;;  %v981_v37 = vpop.f32.mrf.mxu3  ;;  %2323 = vmatpush.msrb.mxu2 %v3068_v6  ;;  %v3066_v46 = vld [vmem:[%s5633_s3 + $0x800] sm:$0xff]  ;;  %v1942_v14 = vrot.slane %v1828_v49, 2 }
 0x148   : > { %v5017_v16 = vadd.f32 %v1354_v41, %v1313_v47  ;;  %v982_v53 = vadd.f32 %v981_v37, %v4863_v44  ;;  %v1316_v60 = vpop.f32.mrf.mxu1  ;;  %v3053_v44 = vld [vmem:[%s5633_s3 + $0x798] sm:$0xff]  ;;  %2356 = vmatpush.msra.mxu3 %v3092_v10  ;;  %2471 = vmatpush.msra.mxu0 %v3109_v11  ;;  %v3107_v41 = vld [vmem:[%s5633_s3 + $0xc48] sm:$0xff]  ;;  %v3050_v37 = vld [vmem:[%s5633_s3 + $0x780] sm:$0xff] }
 0x149   : > { %2281 = vmatpush.msrb.mxu1 %v3053_v44  ;;  %v1853_v10 = vld [vmem:[#allocation2 + $0x188] sm:$0xfc]  ;;  %v1856_v11 = vld [vmem:[#allocation2 + $0x40] sm:$0x3] }
 0x14a   : > { %v1025_v61 = vpop.f32.mrf.mxu0  ;;  %v1023_v43 = vadd.f32 %v1022_v40, %v982_v53  ;;  %v1932_v40 = vrot.slane %v1819_v21, 2  ;;  %2357 = vmatpush.msra.mxu3 %v3091_v34  ;;  %2472 = vmatpush.msra.mxu0 %v3108_v9  ;;  %v1971_v53 = vrot.slane %v1847_v23, 2  ;;  %v3105_v34 = vld [vmem:[%s5633_s3 + $0xc38] sm:$0xff]  ;;  %v1948_v23 = vrot.slane %v1833_v30, 2  ;;  %v3102_v30 = vld [vmem:[%s5633_s3 + $0xc20] sm:$0xff] }
 0x14b   : > { %1793 = vmatmul.f32.gmra.mxu1 %v4627_v27  ;;  %v3067_v27 = vld [vmem:[%s5633_s3 + $0x808] sm:$0xff]  ;;  %v5124_v9 = vld [vmem:[%s5633_s3 + $0xcf8] sm:$0xff] }
 0x14c   : > { %2096 = vmatmul.f32.gmra.mxu2 %v5021_v33  ;;  %1723 = vmatmul.f32.gmra.mxu3 %v1627_v25  ;;  %v5046_v47 = vadd.f32 %v1023_v43, %v4836_v54  ;;  %v1934_v3 = vsel %vm1925_vm1, %v1932_v40, %v1933_v62  ;;  %v1834_v40 = vld [vmem:[#allocation2 + $0x108] sm:$0x3]  ;;  %v3088_v62 = vld [vmem:[%s5633_s3 + $0x8b0] sm:$0xff] }
 0x14d   : > { %1764 = vmatmul.f32.gmra.mxu0 %v1630_v18  ;;  %2282 = vmatpush.msrb.mxu1 %v3052_v24  ;;  %v1941_v18 = vrot.slane %v1825_v48, 2 }
 0x14e   : > { %2324 = vmatpush.msrb.mxu2 %v3067_v27  ;;  %2358 = vmatpush.msra.mxu3 %v3090_v32  ;;  %v1830_v27 = vld [vmem:[#allocation2 + $0xf8] sm:$0xfc] }
 0x14f   : > { %v1357_v58 = vpop.f32.mrf.mxu2  ;;  %v984_v22 = vpop.f32.mrf.mxu3  ;;  %2283 = vmatpush.msrb.mxu1 %v3051_v15  ;;  %2473 = vmatpush.msra.mxu0 %v3107_v41  ;;  %v5108_v24 = vsel %vm1925_vm1, %v1941_v18, %v1942_v14  ;;  %v1951_v15 = vrot.slane %v1834_v40, 2  ;;  %v1859_v41 = vld [vmem:[#allocation2 + $0x140] sm:$0xfc]  ;;  %v1837_v18 = vld [vmem:[#allocation2 + $0x198] sm:$0xfc] }
 0x150   : > { %v5054_v54 = vadd.f32 %v1357_v58, %v1316_v60  ;;  %v985_v63 = vadd.f32 %v984_v22, %v4908_v20  ;;  %v1319_v4 = vpop.f32.mrf.mxu1  ;;  %v1827_v20 = vld [vmem:[#allocation2 + $0x78] sm:$0x3]  ;;  %v1972_v60 = vrot.slane %v1850_v42, 2  ;;  %2325 = vmatpush.msrb.mxu2 %v3066_v46  ;;  %2359 = vmatpush.msra.mxu3 %v3089_v36  ;;  %v1980_v58 = vrot.slane %v1853_v10, 2 }
 0x151   : > { %v1939_v25 = vrot.slane %v1827_v20, 2  ;;  %2284 = vmatpush.msrb.mxu1 %v3050_v37  ;;  %2474 = vmatpush.msra.mxu0 %v3106_v45  ;;  %v1981_v22 = vrot.slane %v1856_v11, 2  ;;  %v1950_v42 = vrot.slane %v1831_v17, 2  ;;  %v1862_v37 = vld [vmem:[#allocation2 + $0x120] sm:$0x3]  ;;  %v1989_v11 = vrot.slane %v1859_v41, 2 }
 0x152   : > { %v5063_v59 = vpop.f32.mrf.mxu0  ;;  %v1026_v26 = vadd.f32 %v1025_v61, %v985_v63  ;;  %v1938_v61 = vrot.slane %v1824_v29, 2  ;;  %v5100_v6 = vsel %vm1925_vm1, %v1971_v53, %v1972_v60  ;;  %v3104_v63 = vld [vmem:[%s5633_s3 + $0xc30] sm:$0xff]  ;;  %2360 = vmatpush.msra.mxu3 %v3088_v62  ;;  %v1836_v53 = vld [vmem:[#allocation2 + $0x1a0] sm:$0xfc]  ;;  %v1840_v45 = vld [vmem:[#allocation2 + $0x98] sm:$0x3] }
 0x153   : > { %1796 = vmatmul.f32.gmra.mxu1 %v4671_v7  ;;  %v5087_v7 = vld [vmem:[%s5633_s3 + $0xd78] sm:$0xff]  ;;  %2475 = vmatpush.msra.mxu0 %v3105_v34  ;;  %v5155_v32 = vsel %vm1925_vm1, %v1980_v58, %v1981_v22  ;;  %v1956_v17 = vrot.slane %v1836_v53, 2  ;;  %v1959_v62 = vrot.slane %v1837_v18, 2  ;;  %v1960_v34 = vrot.slane %v1840_v45, 2  ;;  %v5199_v58 = vld [vmem:[%s5633_s3 + $0xce0] sm:$0xff]  ;;  %v3083_v45 = vld [vmem:[%s5633_s3 + $0x888] sm:$0xff] }
 0x154   : > { %2099 = vmatmul.f32.gmra.mxu2 %v5058_v55  ;;  %2128 = vmatmul.f32.vlgmr.msrb.gmra.mxu3 %v1931_v38  ;;  %v5090_v13 = vadd.f32 %v1026_v26, %v4881_v8  ;;  %v5105_v57 = vsel %vm1925_vm1, %v1938_v61, %v1939_v25  ;;  %v5142_v38 = vld [vmem:[%s5633_s3 + $0xcf0] sm:$0xff]  ;;  %v1092_v26 = vld [vmem:[#allocation2 + $0x168] sm:$0xfe]  ;;  %v5165_v61 = vsel %vm1925_vm1, %v1950_v42, %v1951_v15  ;;  %v1839_v25 = vld [vmem:[#allocation2 + $0x1d8] sm:$0x3] }
 0x155   : > { %2169 = vmatmul.f32.vlgmr.msrb.gmra.mxu0 %v1934_v3  ;;  %2549 = vmatpush.msra.mxu2 %v5087_v7  ;;  %v5147_v3 = vld [vmem:[%s5633_s3 + $0xd68] sm:$0xff]  ;;  %v1957_v40 = vrot.slane %v1839_v25, 2  ;;  %v5204_v22 = vld [vmem:[%s5633_s3 + $0xd58] sm:$0xff]  ;;  %v1846_v53 = vld [vmem:[#allocation2 + $0x80] sm:$0x3] }
 0x156   : > { %3164 = vmatpush.msra.mxu1 %v5124_v9  ;;  %2476 = vmatpush.msra.mxu0 %v3104_v63  ;;  %v1843_v41 = vld [vmem:[#allocation2 + $0x138] sm:$0xfc] }
 0x157   : > { %v1360_v21 = vpop.f32.mrf.mxu2  ;;  %v1389_v19 = vpop.f32.mrf.mxu3  ;;  %v3101_v25 = vld [vmem:[%s5633_s3 + $0xc18] sm:$0xff] }
 0x158   : > { %v5095_v43 = vadd.f32 %v1360_v21, %v1319_v4  ;;  %v1390_v8 = vadd.f32 %v1389_v19, %v4942_v52  ;;  %v1322_v44 = vpop.f32.mrf.mxu1  ;;  %v1947_v4 = vrot.slane %v1830_v27, 2  ;;  %3165 = vmatpush.msra.mxu1 %v5142_v38  ;;  %v3086_v21 = vld [vmem:[%s5633_s3 + $0x8a0] sm:$0xff]  ;;  %v3103_v19 = vld [vmem:[%s5633_s3 + $0xc28] sm:$0xff]  ;;  %v3085_v27 = vld [vmem:[%s5633_s3 + $0x898] sm:$0xff] }
 0x159   : > { %2477 = vmatpush.msra.mxu0 %v3103_v19  ;;  %v5238_v18 = vld [vmem:[%s5633_s3 + $0xcd8] sm:$0xff] }
 0x15a   : > { %v5102_v39 = vpop.f32.mrf.mxu0  ;;  %v5111_v52 = vadd.f32 %v1390_v8, %v4814_v50  ;;  %v5129_v50 = vld [vmem:[%s5633_s3 + $0xd70] sm:$0xff]  ;;  %v5162_v36 = vsel %vm1925_vm1, %v1947_v4, %v1948_v23  ;;  %v5181_v8 = vld [vmem:[%s5633_s3 + $0xce8] sm:$0xff] }
 0x15b   : > { %1799 = vmatmul.f32.gmra.mxu1 %v4711_v35  ;;  %v3087_v35 = vld [vmem:[%s5633_s3 + $0x8a8] sm:$0xff]  ;;  %2550 = vmatpush.msra.mxu2 %v5129_v50 }
 0x15c   : > { %2102 = vmatmul.f32.gmra.mxu2 %v5100_v6  ;;  %2131 = vmatmul.f32.gmra.mxu3 %v5105_v57 }
 0x15d   : > { %2172 = vmatmul.f32.gmra.mxu0 %v5108_v24  ;;  %2361 = vmatpush.msra.mxu3 %v3087_v35 }
 0x15e   : > { %2551 = vmatpush.msra.mxu2 %v5147_v3  ;;  %3166 = vmatpush.msra.mxu1 %v5181_v8 }
 0x15f   : > { %v1363_v29 = vpop.f32.mrf.mxu2  ;;  %v1392_v48 = vpop.f32.mrf.mxu3  ;;  %2362 = vmatpush.msra.mxu3 %v3086_v21  ;;  %2478 = vmatpush.msra.mxu0 %v3102_v30  ;;  %v3100_v21 = vld [vmem:[%s5633_s3 + $0xc10] sm:$0xff] }
 0x160   : > { %v5151_v20 = vadd.f32 %v1363_v29, %v1322_v44  ;;  %v1393_v49 = vadd.f32 %v1392_v48, %v4979_v51  ;;  %v1325_v46 = vpop.f32.mrf.mxu1  ;;  %v1095_v51 = vld [vmem:[#allocation2 + $0x190] sm:$0x1]  ;;  %v1631_v44 = vrot.slane %v1092_v26, 1  ;;  %3167 = vmatpush.msra.mxu1 %v5199_v58  ;;  %v5220_v26 = vsel %vm1925_vm1, %v1956_v17, %v1957_v40 }
 0x161   : > { %v1632_v10 = vrot.slane %v1095_v51, 1  ;;  %2363 = vmatpush.msra.mxu3 %v3085_v27  ;;  %v3084_v51 = vld [vmem:[%s5633_s3 + $0x890] sm:$0xff]  ;;  %2479 = vmatpush.msra.mxu0 %v3101_v25  ;;  %v5261_v27 = vld [vmem:[%s5633_s3 + $0xd48] sm:$0xff]  ;;  %v5297_v25 = vld [vmem:[%s5633_s3 + $0xd40] sm:$0xff] }
 0x162   : > { %v5159_v60 = vpop.f32.mrf.mxu0  ;;  %v5168_v14 = vadd.f32 %v1393_v49, %v4855_v56  ;;  %v5186_v56 = vld [vmem:[%s5633_s3 + $0xd60] sm:$0xff]  ;;  %v5223_v49 = vsel %vm1925_vm1, %v1959_v62, %v1960_v34  ;;  %3168 = vmatpush.msra.mxu1 %v5238_v18 }
 0x163   : > { %1802 = vmatmul.f32.gmra.mxu1 %v4870_v0  ;;  %v1990_v0 = vrot.slane %v1862_v37, 2  ;;  %2552 = vmatpush.msra.mxu2 %v5186_v56  ;;  %v1633_v15 = vsel %vm1144_vm0, %v1631_v44, %v1632_v10  ;;  %v1968_v10 = vrot.slane %v1843_v41, 2  ;;  %v1852_v41 = vld [vmem:[#allocation2 + $0xe0] sm:$0x3] }
 0x164   : > { %2105 = vmatmul.f32.gmra.mxu2 %v5155_v32  ;;  %2134 = vmatmul.f32.gmra.mxu3 %v5162_v36 }
 0x165   : > { %2175 = vmatmul.f32.gmra.mxu0 %v5165_v61  ;;  %v5213_v29 = vsel %vm1925_vm1, %v1989_v11, %v1990_v0  ;;  %2553 = vmatpush.msra.mxu2 %v5204_v22  ;;  %v1969_v11 = vrot.slane %v1846_v53, 2  ;;  %v5256_v0 = vld [vmem:[%s5633_s3 + $0xcd0] sm:$0xff]  ;;  %v3082_v53 = vld [vmem:[%s5633_s3 + $0x880] sm:$0xff] }
 0x166   : > { %2364 = vmatpush.msra.mxu3 %v3084_v51  ;;  %2480 = vmatpush.msra.mxu0 %v3100_v21  ;;  %v5290_v51 = vld [vmem:[%s5633_s3 + $0xcc8] sm:$0xff] }
 0x167   : > { %v1366_v35 = vpop.f32.mrf.mxu2  ;;  %v1395_v4 = vpop.f32.mrf.mxu3  ;;  %3169 = vmatpush.msra.mxu1 %v5256_v0 }
 0x168   : > { %v5208_v63 = vadd.f32 %v1366_v35, %v1325_v46  ;;  %v1396_v23 = vadd.f32 %v1395_v4, %v5017_v16  ;;  %v1328_v42 = vpop.f32.mrf.mxu1  ;;  %v1842_v46 = vld [vmem:[#allocation2 + $0x18] sm:$0xfc]  ;;  %v1845_v16 = vld [vmem:[#allocation2 + $0xa0] sm:$0x3]  ;;  %2365 = vmatpush.msra.mxu3 %v3083_v45  ;;  %v3099_v35 = vld [vmem:[%s5633_s3 + $0xc08] sm:$0xff] }
 0x169   : > { %v1965_v19 = vrot.slane %v1842_v46, 2  ;;  %v1966_v44 = vrot.slane %v1845_v16, 2  ;;  %v1851_v46 = vld [vmem:[#allocation2 + $0x8] sm:$0x3]  ;;  %2481 = vmatpush.msra.mxu0 %v3099_v35  ;;  %3170 = vmatpush.msra.mxu1 %v5290_v51 }
 0x16a   : > { %v5217_v48 = vpop.f32.mrf.mxu0  ;;  %v5226_v37 = vadd.f32 %v1396_v23, %v4900_v2  ;;  %v5243_v2 = vld [vmem:[%s5633_s3 + $0xd50] sm:$0xff]  ;;  %v1975_v21 = vrot.slane %v1851_v46, 2  ;;  %2366 = vmatpush.msra.mxu3 %v3082_v53 }
 0x16b   : > { %1805 = vmatmul.f32.gmra.mxu1 %v1633_v15  ;;  %2554 = vmatpush.msra.mxu2 %v5243_v2  ;;  %v5276_v23 = vsel %vm1925_vm1, %v1965_v19, %v1966_v44  ;;  %v1848_v15 = vld [vmem:[#allocation2 + $0x68] sm:$0xfc]  ;;  %v1978_v44 = vrot.slane %v1852_v41, 2  ;;  %v1855_v41 = vld [vmem:[#allocation2 + $0xb8] sm:$0xfc] }
 0x16c   : > { %2108 = vmatmul.f32.gmra.mxu2 %v5213_v29  ;;  %2137 = vmatmul.f32.gmra.mxu3 %v5220_v26  ;;  %v1974_v45 = vrot.slane %v1848_v15, 2  ;;  %v1858_v53 = vld [vmem:[#allocation2 + $0x150] sm:$0x3] }
 0x16d   : > { %2178 = vmatmul.f32.gmra.mxu0 %v5223_v49  ;;  %2555 = vmatpush.msra.mxu2 %v5261_v27 }
 0x16e   : > { %3180 = vmatpush.msrb.mxu3 %v5087_v7  ;;  %v5328_v15 = vsel %vm1925_vm1, %v1974_v45, %v1975_v21  ;;  %v5336_v7 = vld [vmem:[%s5633_s3 + $0xcb8] sm:$0xff]  ;;  %v1986_v21 = vrot.slane %v1855_v41, 2  ;;  %v1864_v41 = vld [vmem:[#allocation2 + $0x1b0] sm:$0x3] }
 0x16f   : > { %v1369_v30 = vpop.f32.mrf.mxu2  ;;  %v1398_v40 = vpop.f32.mrf.mxu3  ;;  %2556 = vmatpush.msra.mxu2 %v5297_v25 }
 0x170   : > { %v5265_v17 = vadd.f32 %v1369_v30, %v1328_v42  ;;  %v1399_v62 = vadd.f32 %v1398_v40, %v5054_v54  ;;  %v1546_v34 = vpop.f32.mrf.mxu1  ;;  %v5279_v42 = vsel %vm1925_vm1, %v1968_v10, %v1969_v11  ;;  %v1849_v54 = vld [vmem:[#allocation2 + $0x118] sm:$0xfc]  ;;  %3181 = vmatpush.msrb.mxu3 %v5129_v50 }
 0x171   : > { %v1977_v19 = vrot.slane %v1849_v54, 2  ;;  %v5314_v10 = vld [vmem:[%s5633_s3 + $0xd38] sm:$0xff]  ;;  %v1854_v54 = vld [vmem:[#allocation2 + $0x28] sm:$0xfc] }
 0x172   : > { %v5273_v4 = vpop.f32.mrf.mxu0  ;;  %v5282_v16 = vadd.f32 %v1399_v62, %v4937_v31  ;;  %v3098_v31 = vld [vmem:[%s5633_s3 + $0xc00] sm:$0xff]  ;;  %2557 = vmatpush.msra.mxu2 %v5314_v10  ;;  %v1983_v50 = vrot.slane %v1854_v54, 2  ;;  %3182 = vmatpush.msrb.mxu3 %v5147_v3  ;;  %v1860_v54 = vld [vmem:[#allocation2 + $0x128] sm:$0xfc] }
 0x173   : > { %2285 = vmatmul.f32.vlgmr.msrb.gmra.mxu1 %v4946_v1  ;;  %v5307_v1 = vld [vmem:[%s5633_s3 + $0xcc0] sm:$0xff]  ;;  %2482 = vmatpush.msra.mxu0 %v3098_v31  ;;  %v5331_v46 = vsel %vm1925_vm1, %v1977_v19, %v1978_v44  ;;  %v5361_v31 = vld [vmem:[%s5633_s3 + $0xd28] sm:$0xff]  ;;  %v1987_v19 = vrot.slane %v1858_v53, 2  ;;  %v1992_v53 = vrot.slane %v1860_v54, 2 }
 0x174   : > { %2326 = vmatmul.f32.vlgmr.msrb.gmra.mxu2 %v5105_v57  ;;  %2140 = vmatmul.f32.gmra.mxu3 %v5276_v23  ;;  %v1547_v57 = vadd.f32 %v1546_v34, %v5063_v59 }
 0x175   : > { %2181 = vmatmul.f32.gmra.mxu0 %v5279_v42  ;;  %3171 = vmatpush.msra.mxu1 %v5307_v1  ;;  %v5380_v3 = vsel %vm1925_vm1, %v1986_v21, %v1987_v19  ;;  %v1996_v21 = vrot.slane %v1864_v41, 2 }
 0x176   : > { %2508 = vmatpush.msrb.mxu0 %v5124_v9  ;;  %v1857_v9 = vld [vmem:[#allocation2 + $0x1c0] sm:$0x3]  ;;  %3183 = vmatpush.msrb.mxu3 %v5186_v56  ;;  %v1863_v56 = vld [vmem:[#allocation2 + $0x110] sm:$0x3] }
 0x177   : > { %v1587_v11 = vpop.f32.mrf.mxu2  ;;  %v1401_v30 = vpop.f32.mrf.mxu3  ;;  %3172 = vmatpush.msra.mxu1 %v5336_v7 }
 0x178   : > { %v1588_v40 = vadd.f32 %v1587_v11, %v1547_v57  ;;  %v1402_v59 = vadd.f32 %v1401_v30, %v5095_v43  ;;  %v1549_v62 = vpop.f32.mrf.mxu1  ;;  %v5342_v43 = vld [vmem:[%s5633_s3 + $0xd30] sm:$0xff]  ;;  %v1984_v57 = vrot.slane %v1857_v9, 2  ;;  %2509 = vmatpush.msrb.mxu0 %v5142_v38  ;;  %v1861_v9 = vld [vmem:[#allocation2 + $0x1a8] sm:$0xfc]  ;;  %3184 = vmatpush.msrb.mxu3 %v5204_v22 }
 0x179   : > { %2558 = vmatpush.msra.mxu2 %v5342_v43  ;;  %v1550_v45 = vadd.f32 %v1549_v62, %v5102_v39 }
 0x17a   : > { %v5323_v34 = vadd.f32 %v1588_v40, %v5111_v52  ;;  %v5325_v35 = vpop.f32.mrf.mxu0  ;;  %v5345_v52 = vadd.f32 %v1402_v59, %v4971_v5  ;;  %v5356_v5 = vld [vmem:[%s5633_s3 + $0xcb0] sm:$0xff]  ;;  %2510 = vmatpush.msrb.mxu0 %v5181_v8  ;;  %v5377_v62 = vsel %vm1925_vm1, %v1983_v50, %v1984_v57  ;;  %v5385_v8 = vld [vmem:[%s5633_s3 + $0xca8] sm:$0xff]  ;;  %v1995_v57 = vrot.slane %v1861_v9, 2  ;;  %3185 = vmatpush.msrb.mxu3 %v5243_v2 }
 0x17b   : > { %2288 = vmatmul.f32.gmra.mxu1 %v4983_v28  ;;  %2559 = vmatpush.msra.mxu2 %v5361_v31  ;;  %v3116_v2 = vld [vmem:[%s5633_s3 + $0xc90] sm:$0xff] }
 0x17c   : > { %2329 = vmatmul.f32.gmra.mxu2 %v5162_v36  ;;  %2143 = vmatmul.f32.gmra.mxu3 %v5328_v15  ;;  %v5429_v54 = vsel %vm1925_vm1, %v1995_v57, %v1996_v21 }
 0x17d   : > { %2184 = vmatmul.f32.gmra.mxu0 %v5331_v46  ;;  %3173 = vmatpush.msra.mxu1 %v5356_v5 }
 0x17e   : > { %2511 = vmatpush.msrb.mxu0 %v5199_v58  ;;  %v5410_v58 = vld [vmem:[%s5633_s3 + $0xd18] sm:$0xff]  ;;  %3186 = vmatpush.msrb.mxu3 %v5261_v27 }
 0x17f   : > { %v1590_v44 = vpop.f32.mrf.mxu2  ;;  %v1404_v11 = vpop.f32.mrf.mxu3  ;;  %3174 = vmatpush.msra.mxu1 %v5385_v8 }
 0x180   : > { %v1591_v30 = vadd.f32 %v1590_v44, %v1550_v45  ;;  %v1405_v40 = vadd.f32 %v1404_v11, %v5151_v20  ;;  %v1552_v59 = vpop.f32.mrf.mxu1  ;;  %v5390_v20 = vld [vmem:[%s5633_s3 + $0xd20] sm:$0xff]  ;;  %v1993_v45 = vrot.slane %v1863_v56, 2  ;;  %2512 = vmatpush.msrb.mxu0 %v5238_v18  ;;  %v3117_v18 = vld [vmem:[%s5633_s3 + $0xc98] sm:$0xff]  ;;  %3187 = vmatpush.msrb.mxu3 %v5297_v25 }
 0x181   : > { %2560 = vmatpush.msra.mxu2 %v5390_v20  ;;  %v1553_v50 = vadd.f32 %v1552_v59, %v5159_v60  ;;  %v3114_v25 = vld [vmem:[%s5633_s3 + $0xc80] sm:$0xff] }
 0x182   : > { %v5372_v39 = vadd.f32 %v1591_v30, %v5168_v14  ;;  %v5374_v38 = vpop.f32.mrf.mxu0  ;;  %v5394_v14 = vadd.f32 %v1405_v40, %v5008_v12  ;;  %v5405_v12 = vld [vmem:[%s5633_s3 + $0xca0] sm:$0xff]  ;;  %2513 = vmatpush.msrb.mxu0 %v5256_v0  ;;  %v5426_v22 = vsel %vm1925_vm1, %v1992_v53, %v1993_v45  ;;  %v3131_v0 = vld [vmem:[%s5633_s3 + $0xd08] sm:$0xff]  ;;  %3188 = vmatpush.msrb.mxu3 %v5314_v10 }
 0x183   : > { %2291 = vmatmul.f32.gmra.mxu1 %v5021_v33  ;;  %2561 = vmatpush.msra.mxu2 %v5410_v58 }
 0x184   : > { %2332 = vmatmul.f32.gmra.mxu2 %v5220_v26  ;;  %2146 = vmatmul.f32.gmra.mxu3 %v5377_v62 }
 0x185   : > { %2187 = vmatmul.f32.gmra.mxu0 %v5380_v3  ;;  %3175 = vmatpush.msra.mxu1 %v5405_v12 }
 0x186   : > { %2514 = vmatpush.msrb.mxu0 %v5290_v51  ;;  %v3130_v51 = vld [vmem:[%s5633_s3 + $0xd00] sm:$0xff]  ;;  %3189 = vmatpush.msrb.mxu3 %v5342_v43 }
 0x187   : > { %v1593_v19 = vpop.f32.mrf.mxu2  ;;  %v1407_v44 = vpop.f32.mrf.mxu3  ;;  %3176 = vmatpush.msra.mxu1 %v3117_v18 }
 0x188   : > { %v1594_v11 = vadd.f32 %v1593_v19, %v1553_v50  ;;  %v1408_v30 = vadd.f32 %v1407_v44, %v5208_v63  ;;  %v1555_v40 = vpop.f32.mrf.mxu1  ;;  %v3132_v63 = vld [vmem:[%s5633_s3 + $0xd10] sm:$0xff]  ;;  %v3115_v50 = vld [vmem:[%s5633_s3 + $0xc88] sm:$0xff]  ;;  %2515 = vmatpush.msrb.mxu0 %v5307_v1  ;;  %3190 = vmatpush.msrb.mxu3 %v5361_v31  ;;  %v1866_v44 = vld [vmem:[#allocation2 + $0xc0] sm:$0xfc] }
 0x189   : > { %2562 = vmatpush.msra.mxu2 %v3132_v63  ;;  %3177 = vmatpush.msra.mxu1 %v3116_v2 }
 0x18a   : > { %v5421_v60 = vadd.f32 %v1594_v11, %v5226_v37  ;;  %v5423_v59 = vpop.f32.mrf.mxu0  ;;  %v5439_v37 = vadd.f32 %v1408_v30, %v5046_v47  ;;  %v1556_v47 = vadd.f32 %v1555_v40, %v5217_v48  ;;  %2516 = vmatpush.msrb.mxu0 %v5336_v7  ;;  %3191 = vmatpush.msrb.mxu3 %v5390_v20  ;;  %v1865_v20 = vld [vmem:[#allocation2 + $0xc8] sm:$0xfc] }
 0x18b   : > { %2294 = vmatmul.f32.gmra.mxu1 %v5058_v55  ;;  %2563 = vmatpush.msra.mxu2 %v3131_v0 }
 0x18c   : > { %2335 = vmatmul.f32.gmra.mxu2 %v5276_v23  ;;  %2149 = vmatmul.f32.gmra.mxu3 %v5426_v22 }
 0x18d   : > { %2190 = vmatmul.f32.gmra.mxu0 %v5429_v54  ;;  %3178 = vmatpush.msra.mxu1 %v3115_v50 }
 0x18e   : > { %2564 = vmatpush.msra.mxu2 %v3130_v51  ;;  %2517 = vmatpush.msrb.mxu0 %v5356_v5 }
 0x18f   : > { %v1596_v27 = vpop.f32.mrf.mxu2  ;;  %v1410_v56 = vpop.f32.mrf.mxu3  ;;  %3179 = vmatpush.msra.mxu1 %v3114_v25  ;;  %3192 = vmatpush.msrb.mxu3 %v5410_v58  ;;  %v2208_v58 = vrot.slane %v1865_v20, 2 }
 0x190   : > { %v1597_v9 = vadd.f32 %v1596_v27, %v1556_v47  ;;  %v1411_v41 = vadd.f32 %v1410_v56, %v5265_v17  ;;  %v1558_v53 = vpop.f32.mrf.mxu1  ;;  %2518 = vmatpush.msrb.mxu0 %v5385_v8 }
 0x191   : > { %3193 = vmatpush.msrb.mxu3 %v3132_v63 }
 0x192   : > { %v5461_v48 = vadd.f32 %v1597_v9, %v5282_v16  ;;  %v1744_v45 = vpop.f32.mrf.mxu0  ;;  %v5467_v17 = vadd.f32 %v1411_v41, %v5090_v13  ;;  %v1559_v16 = vadd.f32 %v1558_v53, %v5273_v4  ;;  %2519 = vmatpush.msrb.mxu0 %v5405_v12 }
 0x193   : > { %2297 = vmatmul.f32.gmra.mxu1 %v5100_v6  ;;  %3194 = vmatpush.msrb.mxu3 %v3131_v0 }
 0x194   : > { %2338 = vmatmul.f32.gmra.mxu2 %v5328_v15  ;;  %2367 = vmatmul.f32.vlgmr.msra.gmra.mxu3 %v5108_v24 }
 0x195   : > { %2483 = vmatmul.f32.vlgmr.msra.gmra.mxu0 %v4983_v28  ;;  %3195 = vmatpush.msrb.mxu3 %v3130_v51 }
 0x196   : > { %2520 = vmatpush.msrb.mxu0 %v3117_v18 }
 0x197   : > { %v1599_v13 = vpop.f32.mrf.mxu2  ;;  %v1703_v10 = vpop.f32.mrf.mxu3 }
 0x198   : > { %v1600_v1 = vadd.f32 %v1599_v13, %v1559_v16  ;;  %v1745_v7 = vadd.f32 %v1744_v45, %v1703_v10  ;;  %v1561_v57 = vpop.f32.mrf.mxu1  ;;  %2521 = vmatpush.msrb.mxu0 %v3116_v2 }
 0x199   : > { %v1562_v4 = vadd.f32 %v1561_v57, %v5325_v35  ;;  %v1869_v35 = vld [vmem:[#allocation2 + $0x20] sm:$0x3] }
 0x19a   : > { %v5483_v24 = vadd.f32 %v1600_v1, %v5345_v52  ;;  %v1747_v28 = vpop.f32.mrf.mxu0  ;;  %2522 = vmatpush.msrb.mxu0 %v3115_v50  ;;  %v2212_v30 = vrot.slane %v1869_v35, 2 }
 0x19b   : > { %2300 = vmatmul.f32.gmra.mxu1 %v5155_v32 }
 0x19c   : > { %2341 = vmatmul.f32.gmra.mxu2 %v5377_v62  ;;  %2370 = vmatmul.f32.gmra.mxu3 %v5165_v61 }
 0x19d   : > { %2486 = vmatmul.f32.gmra.mxu0 %v5021_v33  ;;  %v1868_v33 = vld [vmem:[#allocation2 + $0xe8] sm:$0x3] }
 0x19e   : > { %v2209_v11 = vrot.slane %v1868_v33, 2  ;;  %2523 = vmatpush.msrb.mxu0 %v3114_v25 }
 0x19f   : > { %v1602_v43 = vpop.f32.mrf.mxu2  ;;  %v1706_v5 = vpop.f32.mrf.mxu3 }
 0x1a0   : > { %v1603_v52 = vadd.f32 %v1602_v43, %v1562_v4  ;;  %v1748_v31 = vadd.f32 %v1747_v28, %v1706_v5  ;;  %v1564_v8 = vpop.f32.mrf.mxu1  ;;  %v2210_v0 = vsel %vm1925_vm1, %v2208_v58, %v2209_v11  ;;  %v1867_v4 = vld [vmem:[#allocation2 + $0x70] sm:$0xfc]  ;;  %v1870_v43 = vld [vmem:[#allocation2 + $0x90] sm:$0x3] }
 0x1a1   : > { %v1565_v21 = vadd.f32 %v1564_v8, %v5374_v38 }
 0x1a2   : > { %v5494_v12 = vadd.f32 %v1603_v52, %v5394_v14  ;;  %v1750_v19 = vpop.f32.mrf.mxu0  ;;  %v2211_v14 = vrot.slane %v1866_v44, 2  ;;  %v1871_v52 = vld [vmem:[#allocation2 + $0x1d0] sm:$0xfc] }
 0x1a3   : > { %2303 = vmatmul.f32.gmra.mxu1 %v5213_v29 }
 0x1a4   : > { %2344 = vmatmul.f32.gmra.mxu2 %v5426_v22  ;;  %2373 = vmatmul.f32.gmra.mxu3 %v5223_v49  ;;  %v5503_v47 = vsel %vm1925_vm1, %v2211_v14, %v2212_v30 }
 0x1a5   : > { %2489 = vmatmul.f32.gmra.mxu0 %v5058_v55 }
 0x1a7   : > { %v1605_v38 = vpop.f32.mrf.mxu2  ;;  %v1709_v18 = vpop.f32.mrf.mxu3 }
 0x1a8   : > { %v1606_v40 = vadd.f32 %v1605_v38, %v1565_v21  ;;  %v1751_v63 = vadd.f32 %v1750_v19, %v1709_v18  ;;  %v1567_v2 = vpop.f32.mrf.mxu1  ;;  %v1875_v18 = vld [vmem:[#allocation2 + $0x130] sm:$0x3] }
 0x1a9   : > { %v1568_v55 = vadd.f32 %v1567_v2, %v5423_v59  ;;  %v1876_v2 = vld [vmem:[#allocation2 + $0x190] sm:$0x3] }
 0x1aa   : > { %v5506_v27 = vadd.f32 %v1606_v40, %v5439_v37  ;;  %v1753_v56 = vpop.f32.mrf.mxu0  ;;  %v1872_v40 = vld [vmem:[#allocation2 + $0x100] sm:$0xfc] }
 0x1ab   : > { %2306 = vmatmul.f32.gmra.mxu1 %v2210_v0 }
 0x1ac   : > { %2347 = vmatmul.f32.gmra.mxu2 %v5503_v47  ;;  %2376 = vmatmul.f32.gmra.mxu3 %v5279_v42 }
 0x1ad   : > { %2492 = vmatmul.f32.gmra.mxu0 %v5100_v6 }
 0x1af   : > { %v1608_v9 = vpop.f32.mrf.mxu2  ;;  %v1712_v53 = vpop.f32.mrf.mxu3 }
 0x1b0   : > { %v1609_v41 = vadd.f32 %v1608_v9, %v1568_v55  ;;  %v1754_v50 = vadd.f32 %v1753_v56, %v1712_v53  ;;  %v1785_v45 = vpop.f32.mrf.mxu1  ;;  %v2413_v55 = vrot.slane %v1876_v2, 2 }
 0x1b1   : > { %v1786_v25 = vadd.f32 %v1785_v45, %v1745_v7 }
 0x1b2   : > { %v5513_v51 = vadd.f32 %v1609_v41, %v5467_v17  ;;  %v1756_v37 = vpop.f32.mrf.mxu0 }
 0x1b3   : > { %v5516_v59 = vadd.f32 %v1786_v25, %v5323_v34  ;;  %2530 = vmatmul.f32.vlgmr.msra.gmra.mxu1 %v5276_v23 }
 0x1b4   : > { %2565 = vmatmul.f32.vlgmr.msra.gmra.mxu2 %v5165_v61  ;;  %2379 = vmatmul.f32.gmra.mxu3 %v5331_v46 }
 0x1b5   : > { %2495 = vmatmul.f32.gmra.mxu0 %v5155_v32 }
 0x1b7   : > { %v5522_v6 = vpop.f32.mrf.mxu2  ;;  %v1715_v16 = vpop.f32.mrf.mxu3 }
 0x1b8   : > { %v1757_v13 = vadd.f32 %v1756_v37, %v1715_v16  ;;  %v1788_v1 = vpop.f32.mrf.mxu1 }
 0x1b9   : > { %v1789_v10 = vadd.f32 %v1788_v1, %v1748_v31 }
 0x1ba   : > { %v1759_v17 = vpop.f32.mrf.mxu0 }
 0x1bb   : > { %v5525_v7 = vadd.f32 %v1789_v10, %v5372_v39  ;;  %2533 = vmatmul.f32.gmra.mxu1 %v5328_v15  ;;  %v1874_v39 = vld [vmem:[#allocation2 + $0x10] sm:$0x3]  ;;  %v2406_v15 = vrot.slane %v1871_v52, 2 }
 0x1bc   : > { %2568 = vmatmul.f32.gmra.mxu2 %v5223_v49  ;;  %2382 = vmatmul.f32.gmra.mxu3 %v5380_v3  ;;  %v2215_v49 = vrot.slane %v1870_v43, 2  ;;  %v2407_v31 = vrot.slane %v1874_v39, 2 }
 0x1bd   : > { %2498 = vmatmul.f32.gmra.mxu0 %v5213_v29  ;;  %v2214_v29 = vrot.slane %v1867_v4, 2 }
 0x1be   : > { %v2408_v35 = vsel %vm1925_vm1, %v2406_v15, %v2407_v31 }
 0x1bf   : > { %v5531_v61 = vpop.f32.mrf.mxu2  ;;  %v1718_v32 = vpop.f32.mrf.mxu3 }
 0x1c0   : > { %v1760_v23 = vadd.f32 %v1759_v17, %v1718_v32  ;;  %v1791_v34 = vpop.f32.mrf.mxu1 }
 0x1c1   : > { %v1792_v28 = vadd.f32 %v1791_v34, %v1751_v63  ;;  %v1873_v63 = vld [vmem:[#allocation2 + $0x168] sm:$0xfc] }
 0x1c2   : > { %v1762_v57 = vpop.f32.mrf.mxu0 }
 0x1c3   : > { %v5534_v5 = vadd.f32 %v1792_v28, %v5421_v60  ;;  %2536 = vmatmul.f32.gmra.mxu1 %v5377_v62  ;;  %v2216_v60 = vsel %vm1925_vm1, %v2214_v29, %v2215_v49 }
 0x1c4   : > { %2571 = vmatmul.f32.gmra.mxu2 %v5279_v42  ;;  %2385 = vmatmul.f32.gmra.mxu3 %v5429_v54 }
 0x1c5   : > { %2501 = vmatmul.f32.gmra.mxu0 %v2210_v0 }
 0x1c7   : > { %v2094_v8 = vpop.f32.mrf.mxu2  ;;  %v1721_v20 = vpop.f32.mrf.mxu3 }
 0x1c8   : > { %v1763_v21 = vadd.f32 %v1762_v57, %v1721_v20  ;;  %v1794_v19 = vpop.f32.mrf.mxu1 }
 0x1c9   : > { %v1795_v44 = vadd.f32 %v1794_v19, %v1754_v50 }
 0x1ca   : > { %v1765_v33 = vpop.f32.mrf.mxu0 }
 0x1cb   : > { %v5542_v62 = vadd.f32 %v1795_v44, %v5461_v48  ;;  %2539 = vmatmul.f32.gmra.mxu1 %v5426_v22  ;;  %v2410_v22 = vrot.slane %v1875_v18, 2  ;;  %v2412_v48 = vrot.slane %v1873_v63, 2 }
 0x1cc   : > { %2574 = vmatmul.f32.gmra.mxu2 %v5331_v46  ;;  %2388 = vmatmul.f32.gmra.mxu3 %v2216_v60  ;;  %v2409_v46 = vrot.slane %v1872_v40, 2 }
 0x1cd   : > { %2504 = vmatmul.f32.gmra.mxu0 %v2408_v35 }
 0x1ce   : > { %v2411_v50 = vsel %vm1925_vm1, %v2409_v46, %v2410_v22 }
 0x1cf   : > { %v2097_v42 = vpop.f32.mrf.mxu2  ;;  %v1724_v58 = vpop.f32.mrf.mxu3 }
 0x1d0   : > { %v1766_v11 = vadd.f32 %v1765_v33, %v1724_v58  ;;  %v1797_v14 = vpop.f32.mrf.mxu1 }
 0x1d1   : > { %v1798_v30 = vadd.f32 %v1797_v14, %v1757_v13 }
 0x1d2   : > { %v2170_v38 = vpop.f32.mrf.mxu0 }
 0x1d3   : > { %v1813_v0 = vadd.f32 %v1798_v30, %v5483_v24  ;;  %2542 = vmatmul.f32.gmra.mxu1 %v5503_v47  ;;  %v2414_v47 = vsel %vm1925_vm1, %v2412_v48, %v2413_v55 }
 0x1d4   : > { %2577 = vmatmul.f32.gmra.mxu2 %v5380_v3  ;;  %2583 = vmatmul.f32.vlgmr.msrb.gmra.mxu3 %v2216_v60 }
 0x1d5   : > { %2524 = vmatmul.f32.vlgmr.msrb.gmra.mxu0 %v5162_v36 }
 0x1d7   : > { %v2100_v56 = vpop.f32.mrf.mxu2  ;;  %v2129_v9 = vpop.f32.mrf.mxu3 }
 0x1d8   : > { %v2130_v41 = vadd.f32 %v2129_v9, %v5522_v6  ;;  %v1800_v53 = vpop.f32.mrf.mxu1 }
 0x1d9   : > { %v1801_v45 = vadd.f32 %v1800_v53, %v1760_v23 }
 0x1da   : > { %v2173_v24 = vpop.f32.mrf.mxu0  ;;  %v2171_v37 = vadd.f32 %v2170_v38, %v2130_v41 }
 0x1db   : > { %v1814_v3 = vadd.f32 %v1801_v45, %v5494_v12  ;;  %2545 = vmatmul.f32.gmra.mxu1 %v2411_v50 }
 0x1dc   : > { %2580 = vmatmul.f32.gmra.mxu2 %v5429_v54  ;;  %2586 = vmatmul.f32.gmra.mxu3 %v2414_v47  ;;  %v2194_v36 = vadd.f32 %v2171_v37, %v5516_v59 }
 0x1dd   : > { %2527 = vmatmul.f32.gmra.mxu0 %v5220_v26 }
 0x1df   : > { %v2103_v25 = vpop.f32.mrf.mxu2  ;;  %v2132_v6 = vpop.f32.mrf.mxu3 }
 0x1e0   : > { %v2133_v16 = vadd.f32 %v2132_v6, %v5531_v61  ;;  %v1803_v13 = vpop.f32.mrf.mxu1 }
 0x1e1   : > { %v1804_v1 = vadd.f32 %v1803_v13, %v1763_v21 }
 0x1e2   : > { %v2176_v17 = vpop.f32.mrf.mxu0  ;;  %v2174_v10 = vadd.f32 %v2173_v24, %v2133_v16 }
 0x1e3   : > { %v1815_v32 = vadd.f32 %v1804_v1, %v5506_v27 }
 0x1e4   : > { %v2195_v12 = vadd.f32 %v2174_v10, %v5525_v7 }
 0x1e7   : > { %v2106_v23 = vpop.f32.mrf.mxu2  ;;  %v2135_v34 = vpop.f32.mrf.mxu3 }
 0x1e8   : > { %v2136_v54 = vadd.f32 %v2135_v34, %v2094_v8  ;;  %v1806_v57 = vpop.f32.mrf.mxu1 }
 0x1e9   : > { %v1807_v26 = vadd.f32 %v1806_v57, %v1766_v11 }
 0x1ea   : > { %v2179_v28 = vpop.f32.mrf.mxu0  ;;  %v2177_v4 = vadd.f32 %v2176_v17, %v2136_v54 }
 0x1eb   : > { %v1816_v59 = vadd.f32 %v1807_v26, %v5513_v51 }
 0x1ec   : > { %v5562_v43 = vadd.f32 %v2177_v4, %v5534_v5 }
 0x1ef   : > { %v2109_v61 = vpop.f32.mrf.mxu2  ;;  %v2138_v52 = vpop.f32.mrf.mxu3 }
 0x1f0   : > { %v2139_v39 = vadd.f32 %v2138_v52, %v2097_v42  ;;  %v2286_v29 = vpop.f32.mrf.mxu1 }
 0x1f2   : > { %v2182_v49 = vpop.f32.mrf.mxu0  ;;  %v2180_v27 = vadd.f32 %v2179_v28, %v2139_v39 }
 0x1f4   : > { %v5565_v7 = vadd.f32 %v2180_v27, %v5542_v62 }
 0x1f7   : > { %v2327_v15 = vpop.f32.mrf.mxu2  ;;  %v2141_v31 = vpop.f32.mrf.mxu3 }
 0x1f8   : > { %v2328_v8 = vadd.f32 %v2327_v15, %v2286_v29  ;;  %v2142_v20 = vadd.f32 %v2141_v31, %v2100_v56  ;;  %v2289_v21 = vpop.f32.mrf.mxu1 }
 0x1fa   : > { %v2185_v19 = vpop.f32.mrf.mxu0  ;;  %v2183_v33 = vadd.f32 %v2182_v49, %v2142_v20 }
 0x1fc   : > { %v5567_v51 = vadd.f32 %v2183_v33, %v1813_v0 }
 0x1ff   : > { %v2330_v5 = vpop.f32.mrf.mxu2  ;;  %v2144_v44 = vpop.f32.mrf.mxu3 }
 0x200   : > { %v2331_v60 = vadd.f32 %v2330_v5, %v2289_v21  ;;  %v2145_v35 = vadd.f32 %v2144_v44, %v2103_v25  ;;  %v2292_v42 = vpop.f32.mrf.mxu1 }
 0x202   : > { %v2188_v58 = vpop.f32.mrf.mxu0  ;;  %v2186_v11 = vadd.f32 %v2185_v19, %v2145_v35 }
 0x204   : > { %v5569_v14 = vadd.f32 %v2186_v11, %v1814_v3 }
 0x207   : > { %v2333_v62 = vpop.f32.mrf.mxu2  ;;  %v2147_v30 = vpop.f32.mrf.mxu3 }
 0x208   : > { %v2148_v38 = vadd.f32 %v2147_v30, %v2106_v23  ;;  %v2295_v40 = vpop.f32.mrf.mxu1  ;;  %v2334_v52 = vadd.f32 %v2333_v62, %v2292_v42 }
 0x20a   : > { %v2191_v18 = vpop.f32.mrf.mxu0  ;;  %v2189_v63 = vadd.f32 %v2188_v58, %v2148_v38 }
 0x20c   : > { %v5571_v2 = vadd.f32 %v2189_v63, %v1815_v32 }
 0x20f   : > { %v2336_v46 = vpop.f32.mrf.mxu2  ;;  %v2150_v0 = vpop.f32.mrf.mxu3 }
 0x210   : > { %v2151_v22 = vadd.f32 %v2150_v0, %v2109_v61  ;;  %v2298_v48 = vpop.f32.mrf.mxu1  ;;  %v2337_v21 = vadd.f32 %v2336_v46, %v2295_v40 }
 0x212   : > { %v2484_v55 = vpop.f32.mrf.mxu0  ;;  %v2192_v56 = vadd.f32 %v2191_v18, %v2151_v22 }
 0x214   : > { %v5573_v9 = vadd.f32 %v2192_v56, %v1816_v59 }
 0x217   : > { %v2339_v41 = vpop.f32.mrf.mxu2  ;;  %v2368_v53 = vpop.f32.mrf.mxu3 }
 0x218   : > { %v2369_v50 = vadd.f32 %v2368_v53, %v2328_v8  ;;  %v5575_v45 = vpop.f32.mrf.mxu1  ;;  %v2340_v11 = vadd.f32 %v2339_v41, %v2298_v48 }
 0x21a   : > { %v5577_v24 = vpop.f32.mrf.mxu0  ;;  %v2392_v47 = vadd.f32 %v2369_v50, %v2194_v36 }
 0x21f   : > { %v5579_v37 = vpop.f32.mrf.mxu2  ;;  %v2371_v3 = vpop.f32.mrf.mxu3 }
 0x220   : > { %v2372_v25 = vadd.f32 %v2371_v3, %v2331_v60  ;;  %v2304_v6 = vpop.f32.mrf.mxu1 }
 0x222   : > { %v2490_v16 = vpop.f32.mrf.mxu0  ;;  %v5581_v13 = vadd.f32 %v2372_v25, %v2195_v12 }
 0x227   : > { %v2345_v1 = vpop.f32.mrf.mxu2  ;;  %v2374_v17 = vpop.f32.mrf.mxu3 }
 0x228   : > { %v5583_v10 = vpop.f32.mrf.mxu1  ;;  %v2375_v29 = vadd.f32 %v2374_v17, %v2334_v52  ;;  %v2346_v40 = vadd.f32 %v2345_v1, %v2304_v6 }
 0x22a   : > { %v2493_v32 = vpop.f32.mrf.mxu0  ;;  %v2394_v15 = vadd.f32 %v2375_v29, %v5562_v43 }
 0x22f   : > { %v2348_v23 = vpop.f32.mrf.mxu2  ;;  %v2377_v34 = vpop.f32.mrf.mxu3 }
 0x230   : > { %v2531_v54 = vpop.f32.mrf.mxu1  ;;  %v2378_v5 = vadd.f32 %v2377_v34, %v2337_v21 }
 0x231   : > { %v2532_v49 = vadd.f32 %v2531_v54, %v2490_v16 }
 0x232   : > { %v2496_v36 = vpop.f32.mrf.mxu0  ;;  %v2395_v43 = vadd.f32 %v2378_v5, %v5565_v7 }
 0x237   : > { %v2566_v57 = vpop.f32.mrf.mxu2  ;;  %v2380_v26 = vpop.f32.mrf.mxu3 }
 0x238   : > { %v2534_v28 = vpop.f32.mrf.mxu1  ;;  %v2381_v63 = vadd.f32 %v2380_v26, %v2340_v11 }
 0x239   : > { %v2535_v60 = vadd.f32 %v2534_v28, %v2493_v32  ;;  %v2349_v32 = vadd.f32 %v2348_v23, %v5583_v10 }
 0x23a   : > { %v5585_v4 = vpop.f32.mrf.mxu0  ;;  %v2396_v7 = vadd.f32 %v2381_v63, %v5567_v51 }
 0x23f   : > { %v2569_v59 = vpop.f32.mrf.mxu2  ;;  %v2383_v12 = vpop.f32.mrf.mxu3 }
 0x240   : > { %v2537_v61 = vpop.f32.mrf.mxu1 }
 0x241   : > { %v2538_v56 = vadd.f32 %v2537_v61, %v2496_v36 }
 0x242   : > { %v2502_v39 = vpop.f32.mrf.mxu0 }
 0x247   : > { %v2572_v27 = vpop.f32.mrf.mxu2  ;;  %v2386_v31 = vpop.f32.mrf.mxu3 }
 0x248   : > { %v2573_v8 = vadd.f32 %v2572_v27, %v2532_v49  ;;  %v2540_v20 = vpop.f32.mrf.mxu1  ;;  %v2387_v0 = vadd.f32 %v2386_v31, %v2346_v40 }
 0x249   : > { %v2541_v28 = vadd.f32 %v2540_v20, %v5585_v4 }
 0x24a   : > { %v2592_v19 = vadd.f32 %v2573_v8, %v2394_v15  ;;  %v2505_v33 = vpop.f32.mrf.mxu0  ;;  %v2398_v48 = vadd.f32 %v2387_v0, %v5571_v2 }
 0x24c   : > { %v2600_v44 = vmax.f32 %v2592_v19, 0.0 }
 0x24e   : > { %2608 = vst [vmem:[%s5594_s25 + $0x10] sm:$0xff] %v2600_v44 }
 0x24f   : > { %v2575_v35 = vpop.f32.mrf.mxu2  ;;  %v2389_v42 = vpop.f32.mrf.mxu3 }
 0x250   : > { %v2576_v58 = vadd.f32 %v2575_v35, %v2535_v60  ;;  %v2543_v38 = vpop.f32.mrf.mxu1 }
 0x251   : > { %v2544_v50 = vadd.f32 %v2543_v38, %v2502_v39 }
 0x252   : > { %v2593_v62 = vadd.f32 %v2576_v58, %v2395_v43  ;;  %v2525_v30 = vpop.f32.mrf.mxu0 }
 0x253   : > { %v2526_v18 = vadd.f32 %v2525_v30, %v2484_v55  ;;  %v2343_v55 = vadd.f32 %v5579_v37, %v5575_v45 }
 0x254   : > { %v2601_v46 = vmax.f32 %v2593_v62, 0.0 }
 0x255   : > { %v2567_v22 = vadd.f32 %v2566_v57, %v2526_v18  ;;  %v2384_v51 = vadd.f32 %v2383_v12, %v2343_v55  ;;  %v2390_v57 = vadd.f32 %v2389_v42, %v2349_v32 }
 0x256   : > { %2609 = vst [vmem:[%s5594_s25 + $0x18] sm:$0xff] %v2601_v46 }
 0x257   : > { %v2590_v53 = vadd.f32 %v2567_v22, %v2392_v47  ;;  %v2578_v3 = vpop.f32.mrf.mxu2  ;;  %v2584_v16 = vpop.f32.mrf.mxu3  ;;  %v2397_v23 = vadd.f32 %v2384_v51, %v5569_v14  ;;  %v2399_v61 = vadd.f32 %v2390_v57, %v5573_v9 }
 0x258   : > { %v2579_v25 = vadd.f32 %v2578_v3, %v2538_v56  ;;  %v2585_v6 = vadd.f32 %v2584_v16, %v2544_v50  ;;  %v2546_v36 = vpop.f32.mrf.mxu1 }
 0x259   : > { %v2598_v41 = vmax.f32 %v2590_v53, 0.0  ;;  %v2547_v37 = vadd.f32 %v2546_v36, %v2505_v33 }
 0x25a   : > { %v2594_v1 = vadd.f32 %v2579_v25, %v2396_v7  ;;  %v2528_v17 = vpop.f32.mrf.mxu0  ;;  %v2596_v47 = vadd.f32 %v2585_v6, %v2398_v48 }
 0x25b   : > { %2606 = vst [vmem:[%s5594_s25] sm:$0xff] %v2598_v41  ;;  %v2529_v34 = vadd.f32 %v2528_v17, %v5577_v24 }
 0x25c   : > { %v2602_v54 = vmax.f32 %v2594_v1, 0.0  ;;  %v2604_v2 = vmax.f32 %v2596_v47, 0.0 }
 0x25d   : > { %v2570_v26 = vadd.f32 %v2569_v59, %v2529_v34 }
 0x25e   : > { %2610 = vst [vmem:[%s5594_s25 + $0x20] sm:$0xff] %v2602_v54 }
 0x25f   : > { %2612 = vst [vmem:[%s5594_s25 + $0x30] sm:$0xff] %v2604_v2  ;;  %v2591_v45 = vadd.f32 %v2570_v26, %v5581_v13  ;;  %v2581_v10 = vpop.f32.mrf.mxu2  ;;  %v2587_v12 = vpop.f32.mrf.mxu3 }
 0x260   : > { %v2582_v24 = vadd.f32 %v2581_v10, %v2541_v28  ;;  %v2588_v39 = vadd.f32 %v2587_v12, %v2547_v37 }
 0x261   : > { %v2599_v52 = vmax.f32 %v2591_v45, 0.0 }
 0x262   : > { %v2595_v29 = vadd.f32 %v2582_v24, %v2397_v23  ;;  %v2597_v59 = vadd.f32 %v2588_v39, %v2399_v61 }
 0x263   : > { %2607 = vst [vmem:[%s5594_s25 + $0x8] sm:$0xff] %v2599_v52 }
 0x264   : > { %v2603_v4 = vmax.f32 %v2595_v29, 0.0  ;;  %v2605_v49 = vmax.f32 %v2597_v59, 0.0 }
 0x266   : > { %2611 = vst [vmem:[%s5594_s25 + $0x28] sm:$0xff] %v2603_v4 }
 0x267   : > { %2613 = vst [vmem:[%s5594_s25 + $0x38] sm:$0xff] %v2605_v49 }
 0x268 PF: > { %s15_s22 = sadd.s32 1, %s3279_s22   ;;  %s5637_s18 = smov %s3271_s20 }
 0x269   : > { %p12_p10 = scmp.ge.s32.totalorder %s15_s22, 18   ;;  %s5638_s19 = smov %s3275_s21 }
 0x26a   : > { %s5639_s20 = smov %s5642_s23  ;;  %s5640_s21 = smov %s5646_s24 }
 0x26b   :  { %14 = sbr.rel (!%p12_p10) target bundleno = 3 (0x3), region = 84 }

</bundles_post_ra>
